<compile_context>
chip_gen: v5e
topology: v5e:2x2
jax: 0.10.0
libtpu: 0.0.40
codegen_flags: <defaults>
</compile_context>

<pallas_src>
import jax
import jax.numpy as jnp
import numpy as np
from jax.experimental import pallas as pl
from jax.experimental.pallas import tpu as pltpu

LATENT_SIZE = 13                     # dims[0] = latent_size + 3 = 16
HIDDEN = 32
NUM_HIDDEN = 6                       # dims = [16, 32,32,32,32,32,32, 1]
LATENT_IN = (4,)                     # PyTorch default latent_in=[4]
D0 = LATENT_SIZE + 3                 # 16
X3_W = HIDDEN - D0                   # width of x entering layer 4 before re-concat (16)


def build_layer_shapes():
    """Replicates DeepSDF.__init__ layer-dimension logic (defaults)."""
    dims = [D0] + [HIDDEN] * NUM_HIDDEN + [1]
    num_layers = len(dims)            # 8 -> layers 0..6
    shapes = []
    for layer in range(num_layers - 1):
        in_dim = dims[layer]
        if layer + 1 in LATENT_IN:
            out_dim = dims[layer + 1] - dims[0]   # lin3: 32 -> 16
        else:
            out_dim = dims[layer + 1]
        shapes.append((in_dim, out_dim))
    return shapes


NUM_LIN = len(build_layer_shapes())   # 7


def deepsdf_kernel(x_ref, b0e_ref, b4e_ref,
                   w0x_ref, w1_ref, b1_ref, w2_ref, b2_ref, w3_ref, b3_ref,
                   w4a_ref, w4x_ref, w5_ref, b5_ref, w6_ref, b6_ref,
                   o_ref):
    """One packed tile: (tm//G, 4*G) xyz -> (tm//G, G) SDF values."""
    bf16 = jnp.bfloat16
    xyz = x_ref[...]                                        # (R, 4G) bf16 (4th coord = 0 pad)

    def lin(a_bf16, w_ref, bias_f32):                       # MXU matmul, f32 accumulation
        return jnp.dot(a_bf16, w_ref[...],
                       preferred_element_type=jnp.float32) + bias_f32

    # layer 0: latent @ W0_lat + b0 is pre-folded into the per-batch bias b0_eff
    h = jnp.maximum(lin(xyz, w0x_ref, b0e_ref[...]), 0.0)
    h = jnp.maximum(lin(h.astype(bf16), w1_ref, b1_ref[...]), 0.0)
    h = jnp.maximum(lin(h.astype(bf16), w2_ref, b2_ref[...]), 0.0)
    h = jnp.maximum(lin(h.astype(bf16), w3_ref, b3_ref[...]), 0.0)
    # layer 4 (latent_in): cat([x, input]) @ W4 == x@W4a + xyzt@W4x + (latent@W4lat + b4)
    h = lin(h.astype(bf16), w4a_ref, b4e_ref[...]) + \
        jnp.dot(xyz, w4x_ref[...], preferred_element_type=jnp.float32)
    h = jnp.maximum(h, 0.0)
    h = jnp.maximum(lin(h.astype(bf16), w5_ref, b5_ref[...]), 0.0)
    h = lin(h.astype(bf16), w6_ref, b6_ref[...])
    # use_tanh=False so no pre-tanh; final self.th tanh always applied.
    o_ref[...] = jnp.tanh(h)


def _block_diag(w, G):
    """Stack the same (in,out) weight G times along the diagonal -> (in*G, out*G)."""
    return jnp.kron(jnp.eye(G, dtype=jnp.float32), w)


def deepsdf_forward(xyzt, latent, weights, biases, *, tm=1024, G=8):
    """xyzt: (bs, n, 3) f32, latent: (bs, LATENT_SIZE) f32 -> (bs, n) f32."""
    bs, n, _ = xyzt.shape
    tm = min(tm, n)
    assert n % tm == 0, "n must be a multiple of the row tile"
    assert tm % G == 0 and (tm // G) % 8 == 0, "tile must pack into (8,128) layout"
    R = tm // G                       # packed rows per tile
    nt = n // tm
    WG = HIDDEN * G
    bf16 = jnp.bfloat16

    w0, w4 = weights[0], weights[4]

    # Fold latent contributions into per-batch effective biases (exact, f32, tiny XLA op).
    b0e = latent.astype(jnp.float32) @ w0[:LATENT_SIZE, :] + biases[0]            # (bs, 32)
    b4e = latent.astype(jnp.float32) @ w4[X3_W:X3_W + LATENT_SIZE, :] + biases[4]  # (bs, 32)
    b0e_p = jnp.tile(b0e[:, None, :], (1, 1, G))                                   # (bs,1,32G)
    b4e_p = jnp.tile(b4e[:, None, :], (1, 1, G))

    # Pad xyz rows 3 -> 4 (zero) so packed K = 4*G stays MXU/layout friendly.
    def pad_xyz_rows(w_xyz):                                  # (3, 32) -> (4, 32)
        return jnp.pad(w_xyz, ((0, 1), (0, 0)))

    def pack_w(w):                                            # block-diag + bf16
        return _block_diag(w, G).astype(bf16)

    def pack_b(b):                                            # (1,out) -> (1,out*G), f32
        return jnp.tile(b, (1, G)).astype(jnp.float32)

    w0x_p = pack_w(pad_xyz_rows(w0[LATENT_SIZE:, :]))         # (4G, 32G)
    w1_p, w2_p, w3_p = pack_w(weights[1]), pack_w(weights[2]), pack_w(weights[3])
    w4a_p = pack_w(w4[:X3_W, :])                              # (16G, 32G)
    w4x_p = pack_w(pad_xyz_rows(w4[X3_W + LATENT_SIZE:, :]))  # (4G, 32G)
    w5_p, w6_p = pack_w(weights[5]), pack_w(weights[6])       # (32G,32G), (32G, G)
    b1_p, b2_p, b3_p = pack_b(biases[1]), pack_b(biases[2]), pack_b(biases[3])
    b5_p, b6_p = pack_b(biases[5]), pack_b(biases[6])

    # Pack G consecutive points into one lane-row; bf16 halves input DMA bytes.
    x_pad = jnp.pad(xyzt, ((0, 0), (0, 0), (0, 1)))           # (bs, n, 4)
    x_p = x_pad.reshape(bs, n // G, 4 * G).astype(bf16)

    static_params = [w0x_p, w1_p, b1_p, w2_p, b2_p, w3_p, b3_p,
                     w4a_p, w4x_p, w5_p, b5_p, w6_p, b6_p]

    in_specs = [
        pl.BlockSpec((None, R, 4 * G), lambda b, t: (b, t, 0)),   # packed xyzt tile
        pl.BlockSpec((None, 1, WG), lambda b, t: (b, 0, 0)),      # per-batch b0_eff
        pl.BlockSpec((None, 1, WG), lambda b, t: (b, 0, 0)),      # per-batch b4_eff
    ]
    for p in static_params:                                       # all 2-D, VMEM-resident
        in_specs.append(pl.BlockSpec(p.shape, lambda b, t: (0, 0)))

    out = pl.pallas_call(
        deepsdf_kernel,
        out_shape=jax.ShapeDtypeStruct((bs, n // G, G), jnp.float32),
        grid_spec=pltpu.PrefetchScalarGridSpec(
            num_scalar_prefetch=0,
            grid=(bs, nt),
            in_specs=in_specs,
            out_specs=pl.BlockSpec((None, R, G), lambda b, t: (b, t, 0)),
        ),
        compiler_params=pltpu.CompilerParams(
            dimension_semantics=("parallel", "parallel")),
    )(x_p, b0e_p, b4e_p, *static_params)

    # (bs, n//G, G) row-major == original point order; matches x.squeeze(2) in PyTorch.
    return out.reshape(bs, n)


def reference_forward(xyzt, latent, weights, biases):
    """Plain-JAX f32 reference mirroring the PyTorch forward (eval mode)."""
    bs, n, _ = xyzt.shape
    lat = jnp.broadcast_to(latent[:, None, :], (bs, n, latent.shape[-1]))
    inp = jnp.concatenate([lat, xyzt], axis=2).astype(jnp.float32)
    x = inp
    for layer in range(NUM_LIN):
        if layer in LATENT_IN:
            x = jnp.concatenate([x, inp], axis=-1)
        x = x @ weights[layer] + biases[layer]
        if layer < NUM_LIN - 1:
            x = jnp.maximum(x, 0.0)
    return jnp.tanh(x)[..., 0]


def init_params(key):
    """Deterministic init matching nn.Linear default U(-1/sqrt(in), 1/sqrt(in))."""
    weights, biases = [], []
    for (in_dim, out_dim) in build_layer_shapes():
        key, kw, kb = jax.random.split(key, 3)
        bound = 1.0 / np.sqrt(in_dim)
        w = jax.random.uniform(kw, (in_dim, out_dim), jnp.float32, -bound, bound)
        b = jax.random.uniform(kb, (1, out_dim), jnp.float32, -bound, bound)
        weights.append(w)
        biases.append(b)
    return weights, biases
    # TODO(synk): dropout / latent_dropout branches are training-only (defaults
    # dropout=None, latent_dropout=False); eval-mode forward is exact as-is.


if __name__ == "__main__":
    key = jax.random.PRNGKey(0)
    key, kx, kl, kp = jax.random.split(key, 4)

    bs, n = 2, 2048
    xyzt = jax.random.normal(kx, (bs, n, 3), jnp.float32)
    latent = jax.random.normal(kl, (bs, LATENT_SIZE), jnp.float32)
    weights, biases = init_params(kp)

    # tm=1024 keeps a (2, 2) grid at this demo size (>= 2 tiles per v7x TensorCore dim);
    # G=8 packs the 32-wide hiddens to 256 lanes (use G=4 on v5e).
    out = deepsdf_forward(xyzt, latent, weights, biases, tm=1024, G=8)
    out = jax.block_until_ready(out)

    ref = jax.block_until_ready(reference_forward(xyzt, latent, weights, biases))
    # bf16 matmul operands with f32 accumulation: loosen tolerance vs. the f32 reference.
    np.testing.assert_allclose(np.asarray(out), np.asarray(ref), rtol=2e-2, atol=2e-2)
    assert out.shape == (bs, n)
    print("KERNEL_OK")
</pallas_src>

<mosaic_0001>
module attributes {stable_mosaic.version = 11 : i64} {
  func.func @deepsdf_kernel(%arg0: i32, %arg1: i32, %arg2: memref<1x128x32xbf16, #tpu.memory_space<vmem>>, %arg3: memref<1x1x256xf32, #tpu.memory_space<vmem>>, %arg4: memref<1x1x256xf32, #tpu.memory_space<vmem>>, %arg5: memref<32x256xbf16, #tpu.memory_space<vmem>>, %arg6: memref<256x256xbf16, #tpu.memory_space<vmem>>, %arg7: memref<1x256xf32, #tpu.memory_space<vmem>>, %arg8: memref<256x256xbf16, #tpu.memory_space<vmem>>, %arg9: memref<1x256xf32, #tpu.memory_space<vmem>>, %arg10: memref<256x128xbf16, #tpu.memory_space<vmem>>, %arg11: memref<1x128xf32, #tpu.memory_space<vmem>>, %arg12: memref<128x256xbf16, #tpu.memory_space<vmem>>, %arg13: memref<32x256xbf16, #tpu.memory_space<vmem>>, %arg14: memref<256x256xbf16, #tpu.memory_space<vmem>>, %arg15: memref<1x256xf32, #tpu.memory_space<vmem>>, %arg16: memref<256x8xbf16, #tpu.memory_space<vmem>>, %arg17: memref<1x8xf32, #tpu.memory_space<vmem>>, %arg18: memref<1x128x8xf32, #tpu.memory_space<vmem>>) attributes {dimension_semantics = [#tpu.dimension_semantics<parallel>, #tpu.dimension_semantics<parallel>], iteration_bounds = array<i64: 2, 2>, scalar_prefetch = 0 : i64, scratch_operands = 0 : i64, tpu.core_type = #tpu.core_type<tc>, window_params = [{transform_indices = @transform_0, window_bounds = array<i64: 1, 128, 32>}, {transform_indices = @transform_1, window_bounds = array<i64: 1, 1, 256>}, {transform_indices = @transform_2, window_bounds = array<i64: 1, 1, 256>}, {pipeline_mode = #tpu.pipeline_mode<synchronous>, transform_indices = @transform_3, window_bounds = array<i64: 32, 256>}, {pipeline_mode = #tpu.pipeline_mode<synchronous>, transform_indices = @transform_4, window_bounds = array<i64: 256, 256>}, {pipeline_mode = #tpu.pipeline_mode<synchronous>, transform_indices = @transform_5, window_bounds = array<i64: 1, 256>}, {pipeline_mode = #tpu.pipeline_mode<synchronous>, transform_indices = @transform_6, window_bounds = array<i64: 256, 256>}, {pipeline_mode = #tpu.pipeline_mode<synchronous>, transform_indices = @transform_7, window_bounds = array<i64: 1, 256>}, {pipeline_mode = #tpu.pipeline_mode<synchronous>, transform_indices = @transform_8, window_bounds = array<i64: 256, 128>}, {pipeline_mode = #tpu.pipeline_mode<synchronous>, transform_indices = @transform_9, window_bounds = array<i64: 1, 128>}, {pipeline_mode = #tpu.pipeline_mode<synchronous>, transform_indices = @transform_10, window_bounds = array<i64: 128, 256>}, {pipeline_mode = #tpu.pipeline_mode<synchronous>, transform_indices = @transform_11, window_bounds = array<i64: 32, 256>}, {pipeline_mode = #tpu.pipeline_mode<synchronous>, transform_indices = @transform_12, window_bounds = array<i64: 256, 256>}, {pipeline_mode = #tpu.pipeline_mode<synchronous>, transform_indices = @transform_13, window_bounds = array<i64: 1, 256>}, {pipeline_mode = #tpu.pipeline_mode<synchronous>, transform_indices = @transform_14, window_bounds = array<i64: 256, 8>}, {pipeline_mode = #tpu.pipeline_mode<synchronous>, transform_indices = @transform_15, window_bounds = array<i64: 1, 8>}, {transform_indices = @transform_16, window_bounds = array<i64: 1, 128, 8>}]} {
    %c0 = arith.constant 0 : index
    %c0_0 = arith.constant 0 : index
    %c0_1 = arith.constant 0 : index
    %0 = vector.load %arg2[%c0, %c0_0, %c0_1] : memref<1x128x32xbf16, #tpu.memory_space<vmem>>, vector<1x128x32xbf16>
    %1 = vector.shape_cast %0 : vector<1x128x32xbf16> to vector<128x32xbf16>
    %c0_2 = arith.constant 0 : index
    %c0_3 = arith.constant 0 : index
    %c0_4 = arith.constant 0 : index
    %2 = vector.load %arg3[%c0_2, %c0_3, %c0_4] : memref<1x1x256xf32, #tpu.memory_space<vmem>>, vector<1x1x256xf32>
    %3 = vector.shape_cast %2 : vector<1x1x256xf32> to vector<1x256xf32>
    %c0_5 = arith.constant 0 : index
    %c0_6 = arith.constant 0 : index
    %4 = vector.load %arg5[%c0_5, %c0_6] : memref<32x256xbf16, #tpu.memory_space<vmem>>, vector<32x256xbf16>
    %cst = arith.constant dense<0.000000e+00> : vector<128x256xf32>
    %5 = tpu.matmul %1, %4, %cst {dimension_numbers = #tpu.dot_dimension_numbers<[1], [0], [0], [1], [0, 0, 1, 1], [], []>} : vector<128x32xbf16>, vector<32x256xbf16>, vector<128x256xf32> -> vector<128x256xf32>
    %6 = vector.broadcast %3 : vector<1x256xf32> to vector<128x256xf32>
    %7 = arith.addf %5, %6 : vector<128x256xf32>
    %cst_7 = arith.constant 0.000000e+00 : f32
    %8 = vector.broadcast %cst_7 : f32 to vector<128x256xf32>
    %9 = arith.maximumf %7, %8 : vector<128x256xf32>
    %10 = arith.truncf %9 : vector<128x256xf32> to vector<128x256xbf16>
    %c0_8 = arith.constant 0 : index
    %c0_9 = arith.constant 0 : index
    %11 = vector.load %arg7[%c0_8, %c0_9] : memref<1x256xf32, #tpu.memory_space<vmem>>, vector<1x256xf32>
    %c0_10 = arith.constant 0 : index
    %c0_11 = arith.constant 0 : index
    %12 = vector.load %arg6[%c0_10, %c0_11] : memref<256x256xbf16, #tpu.memory_space<vmem>>, vector<256x256xbf16>
    %cst_12 = arith.constant dense<0.000000e+00> : vector<128x256xf32>
    %13 = tpu.matmul %10, %12, %cst_12 {dimension_numbers = #tpu.dot_dimension_numbers<[1], [0], [0], [1], [0, 0, 1, 1], [], []>} : vector<128x256xbf16>, vector<256x256xbf16>, vector<128x256xf32> -> vector<128x256xf32>
    %14 = vector.broadcast %11 : vector<1x256xf32> to vector<128x256xf32>
    %15 = arith.addf %13, %14 : vector<128x256xf32>
    %cst_13 = arith.constant 0.000000e+00 : f32
    %16 = vector.broadcast %cst_13 : f32 to vector<128x256xf32>
    %17 = arith.maximumf %15, %16 : vector<128x256xf32>
    %18 = arith.truncf %17 : vector<128x256xf32> to vector<128x256xbf16>
    %c0_14 = arith.constant 0 : index
    %c0_15 = arith.constant 0 : index
    %19 = vector.load %arg9[%c0_14, %c0_15] : memref<1x256xf32, #tpu.memory_space<vmem>>, vector<1x256xf32>
    %c0_16 = arith.constant 0 : index
    %c0_17 = arith.constant 0 : index
    %20 = vector.load %arg8[%c0_16, %c0_17] : memref<256x256xbf16, #tpu.memory_space<vmem>>, vector<256x256xbf16>
    %cst_18 = arith.constant dense<0.000000e+00> : vector<128x256xf32>
    %21 = tpu.matmul %18, %20, %cst_18 {dimension_numbers = #tpu.dot_dimension_numbers<[1], [0], [0], [1], [0, 0, 1, 1], [], []>} : vector<128x256xbf16>, vector<256x256xbf16>, vector<128x256xf32> -> vector<128x256xf32>
    %22 = vector.broadcast %19 : vector<1x256xf32> to vector<128x256xf32>
    %23 = arith.addf %21, %22 : vector<128x256xf32>
    %cst_19 = arith.constant 0.000000e+00 : f32
    %24 = vector.broadcast %cst_19 : f32 to vector<128x256xf32>
    %25 = arith.maximumf %23, %24 : vector<128x256xf32>
    %26 = arith.truncf %25 : vector<128x256xf32> to vector<128x256xbf16>
    %c0_20 = arith.constant 0 : index
    %c0_21 = arith.constant 0 : index
    %27 = vector.load %arg11[%c0_20, %c0_21] : memref<1x128xf32, #tpu.memory_space<vmem>>, vector<1x128xf32>
    %c0_22 = arith.constant 0 : index
    %c0_23 = arith.constant 0 : index
    %28 = vector.load %arg10[%c0_22, %c0_23] : memref<256x128xbf16, #tpu.memory_space<vmem>>, vector<256x128xbf16>
    %cst_24 = arith.constant dense<0.000000e+00> : vector<128x128xf32>
    %29 = tpu.matmul %26, %28, %cst_24 {dimension_numbers = #tpu.dot_dimension_numbers<[1], [0], [0], [1], [0, 0, 1, 1], [], []>} : vector<128x256xbf16>, vector<256x128xbf16>, vector<128x128xf32> -> vector<128x128xf32>
    %30 = vector.broadcast %27 : vector<1x128xf32> to vector<128x128xf32>
    %31 = arith.addf %29, %30 : vector<128x128xf32>
    %cst_25 = arith.constant 0.000000e+00 : f32
    %32 = vector.broadcast %cst_25 : f32 to vector<128x128xf32>
    %33 = arith.maximumf %31, %32 : vector<128x128xf32>
    %34 = arith.truncf %33 : vector<128x128xf32> to vector<128x128xbf16>
    %c0_26 = arith.constant 0 : index
    %c0_27 = arith.constant 0 : index
    %c0_28 = arith.constant 0 : index
    %35 = vector.load %arg4[%c0_26, %c0_27, %c0_28] : memref<1x1x256xf32, #tpu.memory_space<vmem>>, vector<1x1x256xf32>
    %36 = vector.shape_cast %35 : vector<1x1x256xf32> to vector<1x256xf32>
    %c0_29 = arith.constant 0 : index
    %c0_30 = arith.constant 0 : index
    %37 = vector.load %arg12[%c0_29, %c0_30] : memref<128x256xbf16, #tpu.memory_space<vmem>>, vector<128x256xbf16>
    %cst_31 = arith.constant dense<0.000000e+00> : vector<128x256xf32>
    %38 = tpu.matmul %34, %37, %cst_31 {dimension_numbers = #tpu.dot_dimension_numbers<[1], [0], [0], [1], [0, 0, 1, 1], [], []>} : vector<128x128xbf16>, vector<128x256xbf16>, vector<128x256xf32> -> vector<128x256xf32>
    %39 = vector.broadcast %36 : vector<1x256xf32> to vector<128x256xf32>
    %40 = arith.addf %38, %39 : vector<128x256xf32>
    %c0_32 = arith.constant 0 : index
    %c0_33 = arith.constant 0 : index
    %41 = vector.load %arg13[%c0_32, %c0_33] : memref<32x256xbf16, #tpu.memory_space<vmem>>, vector<32x256xbf16>
    %cst_34 = arith.constant dense<0.000000e+00> : vector<128x256xf32>
    %42 = tpu.matmul %1, %41, %cst_34 {dimension_numbers = #tpu.dot_dimension_numbers<[1], [0], [0], [1], [0, 0, 1, 1], [], []>} : vector<128x32xbf16>, vector<32x256xbf16>, vector<128x256xf32> -> vector<128x256xf32>
    %43 = arith.addf %40, %42 : vector<128x256xf32>
    %cst_35 = arith.constant 0.000000e+00 : f32
    %44 = vector.broadcast %cst_35 : f32 to vector<128x256xf32>
    %45 = arith.maximumf %43, %44 : vector<128x256xf32>
    %46 = arith.truncf %45 : vector<128x256xf32> to vector<128x256xbf16>
    %c0_36 = arith.constant 0 : index
    %c0_37 = arith.constant 0 : index
    %47 = vector.load %arg15[%c0_36, %c0_37] : memref<1x256xf32, #tpu.memory_space<vmem>>, vector<1x256xf32>
    %c0_38 = arith.constant 0 : index
    %c0_39 = arith.constant 0 : index
    %48 = vector.load %arg14[%c0_38, %c0_39] : memref<256x256xbf16, #tpu.memory_space<vmem>>, vector<256x256xbf16>
    %cst_40 = arith.constant dense<0.000000e+00> : vector<128x256xf32>
    %49 = tpu.matmul %46, %48, %cst_40 {dimension_numbers = #tpu.dot_dimension_numbers<[1], [0], [0], [1], [0, 0, 1, 1], [], []>} : vector<128x256xbf16>, vector<256x256xbf16>, vector<128x256xf32> -> vector<128x256xf32>
    %50 = vector.broadcast %47 : vector<1x256xf32> to vector<128x256xf32>
    %51 = arith.addf %49, %50 : vector<128x256xf32>
    %cst_41 = arith.constant 0.000000e+00 : f32
    %52 = vector.broadcast %cst_41 : f32 to vector<128x256xf32>
    %53 = arith.maximumf %51, %52 : vector<128x256xf32>
    %54 = arith.truncf %53 : vector<128x256xf32> to vector<128x256xbf16>
    %c0_42 = arith.constant 0 : index
    %c0_43 = arith.constant 0 : index
    %55 = vector.load %arg17[%c0_42, %c0_43] : memref<1x8xf32, #tpu.memory_space<vmem>>, vector<1x8xf32>
    %c0_44 = arith.constant 0 : index
    %c0_45 = arith.constant 0 : index
    %56 = vector.load %arg16[%c0_44, %c0_45] : memref<256x8xbf16, #tpu.memory_space<vmem>>, vector<256x8xbf16>
    %cst_46 = arith.constant dense<0.000000e+00> : vector<128x8xf32>
    %57 = tpu.matmul %54, %56, %cst_46 {dimension_numbers = #tpu.dot_dimension_numbers<[1], [0], [0], [1], [0, 0, 1, 1], [], []>} : vector<128x256xbf16>, vector<256x8xbf16>, vector<128x8xf32> -> vector<128x8xf32>
    %58 = vector.broadcast %55 : vector<1x8xf32> to vector<128x8xf32>
    %59 = arith.addf %57, %58 : vector<128x8xf32>
    %60 = math.tanh %59 : vector<128x8xf32>
    %c0_47 = arith.constant 0 : index
    %c0_48 = arith.constant 0 : index
    %c0_49 = arith.constant 0 : index
    %61 = vector.load %arg18[%c0_47, %c0_48, %c0_49] : memref<1x128x8xf32, #tpu.memory_space<vmem>>, vector<1x128x8xf32>
    %62 = vector.shape_cast %61 : vector<1x128x8xf32> to vector<128x8xf32>
    %63 = vector.shape_cast %60 : vector<128x8xf32> to vector<1x128x8xf32>
    tpu.vector_store %arg18[%c0_47, %c0_48, %c0_49], %63 {strides = array<i32>} : memref<1x128x8xf32, #tpu.memory_space<vmem>>, vector<1x128x8xf32>,
    return
  }
  func.func @transform_0(%arg0: i32, %arg1: i32) -> (i32, i32, i32) {
    %c0_i32 = arith.constant 0 : i32
    %c0_i32_0 = arith.constant 0 : i32
    return %arg0, %arg1, %c0_i32 : i32, i32, i32
  }
  func.func @transform_1(%arg0: i32, %arg1: i32) -> (i32, i32, i32) {
    %c0_i32 = arith.constant 0 : i32
    %c0_i32_0 = arith.constant 0 : i32
    %c0_i32_1 = arith.constant 0 : i32
    return %arg0, %c0_i32, %c0_i32_0 : i32, i32, i32
  }
  func.func @transform_2(%arg0: i32, %arg1: i32) -> (i32, i32, i32) {
    %c0_i32 = arith.constant 0 : i32
    %c0_i32_0 = arith.constant 0 : i32
    %c0_i32_1 = arith.constant 0 : i32
    return %arg0, %c0_i32, %c0_i32_0 : i32, i32, i32
  }
  func.func @transform_3(%arg0: i32, %arg1: i32) -> (i32, i32) {
    %c0_i32 = arith.constant 0 : i32
    %c0_i32_0 = arith.constant 0 : i32
    %c0_i32_1 = arith.constant 0 : i32
    return %c0_i32, %c0_i32_0 : i32, i32
  }
  func.func @transform_4(%arg0: i32, %arg1: i32) -> (i32, i32) {
    %c0_i32 = arith.constant 0 : i32
    %c0_i32_0 = arith.constant 0 : i32
    %c0_i32_1 = arith.constant 0 : i32
    return %c0_i32, %c0_i32_0 : i32, i32
  }
  func.func @transform_5(%arg0: i32, %arg1: i32) -> (i32, i32) {
    %c0_i32 = arith.constant 0 : i32
    %c0_i32_0 = arith.constant 0 : i32
    %c0_i32_1 = arith.constant 0 : i32
    return %c0_i32, %c0_i32_0 : i32, i32
  }
  func.func @transform_6(%arg0: i32, %arg1: i32) -> (i32, i32) {
    %c0_i32 = arith.constant 0 : i32
    %c0_i32_0 = arith.constant 0 : i32
    %c0_i32_1 = arith.constant 0 : i32
    return %c0_i32, %c0_i32_0 : i32, i32
  }
  func.func @transform_7(%arg0: i32, %arg1: i32) -> (i32, i32) {
    %c0_i32 = arith.constant 0 : i32
    %c0_i32_0 = arith.constant 0 : i32
    %c0_i32_1 = arith.constant 0 : i32
    return %c0_i32, %c0_i32_0 : i32, i32
  }
  func.func @transform_8(%arg0: i32, %arg1: i32) -> (i32, i32) {
    %c0_i32 = arith.constant 0 : i32
    %c0_i32_0 = arith.constant 0 : i32
    %c0_i32_1 = arith.constant 0 : i32
    return %c0_i32, %c0_i32_0 : i32, i32
  }
  func.func @transform_9(%arg0: i32, %arg1: i32) -> (i32, i32) {
    %c0_i32 = arith.constant 0 : i32
    %c0_i32_0 = arith.constant 0 : i32
    %c0_i32_1 = arith.constant 0 : i32
    return %c0_i32, %c0_i32_0 : i32, i32
  }
  func.func @transform_10(%arg0: i32, %arg1: i32) -> (i32, i32) {
    %c0_i32 = arith.constant 0 : i32
    %c0_i32_0 = arith.constant 0 : i32
    %c0_i32_1 = arith.constant 0 : i32
    return %c0_i32, %c0_i32_0 : i32, i32
  }
  func.func @transform_11(%arg0: i32, %arg1: i32) -> (i32, i32) {
    %c0_i32 = arith.constant 0 : i32
    %c0_i32_0 = arith.constant 0 : i32
    %c0_i32_1 = arith.constant 0 : i32
    return %c0_i32, %c0_i32_0 : i32, i32
  }
  func.func @transform_12(%arg0: i32, %arg1: i32) -> (i32, i32) {
    %c0_i32 = arith.constant 0 : i32
    %c0_i32_0 = arith.constant 0 : i32
    %c0_i32_1 = arith.constant 0 : i32
    return %c0_i32, %c0_i32_0 : i32, i32
  }
  func.func @transform_13(%arg0: i32, %arg1: i32) -> (i32, i32) {
    %c0_i32 = arith.constant 0 : i32
    %c0_i32_0 = arith.constant 0 : i32
    %c0_i32_1 = arith.constant 0 : i32
    return %c0_i32, %c0_i32_0 : i32, i32
  }
  func.func @transform_14(%arg0: i32, %arg1: i32) -> (i32, i32) {
    %c0_i32 = arith.constant 0 : i32
    %c0_i32_0 = arith.constant 0 : i32
    %c0_i32_1 = arith.constant 0 : i32
    return %c0_i32, %c0_i32_0 : i32, i32
  }
  func.func @transform_15(%arg0: i32, %arg1: i32) -> (i32, i32) {
    %c0_i32 = arith.constant 0 : i32
    %c0_i32_0 = arith.constant 0 : i32
    %c0_i32_1 = arith.constant 0 : i32
    return %c0_i32, %c0_i32_0 : i32, i32
  }
  func.func @transform_16(%arg0: i32, %arg1: i32) -> (i32, i32, i32) {
    %c0_i32 = arith.constant 0 : i32
    %c0_i32_0 = arith.constant 0 : i32
    return %arg0, %arg1, %c0_i32 : i32, i32, i32
  }
}

</mosaic_0001>

<bundles_post_ra>
// kernel: tpu_custom_call.1
= control target key start
LH: loop header
LB: loop body
LE: loop exit
PB: predicated region body
PF: predicated region fallthrough
CT: control target
= control target key end

     0   :  { %s5588_s0 = inlined_call_operand.vmem [shape: bf16[2,256,32], index: 0, kind: input, shape index: {}]   ;;  %s5589_s1 = inlined_call_operand.vmem [shape: f32[2,1,256], index: 1, kind: input, shape index: {}]   ;;  %s5590_s2 = inlined_call_operand.vmem [shape: f32[2,1,256], index: 2, kind: input, shape index: {}]   ;;  %s5591_s3 = inlined_call_operand.hbm [shape: bf16[32,256], index: 3, kind: input, shape index: {}]   ;;  %s5592_s4 = inlined_call_operand.vmem [shape: bf16[256,256], index: 4, kind: input, shape index: {}]   ;;  %s5593_s5 = inlined_call_operand.vmem [shape: f32[1,256], index: 5, kind: input, shape index: {}]   ;;  %s5594_s6 = inlined_call_operand.hbm [shape: bf16[256,256], index: 6, kind: input, shape index: {}]   ;;  %s5595_s7 = inlined_call_operand.vmem [shape: f32[1,256], index: 7, kind: input, shape index: {}]   ;;  %s5596_s8 = inlined_call_operand.vmem [shape: bf16[256,128], index: 8, kind: input, shape index: {}]   ;;  %s5597_s9 = inlined_call_operand.hbm [shape: f32[1,128], index: 9, kind: input, shape index: {}]   ;;  %s5598_s10 = inlined_call_operand.hbm [shape: bf16[128,256], index: 10, kind: input, shape index: {}]   ;;  %s5599_s11 = inlined_call_operand.hbm [shape: bf16[32,256], index: 11, kind: input, shape index: {}]   ;;  %s5600_s12 = inlined_call_operand.hbm [shape: bf16[256,256], index: 12, kind: input, shape index: {}]   ;;  %s5601_s13 = inlined_call_operand.hbm [shape: f32[1,256], index: 13, kind: input, shape index: {}]   ;;  %s5602_s14 = inlined_call_operand.vmem [shape: bf16[256,8], index: 14, kind: input, shape index: {}]   ;;  %s5603_s15 = inlined_call_operand.vmem [shape: f32[1,8], index: 15, kind: input, shape index: {}]   ;;  %s5604_s16 = inlined_call_operand.vmem [shape: f32[2,256,8], index: 16, kind: output, shape index: {}]  }
   0x1   :  { %5607 = sst [smem:[#allocation18_spill]] %s5588_s0 }
   0x2   :  { %5608 = sst [smem:[#allocation19_spill]] %s5591_s3 }
   0x3   :  { %5609 = sst [smem:[#allocation20_spill]] %s5594_s6 }
   0x4   :  { %5610 = sst [smem:[#allocation21_spill]] %s5597_s9 }
   0x5   :  { %5611 = sst [smem:[#allocation22_spill]] %s5598_s10 }
   0x6   :  { %5612 = sst [smem:[#allocation23_spill]] %s5600_s12 }
   0x7   :  { %5613 = sst [smem:[#allocation24_spill]] %s5602_s14 }
   0x8   :  { %5614 = sst [smem:[#allocation25_spill]] %s5603_s15 }
   0x9   :  { %5615 = sst [smem:[#allocation26_spill]] %s5604_s16 }
   0xa   :  { %21 = vsyncpa [#allocation3], 0 }
   0xb   :  { %22 = vsyncpa [#allocation5], 0 }
   0xc   :  { %23 = vsyncpa [#allocation8], 0 }
   0xd   :  { %24 = vsyncpa [#allocation11], 0  ;;  %s4781_s21 = smov 0   ;;  %s4783_s22 = smov 0  }
   0xe   :  { %s4785_s23 = smov 0   ;;  %s4787_s24 = smov 0  }
   0xf   :  { %s4789_s25 = smov 0  }
  0x10 LB: > { %5616 = sst [smem:[#allocation17_spill]] %s4685_s25  ;;  %s3393_s26 = sadd.s32 4294967295, %s4685_s25   ;;  %s4685_s25 = sphi %s4789_s25, %s30_s25   ;;  %s4681_s24 = sphi %s4787_s24, %s5634_s24   ;;  %s4677_s23 = sphi %s4785_s23, %s5633_s23   ;;  %s4673_s22 = sphi %s4783_s22, %s5632_s22   ;;  %s4669_s21 = sphi %s4781_s21, %s5631_s21  }
  0x11   : > { %p3395_p0 = scmp.ge.s32.totalorder %s4685_s25, 1  ;;  %p428_p1 = scmp.lt.s32.totalorder %s4685_s25, 5 }
  0x12   : > { %p4809_p2 = scmp.eq.s32.totalorder %s3393_s26, 0  ;;  %s5618_s6 = sld [smem:[#allocation20_spill]] }
  0x13   : > { %p4816_p3 = pnand %p3395_p0, %p428_p1  ;;  %s5620_s10 = sld [smem:[#allocation22_spill]] }
  0x14   : > { %s4687_s20 = smov [#allocation4]   ;;  %s4688_s29 = smov [#allocation7]  }
  0x15   : > { %p4294_p4 = pneg %p4816_p3  ;;  %s461_s26 = sshll.u32 %s4687_s20, 4  ;;  %s462_s26 = int_to_ptr.vmem [resolvable:$true] %s461_s26 }
  0x16   : > { %s5622_s12 = sld [smem:[#allocation23_spill]]  ;;  %s4689_s20 = smov 128  }
  0x17   : > { %p4827_p5 = pnand %p4809_p2, %p4294_p4  ;;  %s4690_s25 = smov 8  }
  0x18   : > { %s459_s30 = sshll.u32 %s5618_s6, 4  ;;  %s493_s6 = sshll.u32 %s4688_s29, 4  ;;  %s460_s30 = int_to_ptr.hbm [resolvable:$true] %s459_s30  ;;  %s494_s6 = int_to_ptr.vmem [resolvable:$true] %s493_s6 }
  0x19   : > { %s491_s19 = sshll.u32 %s5620_s10, 4  ;;  %s4691_s29 = smov [#allocation10]   ;;  %s492_s19 = int_to_ptr.hbm [resolvable:$true] %s491_s19 }
  0x1a   : > { %4300 = dma.hbm_to_vmem [thread:$0]  (!%p4827_p5), %s460_s30, 4096, %s462_s26, [#allocation5], %s4689_s20, %s4689_s20, %s4690_s25  }
  0x1b   : > { %4306 = dma.hbm_to_vmem [thread:$0]  (!%p4827_p5), %s492_s19, 2048, %s494_s6, [#allocation8], %s4689_s20, %s4689_s20, %s4690_s25  }
  0x1c   : > { %s519_s10 = sshll.u32 %s5622_s12, 4  ;;  %s521_s16 = sshll.u32 %s4691_s29, 4  ;;  %s520_s10 = int_to_ptr.hbm [resolvable:$true] %s519_s10  ;;  %s522_s16 = int_to_ptr.vmem [resolvable:$true] %s521_s16 }
  0x1d   : > { %4312 = dma.hbm_to_vmem [thread:$0]  (!%p4827_p5), %s520_s10, 4096, %s522_s16, [#allocation11], %s4689_s20, %s4689_s20, %s4690_s25  }
  0x1e   : > { %s39_s17 = sadd.s32 1, %s4677_s23  ;;  %s42_s18 = sadd.s32 1, %s4681_s24 }
  0x1f   : > { %p40_p6 = scmp.ge.s32.totalorder %s39_s17, 2  ;;  %s5623_s3 = sld [smem:[#allocation19_spill]] }
  0x20   : > { %s4692_s6 = smov [#allocation2]   ;;  %s5624_s9 = sld [smem:[#allocation21_spill]] }
  0x21   : > { %s5636_s17 = smov (%p40_p6, %s39_s17), 0  ;;  %s5638_s18 = smov (!%p40_p6, %s42_s18), %s4681_s24 }
  0x22   : > { %s441_s19 = sshll.u32 %s4692_s6, 4  ;;  %p44_p7 = scmp.ge.s32.totalorder %s5638_s18, 2  ;;  %s442_s19 = int_to_ptr.vmem [resolvable:$true] %s441_s19 }
  0x23   : > { %s4693_s10 = smov [#allocation6]   ;;  %s505_s6 = sshll.u32 %s5599_s11, 4  ;;  %s506_s6 = int_to_ptr.hbm [resolvable:$true] %s505_s6 }
  0x24   : > { %s5640_s18 = smov (%p44_p7, %s5638_s18), 0  ;;  %s482_s12 = sshll.u32 %s4693_s10, 4  ;;  %s483_s12 = int_to_ptr.vmem [resolvable:$true] %s482_s12 }
  0x25   : > { %s439_s26 = sshll.u32 %s5623_s3, 4  ;;  %s534_s3 = sshll.u32 %s5601_s13, 4  ;;  %s440_s26 = int_to_ptr.hbm [resolvable:$true] %s439_s26  ;;  %s535_s3 = int_to_ptr.hbm [resolvable:$true] %s534_s3 }
  0x26   : > { %s480_s14 = sshll.u32 %s5624_s9, 4  ;;  %s4694_s9 = smov [#allocation9]   ;;  %s481_s14 = int_to_ptr.hbm [resolvable:$true] %s480_s14 }
  0x27   : > { %4297 = dma.hbm_to_vmem [thread:$0]  (!%p4827_p5), %s440_s26, 512, %s442_s19, [#allocation3], %s4689_s20, %s4689_s20, %s4690_s25  }
  0x28   : > { %4303 = dma.hbm_to_vmem [thread:$0]  (!%p4827_p5), %s481_s14, 16, %s483_s12, [#allocation5]  }
  0x29   : > { %s507_s26 = sshll.u32 %s4694_s9, 4  ;;  %s4695_s19 = smov [#allocation12]   ;;  %s508_s26 = int_to_ptr.vmem [resolvable:$true] %s507_s26 }
  0x2a   : > { %4309 = dma.hbm_to_vmem [thread:$0]  (!%p4827_p5), %s506_s6, 512, %s508_s26, [#allocation8], %s4689_s20, %s4689_s20, %s4690_s25  }
  0x2b   : > { %s536_s10 = sshll.u32 %s4695_s19, 4  ;;  %582 = sbr.rel (%p4816_p3) target bundleno = 1328 (0x530), region = 84  ;;  %s537_s10 = int_to_ptr.vmem [resolvable:$true] %s536_s10 }
  0x2c   : > { %4315 = dma.hbm_to_vmem [thread:$0]  (!%p4827_p5), %s535_s3, 32, %s537_s10, [#allocation11]  }
  0x30   : > { %4652 = dma.done.wait (%p4809_p2), [#allocation3], 512  }
  0x31   : > { %4654 = vsyncadd (%p4809_p2), [#allocation3], 4294966784 }
  0x32   : > { %4656 = dma.done.wait (%p4809_p2), [#allocation5], 4112  }
  0x33   : > { %4658 = vsyncadd (%p4809_p2), [#allocation5], 4294963184 }
  0x34   : > { %4660 = dma.done.wait (%p4809_p2), [#allocation8], 2560  }
  0x35   : > { %4662 = vsyncadd (%p4809_p2), [#allocation8], 4294964736 }
  0x36   : > { %4664 = dma.done.wait (%p4809_p2), [#allocation11], 4128  }
  0x37   : > { %4666 = vsyncadd (%p4809_p2), [#allocation11], 4294963168  ;;  %s3412_s3 = sshll.u32 %s4669_s21, 4  ;;  %p680_p8 = scmp.lt.s32.totalorder %s4673_s22, 1  ;;  %v3462_v0 = vld [vmem:[#allocation2 + $0x10] sm:$0xf] }
  0x38   : > { %p682_p9 = scmp.lt.s32.totalorder %s3412_s3, 31  ;;  %v4105_v1 = vld [vmem:[#allocation2 + $0x14] sm:$0xf0]  ;;  %v4104_v2 = vld [vmem:[#allocation2 + $0x14] sm:$0xf]  ;;  %s5625_s0 = sld [smem:[#allocation18_spill]] }
  0x39   : > { %s5642_s22 = smov (!%p680_p8, %s4673_s22), 1  ;;  %v3463_v3 = vor.u32 %v4105_v1, %v3462_v0  ;;  %v3464_v4 = vld [vmem:[#allocation2 + $0x18] sm:$0xf0]  ;;  %v3454_v5 = vld [vmem:[#allocation2] sm:$0xf]  ;;  %vm794_vm0 = vcmask 261120  }
  0x3a   : > { %s5644_s3 = smov (!%p682_p9, %s3412_s3), 31  ;;  %s3413_s9 = sshll.u32 %s5642_s22, 5  ;;  %v4103_v6 = vld [vmem:[#allocation2 + $0x4] sm:$0xf0]  ;;  %v3467_v7 = vor.u32 %v4104_v2, %v3464_v4  ;;  %v4102_v8 = vld [vmem:[#allocation2 + $0x4] sm:$0xf] }
  0x3b   : > { %s4906_s14 = sadd.s32 %s3413_s9, %s5644_s3  ;;  %v3456_v9 = vld [vmem:[#allocation2 + $0x8] sm:$0xf0]  ;;  %825 = vmatpush.bf16.msra.mxu0 %v3463_v3  ;;  %v3455_v10 = vor.u32 %v4103_v6, %v3454_v5  ;;  %4254 = vmatpush.bf16.msra.mxu2 %v3463_v3  ;;  %v4120_v17 = vld [vmem:[%s5592_s4 + $0x74] sm:$0xf]  ;;  %v3544_v18 = vld [vmem:[%s5592_s4 + $0x78] sm:$0xf0] }
  0x3c   : > { %s3414_s25 = sshll.u32 %s4906_s14, 2  ;;  %874 = vmatpush.bf16.msra.mxu1 %v3467_v7  ;;  %v3459_v11 = vor.u32 %v4102_v8, %v3456_v9  ;;  %4256 = vmatpush.bf16.msra.mxu3 %v3467_v7  ;;  %v3547_v19 = vor.u32 %v4120_v17, %v3544_v18  ;;  %v3606_v20 = vld [vmem:[%s5592_s4 + $0xf0] sm:$0xf]  ;;  %v4137_v21 = vld [vmem:[%s5592_s4 + $0xf4] sm:$0xf0]  ;;  %s3415_s20 = sshll.u32 %s5642_s22, 1 }
  0x3d   : > { %v4118_v22 = vld [vmem:[%s5592_s4 + $0x64] sm:$0xf]  ;;  %v3607_v23 = vor.u32 %v4137_v21, %v3606_v20  ;;  %v3536_v24 = vld [vmem:[%s5592_s4 + $0x68] sm:$0xf0]  ;;  %v3598_v25 = vld [vmem:[%s5592_s4 + $0xe0] sm:$0xf]  ;;  %s692_s30 = scalar_lea.vmem %s5589_s1, %s3415_s20  ;;  %s696_s9 = scalar_lea.vmem %s5590_s2, %s3415_s20 }
  0x3e   : > { %s4912_s28 = scalar_lea.vmem %s5625_s0, %s3414_s25  ;;  %v3539_v26 = vor.u32 %v4118_v22, %v3536_v24  ;;  %v4135_v27 = vld [vmem:[%s5592_s4 + $0xe4] sm:$0xf0]  ;;  %v4136_v28 = vld [vmem:[%s5592_s4 + $0xf4] sm:$0xf]  ;;  %v3608_v29 = vld [vmem:[%s5592_s4 + $0xf8] sm:$0xf0] }
  0x3f   : > { %v4094_v12 = vld [vmem:[%s4912_s28] sm:$0xff]  ;;  %826 = vmatpush.bf16.msra.mxu0 %v3455_v10  ;;  %4255 = vmatpush.bf16.msra.mxu2 %v3455_v10  ;;  %v4095_v13 = vld [vmem:[%s4912_s28 + $0x8] sm:$0xff]  ;;  %v4096_v15 = vld [vmem:[%s4912_s28 + $0x10] sm:$0xff]  ;;  %v3599_v30 = vor.u32 %v4135_v27, %v3598_v25  ;;  %v3611_v31 = vor.u32 %v4136_v28, %v3608_v29  ;;  %s5626_s25 = sld [smem:[#allocation24_spill]]  ;;  %vm3193_vm1 = vcmask 64512  }
  0x40   : > { %875 = vmatpush.bf16.msra.mxu1 %v3459_v11  ;;  %4257 = vmatpush.bf16.msra.mxu3 %v3459_v11  ;;  %v4921_v14 = vld [vmem:[%s4912_s28 + $0x20] sm:$0xff]  ;;  %v4099_v16 = vld [vmem:[%s4912_s28 + $0x28] sm:$0xff]  ;;  %v4116_v32 = vld [vmem:[%s5592_s4 + $0x54] sm:$0xf]  ;;  %s5628_s20 = sld [smem:[#allocation25_spill]] }
  0x41   : > { %v3528_v33 = vld [vmem:[%s5592_s4 + $0x58] sm:$0xf0]  ;;  %v3542_v34 = vld [vmem:[%s5592_s4 + $0x70] sm:$0xf]  ;;  %v4121_v35 = vld [vmem:[%s5592_s4 + $0x74] sm:$0xf0] }
  0x42   : > { %3468 = vmatmul.msk.bf16.vlgmr.msra.gmra.mxu0 %vm794_vm0, %v4094_v12  ;;  %3473 = vmatmul.msk.bf16.vlgmr.msra.gmra.mxu2 %vm794_vm0, %v4099_v16  ;;  %v3590_v36 = vld [vmem:[%s5592_s4 + $0xd0] sm:$0xf]  ;;  %v4133_v37 = vld [vmem:[%s5592_s4 + $0xd4] sm:$0xf0]  ;;  %v3543_v38 = vor.u32 %v4121_v35, %v3542_v34  ;;  %v4134_v39 = vld [vmem:[%s5592_s4 + $0xe4] sm:$0xf]  ;;  %v3531_v41 = vor.u32 %v4116_v32, %v3528_v33 }
  0x43   : > { %3476 = vmatmul.msk.bf16.vlgmr.msra.gmra.mxu1 %vm794_vm0, %v4094_v12  ;;  %3480 = vmatmul.msk.bf16.vlgmr.msra.gmra.mxu3 %vm794_vm0, %v4921_v14  ;;  %v3600_v40 = vld [vmem:[%s5592_s4 + $0xe8] sm:$0xf0]  ;;  %v3534_v43 = vld [vmem:[%s5592_s4 + $0x60] sm:$0xf]  ;;  %v4119_v44 = vld [vmem:[%s5592_s4 + $0x64] sm:$0xf0]  ;;  %v3591_v45 = vor.u32 %v4133_v37, %v3590_v36 }
  0x44   : > { %1261 = vmatpush.bf16.msrb.mxu0 %v3547_v19  ;;  %1212 = vmatpush.bf16.msrb.mxu3 %v3607_v23  ;;  %v3603_v42 = vor.u32 %v4134_v39, %v3600_v40  ;;  %v3535_v46 = vor.u32 %v4119_v44, %v3534_v43  ;;  %v4114_v47 = vld [vmem:[%s5592_s4 + $0x44] sm:$0xf]  ;;  %v3520_v48 = vld [vmem:[%s5592_s4 + $0x48] sm:$0xf0]  ;;  %v3582_v49 = vld [vmem:[%s5592_s4 + $0xc0] sm:$0xf] }
  0x45   : > { %1310 = vmatpush.bf16.msrb.mxu1 %v3611_v31  ;;  %1163 = vmatpush.bf16.msrb.mxu2 %v3543_v38  ;;  %v4131_v50 = vld [vmem:[%s5592_s4 + $0xc4] sm:$0xf0]  ;;  %v4132_v51 = vld [vmem:[%s5592_s4 + $0xd4] sm:$0xf]  ;;  %v3592_v52 = vld [vmem:[%s5592_s4 + $0xd8] sm:$0xf0]  ;;  %v3523_v57 = vor.u32 %v4114_v47, %v3520_v48  ;;  %s5627_s27 = smov %s5626_s25 }
  0x46   : > { %v3595_v53 = vor.u32 %v4132_v51, %v3592_v52  ;;  %v3526_v54 = vld [vmem:[%s5592_s4 + $0x50] sm:$0xf]  ;;  %v4117_v55 = vld [vmem:[%s5592_s4 + $0x54] sm:$0xf0]  ;;  %v4112_v58 = vld [vmem:[%s5592_s4 + $0x34] sm:$0xf]  ;;  %v3583_v59 = vor.u32 %v4131_v50, %v3582_v49 }
  0x47   : > { %v4097_v56 = vld [vmem:[%s4912_s28 + $0x18] sm:$0xff]  ;;  %v4130_v61 = vld [vmem:[%s5592_s4 + $0xc4] sm:$0xf]  ;;  %v3584_v62 = vld [vmem:[%s5592_s4 + $0xc8] sm:$0xf0]  ;;  %v3527_v63 = vor.u32 %v4117_v55, %v3526_v54  ;;  %s5629_s12 = sld [smem:[#allocation26_spill]] }
  0x48   : > { %1262 = vmatpush.bf16.msrb.mxu0 %v3539_v26  ;;  %1213 = vmatpush.bf16.msrb.mxu3 %v3599_v30  ;;  %v3512_v60 = vld [vmem:[%s5592_s4 + $0x38] sm:$0xf0]  ;;  %v3574_v0 = vld [vmem:[%s5592_s4 + $0xb0] sm:$0xf]  ;;  %v4129_v1 = vld [vmem:[%s5592_s4 + $0xb4] sm:$0xf0]  ;;  %v3587_v5 = vor.u32 %v4130_v61, %v3584_v62 }
  0x49   : > { %1311 = vmatpush.bf16.msrb.mxu1 %v3603_v42  ;;  %1164 = vmatpush.bf16.msrb.mxu2 %v3535_v46  ;;  %v4100_v2 = vld [vmem:[%s4912_s28 + $0x30] sm:$0xff]  ;;  %v3518_v3 = vld [vmem:[%s5592_s4 + $0x40] sm:$0xf]  ;;  %v4115_v4 = vld [vmem:[%s5592_s4 + $0x44] sm:$0xf0]  ;;  %v3515_v6 = vor.u32 %v4112_v58, %v3512_v60  ;;  %v3575_v9 = vor.u32 %v4129_v1, %v3574_v0 }
  0x4a   : > { %v4128_v7 = vld [vmem:[%s5592_s4 + $0xb4] sm:$0xf]  ;;  %v3576_v8 = vld [vmem:[%s5592_s4 + $0xb8] sm:$0xf0]  ;;  %v4110_v10 = vld [vmem:[%s5592_s4 + $0x24] sm:$0xf]  ;;  %v3519_v12 = vor.u32 %v4115_v4, %v3518_v3 }
  0x4b   : > { %v3504_v11 = vld [vmem:[%s5592_s4 + $0x28] sm:$0xf0]  ;;  %v4113_v17 = vld [vmem:[%s5592_s4 + $0x34] sm:$0xf0]  ;;  %v3579_v18 = vor.u32 %v4128_v7, %v3576_v8  ;;  %v3502_v22 = vld [vmem:[%s5592_s4 + $0x20] sm:$0xf] }
  0x4c   : > { %1263 = vmatpush.bf16.msrb.mxu0 %v3531_v41  ;;  %1214 = vmatpush.bf16.msrb.mxu3 %v3591_v45  ;;  %v3507_v19 = vor.u32 %v4110_v10, %v3504_v11  ;;  %v4111_v23 = vld [vmem:[%s5592_s4 + $0x24] sm:$0xf0]  ;;  %v4101_v25 = vld [vmem:[%s4912_s28 + $0x38] sm:$0xff]  ;;  %v4126_v26 = vld [vmem:[%s5592_s4 + $0xa4] sm:$0xf] }
  0x4d   : > { %1312 = vmatpush.bf16.msrb.mxu1 %v3595_v53  ;;  %1165 = vmatpush.bf16.msrb.mxu2 %v3527_v63  ;;  %v3503_v24 = vor.u32 %v4111_v23, %v3502_v22  ;;  %v3568_v27 = vld [vmem:[%s5592_s4 + $0xa8] sm:$0xf0]  ;;  %v3558_v29 = vld [vmem:[%s5592_s4 + $0x90] sm:$0xf]  ;;  %v4109_v32 = vld [vmem:[%s5592_s4 + $0x14] sm:$0xf0] }
  0x4e   : > { %v3571_v28 = vor.u32 %v4126_v26, %v3568_v27  ;;  %v3494_v30 = vld [vmem:[%s5592_s4 + $0x10] sm:$0xf]  ;;  %v4108_v33 = vld [vmem:[%s5592_s4 + $0x14] sm:$0xf]  ;;  %v3496_v34 = vld [vmem:[%s5592_s4 + $0x18] sm:$0xf0] }
  0x4f   : > { %v3495_v35 = vor.u32 %v4109_v32, %v3494_v30  ;;  %v3499_v36 = vor.u32 %v4108_v33, %v3496_v34  ;;  %v4124_v37 = vld [vmem:[%s5592_s4 + $0x94] sm:$0xf]  ;;  %v3560_v38 = vld [vmem:[%s5592_s4 + $0x98] sm:$0xf0]  ;;  %v3486_v40 = vld [vmem:[%s5592_s4] sm:$0xf] }
  0x50   : > { %1264 = vmatpush.bf16.msrb.mxu0 %v3523_v57  ;;  %1215 = vmatpush.bf16.msrb.mxu3 %v3583_v59  ;;  %v3563_v39 = vor.u32 %v4124_v37, %v3560_v38  ;;  %v4107_v41 = vld [vmem:[%s5592_s4 + $0x4] sm:$0xf0]  ;;  %v3550_v42 = vld [vmem:[%s5592_s4 + $0x80] sm:$0xf]  ;;  %v4106_v45 = vld [vmem:[%s5592_s4 + $0x4] sm:$0xf] }
  0x51   : > { %1313 = vmatpush.bf16.msrb.mxu1 %v3587_v5  ;;  %1166 = vmatpush.bf16.msrb.mxu2 %v3519_v12  ;;  %v3487_v43 = vor.u32 %v4107_v41, %v3486_v40  ;;  %v4123_v44 = vld [vmem:[%s5592_s4 + $0x84] sm:$0xf0]  ;;  %v3488_v46 = vld [vmem:[%s5592_s4 + $0x8] sm:$0xf0]  ;;  %v4122_v49 = vld [vmem:[%s5592_s4 + $0x84] sm:$0xf] }
  0x52   : > { %3469 = vmatmul.msk.bf16.gmra.mxu0 %vm794_vm0, %v4095_v13  ;;  %3474 = vmatmul.msk.bf16.gmra.mxu2 %vm794_vm0, %v4100_v2  ;;  %v3551_v47 = vor.u32 %v4123_v44, %v3550_v42  ;;  %v3491_v48 = vor.u32 %v4106_v45, %v3488_v46  ;;  %v3552_v50 = vld [vmem:[%s5592_s4 + $0x88] sm:$0xf0]  ;;  %v724_v52 = vld [vmem:[%s692_s30] sm:$0x3]  ;;  %v3670_v57 = vld [vmem:[#allocation4 + $0x70] sm:$0xf] }
  0x53   : > { %3477 = vmatmul.msk.bf16.gmra.mxu1 %vm794_vm0, %v4095_v13  ;;  %3481 = vmatmul.msk.bf16.gmra.mxu3 %vm794_vm0, %v4099_v16  ;;  %v3566_v13 = vld [vmem:[%s5592_s4 + $0xa0] sm:$0xf]  ;;  %v3510_v16 = vld [vmem:[%s5592_s4 + $0x30] sm:$0xf]  ;;  %v3555_v51 = vor.u32 %v4122_v49, %v3552_v50  ;;  %v5140_v55 = vperm.slane %v724_v52, 0 }
  0x54   : > { %1265 = vmatpush.bf16.msrb.mxu0 %v3515_v6  ;;  %1216 = vmatpush.bf16.msrb.mxu3 %v3575_v9  ;;  %v3511_v21 = vor.u32 %v4113_v17, %v3510_v16  ;;  %v4153_v58 = vld [vmem:[#allocation4 + $0x74] sm:$0xf0]  ;;  %v3734_v60 = vld [vmem:[#allocation4 + $0xf0] sm:$0xf]  ;;  %v4152_v9 = vld [vmem:[#allocation4 + $0x74] sm:$0xf] }
  0x55   : > { %1314 = vmatpush.bf16.msrb.mxu1 %v3579_v18  ;;  %v3671_v59 = vor.u32 %v4153_v58, %v3670_v57  ;;  %v4169_v61 = vld [vmem:[#allocation4 + $0xf4] sm:$0xf0]  ;;  %v3672_v10 = vld [vmem:[#allocation4 + $0x78] sm:$0xf0]  ;;  %v3726_v23 = vld [vmem:[#allocation4 + $0xe0] sm:$0xf] }
  0x56   : > { %1167 = vmatpush.bf16.msrb.mxu2 %v3511_v21  ;;  %v3735_v62 = vor.u32 %v4169_v61, %v3734_v60  ;;  %v3675_v12 = vor.u32 %v4152_v9, %v3672_v10  ;;  %v4151_v21 = vld [vmem:[#allocation4 + $0x64] sm:$0xf0]  ;;  %v3728_v40 = vld [vmem:[#allocation4 + $0xe8] sm:$0xf0]  ;;  %v3654_v45 = vld [vmem:[#allocation4 + $0x50] sm:$0xf] }
  0x57   : > { %v4149_v46 = vld [vmem:[#allocation4 + $0x54] sm:$0xf0]  ;;  %v4148_v61 = vld [vmem:[#allocation4 + $0x54] sm:$0xf]  ;;  %v3646_v9 = vld [vmem:[#allocation4 + $0x40] sm:$0xf] }
  0x58   : > { %1266 = vmatpush.bf16.msrb.mxu0 %v3507_v19  ;;  %v4165_v49 = vld [vmem:[#allocation4 + $0xd4] sm:$0xf0]  ;;  %v4147_v10 = vld [vmem:[#allocation4 + $0x44] sm:$0xf0] }
  0x59   : > { %1315 = vmatpush.bf16.msrb.mxu1 %v3571_v28 }
  0x5a   : > { %1168 = vmatpush.bf16.msrb.mxu2 %v3503_v24  ;;  %v4167_v24 = vld [vmem:[#allocation4 + $0xe4] sm:$0xf0] }
  0x5c   : > { %1267 = vmatpush.bf16.msrb.mxu0 %v3499_v36  ;;  %v3664_v36 = vld [vmem:[#allocation4 + $0x68] sm:$0xf0] }
  0x5d   : > { %1316 = vmatpush.bf16.msrb.mxu1 %v3563_v39  ;;  %v4166_v39 = vld [vmem:[#allocation4 + $0xe4] sm:$0xf] }
  0x5e   : > { %1169 = vmatpush.bf16.msrb.mxu2 %v3495_v35  ;;  %v4150_v35 = vld [vmem:[#allocation4 + $0x64] sm:$0xf]  ;;  %v3731_v42 = vor.u32 %v4166_v39, %v3728_v40  ;;  %v3702_v39 = vld [vmem:[#allocation4 + $0xb0] sm:$0xf] }
  0x5f   : > { %v3667_v38 = vor.u32 %v4150_v35, %v3664_v36 }
  0x60   : > { %1268 = vmatpush.bf16.msrb.mxu0 %v3491_v48  ;;  %v3718_v48 = vld [vmem:[#allocation4 + $0xd0] sm:$0xf] }
  0x61   : > { %1317 = vmatpush.bf16.msrb.mxu1 %v3555_v51  ;;  %v3719_v50 = vor.u32 %v4165_v49, %v3718_v48  ;;  %v3704_v48 = vld [vmem:[#allocation4 + $0xb8] sm:$0xf0] }
  0x62   : > { %3470 = vmatmul.msk.bf16.gmra.mxu0 %vm794_vm0, %v4096_v15  ;;  %3475 = vmatmul.msk.bf16.gmra.mxu2 %vm794_vm0, %v4101_v25 }
  0x63   : > { %3478 = vmatmul.msk.bf16.gmra.mxu1 %vm794_vm0, %v4096_v15  ;;  %v4127_v15 = vld [vmem:[%s5592_s4 + $0xa4] sm:$0xf0]  ;;  %3482 = vmatmul.msk.bf16.gmra.mxu3 %vm794_vm0, %v4100_v2 }
  0x64   : > { %v3567_v20 = vor.u32 %v4127_v15, %v3566_v13  ;;  %1170 = vmatpush.bf16.msrb.mxu2 %v3487_v43  ;;  %v4168_v13 = vld [vmem:[#allocation4 + $0xf4] sm:$0xf]  ;;  %v3736_v15 = vld [vmem:[#allocation4 + $0xf8] sm:$0xf0]  ;;  %1703 = vmatpush.bf16.msra.mxu0 %v3675_v12 }
  0x65   : > { %v3739_v17 = vor.u32 %v4168_v13, %v3736_v15  ;;  %v3647_v13 = vor.u32 %v4147_v10, %v3646_v9  ;;  %v4163_v15 = vld [vmem:[#allocation4 + $0xc4] sm:$0xf0]  ;;  %v4158_v10 = vld [vmem:[#allocation4 + $0xa4] sm:$0xf] }
  0x66   : > { %1217 = vmatpush.bf16.msrb.mxu3 %v3567_v20  ;;  %v3662_v20 = vld [vmem:[#allocation4 + $0x60] sm:$0xf] }
  0x67   : > { %1752 = vmatpush.bf16.msra.mxu1 %v3739_v17  ;;  %v3663_v22 = vor.u32 %v4151_v21, %v3662_v20  ;;  %v3648_v17 = vld [vmem:[#allocation4 + $0x48] sm:$0xf0]  ;;  %v4162_v20 = vld [vmem:[#allocation4 + $0xc4] sm:$0xf] }
  0x68   : > { %1605 = vmatpush.bf16.msra.mxu2 %v3671_v59  ;;  %1704 = vmatpush.bf16.msra.mxu0 %v3667_v38  ;;  %v3712_v21 = vld [vmem:[#allocation4 + $0xc8] sm:$0xf0]  ;;  %v4145_v38 = vld [vmem:[#allocation4 + $0x34] sm:$0xf0] }
  0x6b   : > { %1753 = vmatpush.bf16.msra.mxu1 %v3731_v42  ;;  %v4161_v42 = vld [vmem:[#allocation4 + $0xb4] sm:$0xf0] }
  0x6c   : > { %1606 = vmatpush.bf16.msra.mxu2 %v3663_v22  ;;  %v3715_v22 = vor.u32 %v4162_v20, %v3712_v21 }
  0x72   : > { %3471 = vmatmul.msk.bf16.gmra.mxu0 %vm794_vm0, %v4097_v56 }
  0x73   : > { %3479 = vmatmul.msk.bf16.gmra.mxu1 %vm794_vm0, %v4097_v56  ;;  %3483 = vmatmul.msk.bf16.gmra.mxu3 %vm794_vm0, %v4101_v25  ;;  %v5142_v56 = vperm.slane %v724_v52, 1  ;;  %v3727_v25 = vor.u32 %v4167_v24, %v3726_v23 }
  0x82   : > { %3472 = vmatmul.msk.bf16.gmra.mxu0 %vm794_vm0, %v4921_v14  ;;  %v4125_v14 = vld [vmem:[%s5592_s4 + $0x94] sm:$0xf0] }
  0x83   : > { %v3559_v31 = vor.u32 %v4125_v14, %v3558_v29 }
  0x85   : > { %1218 = vmatpush.bf16.msrb.mxu3 %v3559_v31 }
  0x89   : > { %1219 = vmatpush.bf16.msrb.mxu3 %v3551_v47  ;;  %v3655_v47 = vor.u32 %v4149_v46, %v3654_v45  ;;  %v3703_v45 = vor.u32 %v4161_v42, %v3702_v39 }
  0x8b   : > { %1607 = vmatpush.bf16.msra.mxu2 %v3655_v47  ;;  %v4160_v47 = vld [vmem:[#allocation4 + $0xb4] sm:$0xf] }
  0x8c   : > { %v3707_v49 = vor.u32 %v4160_v47, %v3704_v48  ;;  %v4156_v48 = vld [vmem:[#allocation4 + $0x94] sm:$0xf] }
  0x8d   : > { %1654 = vmatpush.bf16.msra.mxu3 %v3735_v62  ;;  %v3656_v62 = vld [vmem:[#allocation4 + $0x58] sm:$0xf0] }
  0x8f   : > { %1608 = vmatpush.bf16.msra.mxu2 %v3647_v13 }
  0x91   : > { %1655 = vmatpush.bf16.msra.mxu3 %v3727_v25 }
  0x95   : > { %1656 = vmatpush.bf16.msra.mxu3 %v3719_v50 }
  0xbf   : > { %v828_v53 = vpop.f32.mrf.mxu0 }
  0xc0   : > { %v877_v54 = vpop.f32.mrf.mxu1  ;;  %v829_v63 = vadd.f32 %v828_v53, %v5140_v55 }
  0xc1   : > { %v878_v0 = vadd.f32 %v877_v54, %v5142_v56 }
  0xc2   : > { %v917_v5 = vmax.f32 %v829_v63, 0.0 }
  0xc3   : > { %v918_v7 = vmax.f32 %v878_v0, 0.0 }
  0xc5   : > { %v853_v36 = vpop.f32.mrf.mxu2 }
  0xc7   : > { %v830_v1 = vpop.f32.mrf.mxu0 }
  0xc8   : > { %v831_v2 = vadd.f32 %v830_v1, %v5140_v55  ;;  %v879_v3 = vpop.f32.mrf.mxu1  ;;  %v3659_v1 = vor.u32 %v4148_v61, %v3656_v62 }
  0xc9   : > { %v880_v4 = vadd.f32 %v879_v3, %v5142_v56  ;;  %v3720_v3 = vld [vmem:[#allocation4 + $0xd8] sm:$0xf0] }
  0xca   : > { %v919_v6 = vmax.f32 %v831_v2, 0.0  ;;  %v4164_v2 = vld [vmem:[#allocation4 + $0xd4] sm:$0xf]  ;;  %1705 = vmatpush.bf16.msra.mxu0 %v3659_v1  ;;  %v3630_v1 = vld [vmem:[#allocation4 + $0x20] sm:$0xf] }
  0xcb   : > { %v920_v8 = vmax.f32 %v880_v4, 0.0 }
  0xcc   : > { %v949_v11 = vpack.c.bf16 %v919_v6, %v917_v5  ;;  %v5156_v5 = vpop.f32.mrf.mxu3  ;;  %v3723_v6 = vor.u32 %v4164_v2, %v3720_v3  ;;  %v4143_v2 = vld [vmem:[#allocation4 + $0x24] sm:$0xf0]  ;;  %v3694_v3 = vld [vmem:[#allocation4 + $0xa0] sm:$0xf] }
  0xcd   : > { %v950_v16 = vpack.c.bf16 %v920_v8, %v918_v7  ;;  %v898_v50 = vadd.f32 %v5156_v5, %v5142_v56  ;;  %v4159_v5 = vld [vmem:[#allocation4 + $0xa4] sm:$0xf0] }
  0xce   : > { %1171 = vmatmul.bf16.vlgmr.msrb.gmra.mxu2 %v949_v11  ;;  %1269 = vmatmul.bf16.vlgmr.msrb.gmra.mxu0 %v949_v11  ;;  %v3710_v11 = vld [vmem:[#allocation4 + $0xc0] sm:$0xf] }
  0xcf   : > { %1220 = vmatmul.bf16.vlgmr.msrb.gmra.mxu3 %v950_v16  ;;  %1318 = vmatmul.bf16.vlgmr.msrb.gmra.mxu1 %v950_v16  ;;  %v833_v18 = vpop.f32.mrf.mxu0  ;;  %v4146_v16 = vld [vmem:[#allocation4 + $0x44] sm:$0xf] }
  0xd0   : > { %v882_v19 = vpop.f32.mrf.mxu1  ;;  %v834_v26 = vadd.f32 %v833_v18, %v5140_v55  ;;  %1754 = vmatpush.bf16.msra.mxu1 %v3723_v6  ;;  %v3711_v18 = vor.u32 %v4163_v15, %v3710_v11  ;;  %v4142_v6 = vld [vmem:[#allocation4 + $0x24] sm:$0xf]  ;;  %v3696_v11 = vld [vmem:[#allocation4 + $0xa8] sm:$0xf0]  ;;  %v854_v15 = vadd.f32 %v853_v36, %v5140_v55 }
  0xd1   : > { %v883_v27 = vadd.f32 %v882_v19, %v5142_v56  ;;  %v3651_v19 = vor.u32 %v4146_v16, %v3648_v17 }
  0xd2   : > { %v921_v31 = vmax.f32 %v834_v26, 0.0  ;;  %1657 = vmatpush.bf16.msra.mxu3 %v3711_v18  ;;  %v937_v20 = vmax.f32 %v854_v15, 0.0 }
  0xd3   : > { %v922_v33 = vmax.f32 %v883_v27, 0.0  ;;  %1706 = vmatpush.bf16.msra.mxu0 %v3651_v19 }
  0xd4   : > { %1755 = vmatpush.bf16.msra.mxu1 %v3715_v22  ;;  %v899_v24 = vpop.f32.mrf.mxu3 }
  0xd6   : > { %1658 = vmatpush.bf16.msra.mxu3 %v3703_v45 }
  0xd7   : > { %v835_v28 = vpop.f32.mrf.mxu0 }
  0xd8   : > { %v836_v29 = vadd.f32 %v835_v28, %v5140_v55  ;;  %v884_v14 = vpop.f32.mrf.mxu1  ;;  %1756 = vmatpush.bf16.msra.mxu1 %v3707_v49  ;;  %v3688_v49 = vld [vmem:[#allocation4 + $0x98] sm:$0xf0] }
  0xd9   : > { %v885_v30 = vadd.f32 %v884_v14, %v5142_v56 }
  0xda   : > { %v923_v32 = vmax.f32 %v836_v29, 0.0 }
  0xdb   : > { %v924_v34 = vmax.f32 %v885_v30, 0.0 }
  0xdc   : > { %v951_v37 = vpack.c.bf16 %v923_v32, %v921_v31  ;;  %v902_v40 = vpop.f32.mrf.mxu3 }
  0xdd   : > { %v952_v41 = vpack.c.bf16 %v924_v34, %v922_v33  ;;  %v903_v18 = vadd.f32 %v902_v40, %v5142_v56 }
  0xde   : > { %1176 = vmatmul.bf16.gmra.mxu2 %v951_v37  ;;  %1274 = vmatmul.bf16.gmra.mxu0 %v951_v37  ;;  %v3638_v37 = vld [vmem:[#allocation4 + $0x30] sm:$0xf] }
  0xdf   : > { %1225 = vmatmul.bf16.gmra.mxu3 %v952_v41  ;;  %1323 = vmatmul.bf16.gmra.mxu1 %v952_v41  ;;  %v838_v43 = vpop.f32.mrf.mxu0  ;;  %v3639_v41 = vor.u32 %v4145_v38, %v3638_v37  ;;  %v938_v22 = vmax.f32 %v903_v18, 0.0 }
  0xe0   : > { %v887_v44 = vpop.f32.mrf.mxu1  ;;  %v839_v51 = vadd.f32 %v838_v43, %v5140_v55  ;;  %v4144_v43 = vld [vmem:[#allocation4 + $0x34] sm:$0xf] }
  0xe1   : > { %v888_v52 = vadd.f32 %v887_v44, %v5142_v56  ;;  %v3640_v44 = vld [vmem:[#allocation4 + $0x38] sm:$0xf0]  ;;  %1609 = vmatpush.bf16.msra.mxu2 %v3639_v41 }
  0xe2   : > { %v925_v59 = vmax.f32 %v839_v51, 0.0  ;;  %v3643_v46 = vor.u32 %v4144_v43, %v3640_v44  ;;  %v900_v51 = vadd.f32 %v899_v24, %v5142_v56 }
  0xe3   : > { %v926_v63 = vmax.f32 %v888_v52, 0.0 }
  0xe4   : > { %1707 = vmatpush.bf16.msra.mxu0 %v3643_v46  ;;  %v904_v62 = vpop.f32.mrf.mxu3 }
  0xe5   : > { %v905_v19 = vadd.f32 %v904_v62, %v5142_v56  ;;  %v3678_v62 = vld [vmem:[#allocation4 + $0x80] sm:$0xf] }
  0xe7   : > { %v840_v53 = vpop.f32.mrf.mxu0 }
  0xe8   : > { %v841_v54 = vadd.f32 %v840_v53, %v5140_v55  ;;  %v889_v57 = vpop.f32.mrf.mxu1 }
  0xe9   : > { %v890_v58 = vadd.f32 %v889_v57, %v5142_v56  ;;  %v934_v57 = vmax.f32 %v898_v50, 0.0 }
  0xea   : > { %v927_v60 = vmax.f32 %v841_v54, 0.0 }
  0xeb   : > { %v928_v0 = vmax.f32 %v890_v58, 0.0  ;;  %v936_v58 = vmax.f32 %v900_v51, 0.0  ;;  %v3691_v51 = vor.u32 %v4156_v48, %v3688_v49 }
  0xec   : > { %v953_v4 = vpack.c.bf16 %v927_v60, %v925_v59  ;;  %v855_v59 = vpop.f32.mrf.mxu2  ;;  %v907_v17 = vpop.f32.mrf.mxu3 }
  0xed   : > { %v954_v7 = vpack.c.bf16 %v928_v0, %v926_v63  ;;  %v958_v0 = vpack.c.bf16 %v936_v58, %v934_v57  ;;  %v856_v16 = vadd.f32 %v855_v59, %v5140_v55  ;;  %v908_v38 = vadd.f32 %v907_v17, %v5142_v56  ;;  %v3614_v59 = vld [vmem:[#allocation4] sm:$0xf] }
  0xee   : > { %1181 = vmatmul.bf16.gmra.mxu2 %v953_v4  ;;  %1279 = vmatmul.bf16.gmra.mxu0 %v953_v4  ;;  %v3631_v4 = vor.u32 %v4143_v2, %v3630_v1 }
  0xef   : > { %1230 = vmatmul.bf16.gmra.mxu3 %v954_v7  ;;  %1328 = vmatmul.bf16.gmra.mxu1 %v954_v7  ;;  %v843_v8 = vpop.f32.mrf.mxu0  ;;  %v3632_v7 = vld [vmem:[#allocation4 + $0x28] sm:$0xf0]  ;;  %v939_v21 = vmax.f32 %v856_v16, 0.0  ;;  %v942_v44 = vmax.f32 %v908_v38, 0.0 }
  0xf0   : > { %v892_v12 = vpop.f32.mrf.mxu1  ;;  %v844_v23 = vadd.f32 %v843_v8, %v5140_v55  ;;  %v3695_v8 = vor.u32 %v4159_v5, %v3694_v3  ;;  %v3635_v9 = vor.u32 %v4142_v6, %v3632_v7  ;;  %1610 = vmatpush.bf16.msra.mxu2 %v3631_v4  ;;  %v3680_v4 = vld [vmem:[#allocation4 + $0x88] sm:$0xf0] }
  0xf1   : > { %v893_v25 = vadd.f32 %v892_v12, %v5142_v56  ;;  %v3699_v12 = vor.u32 %v4158_v10, %v3696_v11  ;;  %v959_v24 = vpack.c.bf16 %v939_v21, %v937_v20  ;;  %v965_v11 = vld [vmem:[%s5593_s5] sm:$0x3] }
  0xf2   : > { %v929_v14 = vmax.f32 %v844_v23, 0.0  ;;  %1659 = vmatpush.bf16.msra.mxu3 %v3695_v8  ;;  %1708 = vmatpush.bf16.msra.mxu0 %v3635_v9  ;;  %v940_v23 = vmax.f32 %v905_v19, 0.0  ;;  %v4138_v9 = vld [vmem:[#allocation4 + $0x4] sm:$0xf]  ;;  %v5185_v18 = vperm.slane %v965_v11, 0 }
  0xf3   : > { %v930_v31 = vmax.f32 %v893_v25, 0.0  ;;  %1757 = vmatpush.bf16.msra.mxu1 %v3699_v12 }
  0xf4   : > { %v858_v13 = vpop.f32.mrf.mxu2  ;;  %v960_v25 = vpack.c.bf16 %v940_v23, %v938_v22 }
  0xf5   : > { %v859_v36 = vadd.f32 %v858_v13, %v5140_v55  ;;  %v5182_v13 = vperm.slane %v965_v11, 1  ;;  %v4175_v11 = vld [vmem:[%s5596_s8 + $0x28] sm:$0xff] }
  0xf7   : > { %v845_v26 = vpop.f32.mrf.mxu0  ;;  %v941_v41 = vmax.f32 %v859_v36, 0.0  ;;  %1758 = vmatpush.bf16.msra.mxu1 %v3691_v51  ;;  %v4176_v51 = vld [vmem:[%s5596_s8 + $0x30] sm:$0xff] }
  0xf8   : > { %v846_v27 = vadd.f32 %v845_v26, %v5140_v55  ;;  %v894_v28 = vpop.f32.mrf.mxu1 }
  0xf9   : > { %v895_v29 = vadd.f32 %v894_v28, %v5142_v56  ;;  %v3622_v28 = vld [vmem:[#allocation4 + $0x10] sm:$0xf] }
  0xfa   : > { %v931_v30 = vmax.f32 %v846_v27, 0.0  ;;  %v909_v27 = vpop.f32.mrf.mxu3 }
  0xfb   : > { %v932_v32 = vmax.f32 %v895_v29, 0.0  ;;  %v4141_v29 = vld [vmem:[#allocation4 + $0x14] sm:$0xf0]  ;;  %v910_v39 = vadd.f32 %v909_v27, %v5142_v56 }
  0xfc   : > { %v955_v33 = vpack.c.bf16 %v931_v30, %v929_v14  ;;  %v860_v26 = vpop.f32.mrf.mxu2  ;;  %v3686_v14 = vld [vmem:[#allocation4 + $0x90] sm:$0xf]  ;;  %v3623_v30 = vor.u32 %v4141_v29, %v3622_v28  ;;  %v4177_v28 = vld [vmem:[%s5596_s8 + $0x38] sm:$0xff] }
  0xfd   : > { %v956_v34 = vpack.c.bf16 %v932_v32, %v930_v31  ;;  %v4157_v31 = vld [vmem:[#allocation4 + $0x94] sm:$0xf0]  ;;  %v4140_v32 = vld [vmem:[#allocation4 + $0x14] sm:$0xf]  ;;  %v861_v37 = vadd.f32 %v860_v26, %v5140_v55  ;;  %v944_v45 = vmax.f32 %v910_v39, 0.0 }
  0xfe   : > { %1186 = vmatmul.bf16.gmra.mxu2 %v955_v33  ;;  %1284 = vmatmul.bf16.gmra.mxu0 %v955_v33  ;;  %v3624_v33 = vld [vmem:[#allocation4 + $0x18] sm:$0xf0] }
  0xff   : > { %1235 = vmatmul.bf16.gmra.mxu3 %v956_v34  ;;  %1333 = vmatmul.bf16.gmra.mxu1 %v956_v34  ;;  %v848_v35 = vpop.f32.mrf.mxu0  ;;  %v3687_v34 = vor.u32 %v4157_v31, %v3686_v14  ;;  %v943_v42 = vmax.f32 %v861_v37, 0.0  ;;  %v962_v47 = vpack.c.bf16 %v944_v45, %v942_v44  ;;  %v4185_v29 = vld [vmem:[%s5596_s8 + $0x78] sm:$0xff] }
 0x100   : > { %v849_v52 = vadd.f32 %v848_v35, %v5140_v55  ;;  %v3627_v35 = vor.u32 %v4140_v32, %v3624_v33  ;;  %1611 = vmatpush.bf16.msra.mxu2 %v3623_v30 }
 0x101   : > { %1660 = vmatpush.bf16.msra.mxu3 %v3687_v34  ;;  %v961_v46 = vpack.c.bf16 %v943_v42, %v941_v41 }
 0x102   : > { %v933_v60 = vmax.f32 %v849_v52, 0.0  ;;  %1709 = vmatpush.bf16.msra.mxu0 %v3627_v35  ;;  %v912_v43 = vpop.f32.mrf.mxu3 }
 0x103   : > { %v913_v57 = vadd.f32 %v912_v43, %v5142_v56 }
 0x104   : > { %v863_v40 = vpop.f32.mrf.mxu2 }
 0x105   : > { %v946_v5 = vmax.f32 %v913_v57, 0.0 }
 0x107   : > { %v850_v53 = vpop.f32.mrf.mxu0 }
 0x108   : > { %v851_v54 = vadd.f32 %v850_v53, %v5140_v55  ;;  %v864_v53 = vadd.f32 %v863_v40, %v5140_v55 }
 0x10a   : > { %v935_v61 = vmax.f32 %v851_v54, 0.0  ;;  %v914_v52 = vpop.f32.mrf.mxu3  ;;  %v945_v1 = vmax.f32 %v864_v53, 0.0 }
 0x10b   : > { %v915_v58 = vadd.f32 %v914_v52, %v5142_v56  ;;  %v3616_v56 = vld [vmem:[#allocation4 + $0x8] sm:$0xf0]  ;;  %v4184_v52 = vld [vmem:[%s5596_s8 + $0x70] sm:$0xff] }
 0x10c   : > { %v957_v63 = vpack.c.bf16 %v935_v61, %v933_v60  ;;  %v865_v50 = vpop.f32.mrf.mxu2  ;;  %v4139_v60 = vld [vmem:[#allocation4 + $0x4] sm:$0xf0]  ;;  %v3619_v10 = vor.u32 %v4138_v9, %v3616_v56 }
 0x10d   : > { %v866_v54 = vadd.f32 %v865_v50, %v5140_v55  ;;  %v3615_v61 = vor.u32 %v4139_v60, %v3614_v59  ;;  %v948_v6 = vmax.f32 %v915_v58, 0.0 }
 0x10e   : > { %1191 = vmatmul.bf16.gmra.mxu2 %v957_v63  ;;  %1289 = vmatmul.bf16.gmra.mxu0 %v957_v63  ;;  %v4155_v63 = vld [vmem:[#allocation4 + $0x84] sm:$0xf0] }
 0x10f   : > { %1240 = vmatmul.bf16.gmra.mxu3 %v958_v0  ;;  %1338 = vmatmul.bf16.gmra.mxu1 %v958_v0  ;;  %v4154_v0 = vld [vmem:[#allocation4 + $0x84] sm:$0xf]  ;;  %v947_v2 = vmax.f32 %v866_v54, 0.0  ;;  %v3679_v3 = vor.u32 %v4155_v63, %v3678_v62  ;;  %v964_v8 = vpack.c.bf16 %v948_v6, %v946_v5 }
 0x110   : > { %1612 = vmatpush.bf16.msra.mxu2 %v3615_v61  ;;  %v3683_v7 = vor.u32 %v4154_v0, %v3680_v4  ;;  %1710 = vmatpush.bf16.msra.mxu0 %v3619_v10 }
 0x111   : > { %1661 = vmatpush.bf16.msra.mxu3 %v3679_v3  ;;  %v963_v55 = vpack.c.bf16 %v947_v2, %v945_v1 }
 0x112   : > { %1759 = vmatpush.bf16.msra.mxu1 %v3683_v7 }
 0x114   : > { %1981 = vmatpush.bf16.msrb.mxu2 %v4177_v28 }
 0x115   : > { %2030 = vmatpush.bf16.msrb.mxu3 %v4185_v29 }
 0x118   : > { %1982 = vmatpush.bf16.msrb.mxu2 %v4176_v51 }
 0x119   : > { %2031 = vmatpush.bf16.msrb.mxu3 %v4184_v52 }
 0x11c   : > { %1983 = vmatpush.bf16.msrb.mxu2 %v4175_v11 }
 0x11e   : > { %1196 = vmatmul.bf16.gmra.mxu2 %v959_v24  ;;  %1294 = vmatmul.bf16.gmra.mxu0 %v959_v24 }
 0x11f   : > { %1245 = vmatmul.bf16.gmra.mxu3 %v960_v25  ;;  %1343 = vmatmul.bf16.gmra.mxu1 %v960_v25 }
 0x12e   : > { %1201 = vmatmul.bf16.gmra.mxu2 %v961_v46  ;;  %1299 = vmatmul.bf16.gmra.mxu0 %v961_v46 }
 0x12f   : > { %1250 = vmatmul.bf16.gmra.mxu3 %v962_v47  ;;  %1348 = vmatmul.bf16.gmra.mxu1 %v962_v47 }
 0x13e   : > { %1206 = vmatmul.bf16.gmra.mxu2 %v963_v55  ;;  %1304 = vmatmul.bf16.gmra.mxu0 %v963_v55 }
 0x13f   : > { %1255 = vmatmul.bf16.gmra.mxu3 %v964_v8  ;;  %1353 = vmatmul.bf16.gmra.mxu1 %v964_v8 }
 0x14b   : > { %v1270_v12 = vpop.f32.mrf.mxu0 }
 0x14c   : > { %v1319_v15 = vpop.f32.mrf.mxu1  ;;  %v1271_v16 = vadd.f32 %v1270_v12, %v5182_v13  ;;  %v4183_v12 = vld [vmem:[%s5596_s8 + $0x68] sm:$0xff] }
 0x14d   : > { %2032 = vmatpush.bf16.msrb.mxu3 %v4183_v12 }
 0x14e   : > { %v1320_v21 = vadd.f32 %v1319_v15, %v1271_v16 }
 0x150   : > { %v1360_v26 = vmax.f32 %v1320_v21, 0.0 }
 0x151   : > { %v1172_v17 = vpop.f32.mrf.mxu2 }
 0x152   : > { %v1221_v19 = vpop.f32.mrf.mxu3  ;;  %v1173_v24 = vadd.f32 %v1172_v17, %v5185_v18 }
 0x153   : > { %v1272_v20 = vpop.f32.mrf.mxu0 }
 0x154   : > { %v1273_v22 = vadd.f32 %v1272_v20, %v5182_v13  ;;  %v1321_v23 = vpop.f32.mrf.mxu1  ;;  %v1222_v30 = vadd.f32 %v1221_v19, %v1173_v24 }
 0x156   : > { %v1322_v25 = vadd.f32 %v1321_v23, %v1273_v22  ;;  %v1359_v37 = vmax.f32 %v1222_v30, 0.0 }
 0x158   : > { %v1362_v27 = vmax.f32 %v1322_v25, 0.0 }
 0x159   : > { %v1174_v14 = vpop.f32.mrf.mxu2 }
 0x15a   : > { %v1392_v31 = vpack.c.bf16 %v1362_v27, %v1360_v26  ;;  %v1175_v32 = vadd.f32 %v1174_v14, %v5185_v18  ;;  %v1223_v33 = vpop.f32.mrf.mxu3 }
 0x15b   : > { %v1275_v34 = vpop.f32.mrf.mxu0 }
 0x15c   : > { %v1224_v35 = vadd.f32 %v1223_v33, %v1175_v32  ;;  %v1324_v36 = vpop.f32.mrf.mxu1  ;;  %1662 = vmatmul.bf16.vlgmr.msra.gmra.mxu3 %v1392_v31  ;;  %1760 = vmatmul.bf16.vlgmr.msra.gmra.mxu1 %v1392_v31  ;;  %v1276_v40 = vadd.f32 %v1275_v34, %v5182_v13 }
 0x15e   : > { %v1361_v38 = vmax.f32 %v1224_v35, 0.0  ;;  %v1325_v44 = vadd.f32 %v1324_v36, %v1276_v40 }
 0x160   : > { %v1391_v39 = vpack.c.bf16 %v1361_v38, %v1359_v37  ;;  %v1364_v49 = vmax.f32 %v1325_v44, 0.0  ;;  %v4174_v37 = vld [vmem:[%s5596_s8 + $0x20] sm:$0xff] }
 0x161   : > { %v1177_v41 = vpop.f32.mrf.mxu2  ;;  %v4182_v38 = vld [vmem:[%s5596_s8 + $0x60] sm:$0xff]  ;;  %1984 = vmatpush.bf16.msrb.mxu2 %v4174_v37 }
 0x162   : > { %v1226_v42 = vpop.f32.mrf.mxu3  ;;  %1613 = vmatmul.bf16.vlgmr.msra.gmra.mxu2 %v1391_v39  ;;  %1711 = vmatmul.bf16.vlgmr.msra.gmra.mxu0 %v1391_v39  ;;  %v1178_v47 = vadd.f32 %v1177_v41, %v5185_v18 }
 0x163   : > { %v1277_v43 = vpop.f32.mrf.mxu0  ;;  %2033 = vmatpush.bf16.msrb.mxu3 %v4182_v38 }
 0x164   : > { %v1278_v45 = vadd.f32 %v1277_v43, %v5182_v13  ;;  %v1326_v46 = vpop.f32.mrf.mxu1  ;;  %v1227_v54 = vadd.f32 %v1226_v42, %v1178_v47 }
 0x166   : > { %v1327_v48 = vadd.f32 %v1326_v46, %v1278_v45  ;;  %v1363_v63 = vmax.f32 %v1227_v54, 0.0 }
 0x168   : > { %v1366_v50 = vmax.f32 %v1327_v48, 0.0 }
 0x169   : > { %v1179_v53 = vpop.f32.mrf.mxu2 }
 0x16a   : > { %v1180_v57 = vadd.f32 %v1179_v53, %v5185_v18  ;;  %v1228_v58 = vpop.f32.mrf.mxu3  ;;  %v1394_v59 = vpack.c.bf16 %v1366_v50, %v1364_v49 }
 0x16b   : > { %v1280_v60 = vpop.f32.mrf.mxu0 }
 0x16c   : > { %v1229_v61 = vadd.f32 %v1228_v58, %v1180_v57  ;;  %v1329_v62 = vpop.f32.mrf.mxu1  ;;  %1667 = vmatmul.bf16.gmra.mxu3 %v1394_v59  ;;  %1765 = vmatmul.bf16.gmra.mxu1 %v1394_v59  ;;  %v1281_v1 = vadd.f32 %v1280_v60, %v5182_v13 }
 0x16e   : > { %v1365_v0 = vmax.f32 %v1229_v61, 0.0  ;;  %v1330_v6 = vadd.f32 %v1329_v62, %v1281_v1 }
 0x170   : > { %v1393_v2 = vpack.c.bf16 %v1365_v0, %v1363_v63  ;;  %v1368_v56 = vmax.f32 %v1330_v6, 0.0  ;;  %v4173_v63 = vld [vmem:[%s5596_s8 + $0x18] sm:$0xff] }
 0x171   : > { %v1182_v3 = vpop.f32.mrf.mxu2  ;;  %v4181_v0 = vld [vmem:[%s5596_s8 + $0x58] sm:$0xff]  ;;  %1985 = vmatpush.bf16.msrb.mxu2 %v4173_v63 }
 0x172   : > { %v1231_v4 = vpop.f32.mrf.mxu3  ;;  %1618 = vmatmul.bf16.gmra.mxu2 %v1393_v2  ;;  %1716 = vmatmul.bf16.gmra.mxu0 %v1393_v2  ;;  %v1183_v8 = vadd.f32 %v1182_v3, %v5185_v18 }
 0x173   : > { %v1282_v5 = vpop.f32.mrf.mxu0  ;;  %2034 = vmatpush.bf16.msrb.mxu3 %v4181_v0 }
 0x174   : > { %v1283_v7 = vadd.f32 %v1282_v5, %v5182_v13  ;;  %v1331_v55 = vpop.f32.mrf.mxu1  ;;  %v1232_v16 = vadd.f32 %v1231_v4, %v1183_v8 }
 0x176   : > { %v1332_v9 = vadd.f32 %v1331_v55, %v1283_v7  ;;  %v1367_v24 = vmax.f32 %v1232_v16, 0.0 }
 0x178   : > { %v1370_v10 = vmax.f32 %v1332_v9, 0.0 }
 0x179   : > { %v1184_v15 = vpop.f32.mrf.mxu2 }
 0x17a   : > { %v1185_v17 = vadd.f32 %v1184_v15, %v5185_v18  ;;  %v1233_v19 = vpop.f32.mrf.mxu3  ;;  %v1396_v20 = vpack.c.bf16 %v1370_v10, %v1368_v56 }
 0x17b   : > { %v1285_v21 = vpop.f32.mrf.mxu0 }
 0x17c   : > { %v1234_v22 = vadd.f32 %v1233_v19, %v1185_v17  ;;  %v1334_v23 = vpop.f32.mrf.mxu1  ;;  %1672 = vmatmul.bf16.gmra.mxu3 %v1396_v20  ;;  %1770 = vmatmul.bf16.gmra.mxu1 %v1396_v20  ;;  %v1286_v26 = vadd.f32 %v1285_v21, %v5182_v13 }
 0x17e   : > { %v1369_v25 = vmax.f32 %v1234_v22, 0.0  ;;  %v1335_v30 = vadd.f32 %v1334_v23, %v1286_v26 }
 0x180   : > { %v1395_v27 = vpack.c.bf16 %v1369_v25, %v1367_v24  ;;  %v1372_v35 = vmax.f32 %v1335_v30, 0.0  ;;  %v4172_v24 = vld [vmem:[%s5596_s8 + $0x10] sm:$0xff] }
 0x181   : > { %v1187_v28 = vpop.f32.mrf.mxu2  ;;  %v4180_v25 = vld [vmem:[%s5596_s8 + $0x50] sm:$0xff]  ;;  %1986 = vmatpush.bf16.msrb.mxu2 %v4172_v24 }
 0x182   : > { %v1236_v29 = vpop.f32.mrf.mxu3  ;;  %1623 = vmatmul.bf16.gmra.mxu2 %v1395_v27  ;;  %1721 = vmatmul.bf16.gmra.mxu0 %v1395_v27  ;;  %v1188_v33 = vadd.f32 %v1187_v28, %v5185_v18 }
 0x183   : > { %v1287_v14 = vpop.f32.mrf.mxu0  ;;  %2035 = vmatpush.bf16.msrb.mxu3 %v4180_v25 }
 0x184   : > { %v1288_v31 = vadd.f32 %v1287_v14, %v5182_v13  ;;  %v1336_v32 = vpop.f32.mrf.mxu1  ;;  %v1237_v40 = vadd.f32 %v1236_v29, %v1188_v33 }
 0x186   : > { %v1337_v34 = vadd.f32 %v1336_v32, %v1288_v31  ;;  %v1371_v47 = vmax.f32 %v1237_v40, 0.0  ;;  %v4179_v40 = vld [vmem:[%s5596_s8 + $0x48] sm:$0xff] }
 0x187   : > { %2036 = vmatpush.bf16.msrb.mxu3 %v4179_v40 }
 0x188   : > { %v1374_v36 = vmax.f32 %v1337_v34, 0.0 }
 0x189   : > { %v1189_v39 = vpop.f32.mrf.mxu2 }
 0x18a   : > { %v1190_v41 = vadd.f32 %v1189_v39, %v5185_v18  ;;  %v1238_v42 = vpop.f32.mrf.mxu3  ;;  %v1398_v43 = vpack.c.bf16 %v1374_v36, %v1372_v35  ;;  %v4171_v39 = vld [vmem:[%s5596_s8 + $0x8] sm:$0xff] }
 0x18b   : > { %v1290_v44 = vpop.f32.mrf.mxu0  ;;  %1987 = vmatpush.bf16.msrb.mxu2 %v4171_v39 }
 0x18c   : > { %v1239_v45 = vadd.f32 %v1238_v42, %v1190_v41  ;;  %v1339_v46 = vpop.f32.mrf.mxu1  ;;  %1677 = vmatmul.bf16.gmra.mxu3 %v1398_v43  ;;  %1775 = vmatmul.bf16.gmra.mxu1 %v1398_v43  ;;  %v1291_v49 = vadd.f32 %v1290_v44, %v5182_v13 }
 0x18e   : > { %v1373_v48 = vmax.f32 %v1239_v45, 0.0  ;;  %v1340_v54 = vadd.f32 %v1339_v46, %v1291_v49 }
 0x190   : > { %v1397_v50 = vpack.c.bf16 %v1373_v48, %v1371_v47  ;;  %v1376_v61 = vmax.f32 %v1340_v54, 0.0 }
 0x191   : > { %v1192_v51 = vpop.f32.mrf.mxu2 }
 0x192   : > { %v1241_v52 = vpop.f32.mrf.mxu3  ;;  %1628 = vmatmul.bf16.gmra.mxu2 %v1397_v50  ;;  %1726 = vmatmul.bf16.gmra.mxu0 %v1397_v50  ;;  %v1193_v59 = vadd.f32 %v1192_v51, %v5185_v18 }
 0x193   : > { %v1292_v53 = vpop.f32.mrf.mxu0 }
 0x194   : > { %v1293_v57 = vadd.f32 %v1292_v53, %v5182_v13  ;;  %v1341_v58 = vpop.f32.mrf.mxu1  ;;  %v1242_v2 = vadd.f32 %v1241_v52, %v1193_v59 }
 0x196   : > { %v1342_v60 = vadd.f32 %v1341_v58, %v1293_v57  ;;  %v1375_v8 = vmax.f32 %v1242_v2, 0.0 }
 0x198   : > { %v1378_v62 = vmax.f32 %v1342_v60, 0.0 }
 0x199   : > { %v1194_v1 = vpop.f32.mrf.mxu2 }
 0x19a   : > { %v1195_v3 = vadd.f32 %v1194_v1, %v5185_v18  ;;  %v1243_v4 = vpop.f32.mrf.mxu3  ;;  %v1400_v5 = vpack.c.bf16 %v1378_v62, %v1376_v61 }
 0x19b   : > { %v1295_v6 = vpop.f32.mrf.mxu0 }
 0x19c   : > { %v1244_v7 = vadd.f32 %v1243_v4, %v1195_v3  ;;  %v1344_v55 = vpop.f32.mrf.mxu1  ;;  %1682 = vmatmul.bf16.gmra.mxu3 %v1400_v5  ;;  %1780 = vmatmul.bf16.gmra.mxu1 %v1400_v5  ;;  %v1296_v56 = vadd.f32 %v1295_v6, %v5182_v13 }
 0x19e   : > { %v1377_v9 = vmax.f32 %v1244_v7, 0.0  ;;  %v1345_v16 = vadd.f32 %v1344_v55, %v1296_v56 }
 0x1a0   : > { %v1399_v10 = vpack.c.bf16 %v1377_v9, %v1375_v8  ;;  %v1380_v22 = vmax.f32 %v1345_v16, 0.0 }
 0x1a1   : > { %v1197_v11 = vpop.f32.mrf.mxu2 }
 0x1a2   : > { %v1246_v12 = vpop.f32.mrf.mxu3  ;;  %1633 = vmatmul.bf16.gmra.mxu2 %v1399_v10  ;;  %1731 = vmatmul.bf16.gmra.mxu0 %v1399_v10  ;;  %v1198_v20 = vadd.f32 %v1197_v11, %v5185_v18  ;;  %v4170_v11 = vld [vmem:[%s5596_s8] sm:$0xff] }
 0x1a3   : > { %v1297_v15 = vpop.f32.mrf.mxu0  ;;  %1988 = vmatpush.bf16.msrb.mxu2 %v4170_v11 }
 0x1a4   : > { %v1298_v17 = vadd.f32 %v1297_v15, %v5182_v13  ;;  %v1346_v19 = vpop.f32.mrf.mxu1  ;;  %v1247_v27 = vadd.f32 %v1246_v12, %v1198_v20  ;;  %v1407_v20 = vld [vmem:[%s5595_s7] sm:$0x3] }
 0x1a6   : > { %v1347_v21 = vadd.f32 %v1346_v19, %v1298_v17  ;;  %v1379_v33 = vmax.f32 %v1247_v27, 0.0  ;;  %v5272_v27 = vperm.slane %v1407_v20, 0 }
 0x1a8   : > { %v1382_v23 = vmax.f32 %v1347_v21, 0.0 }
 0x1a9   : > { %v1199_v26 = vpop.f32.mrf.mxu2 }
 0x1aa   : > { %v1200_v28 = vadd.f32 %v1199_v26, %v5185_v18  ;;  %v1248_v29 = vpop.f32.mrf.mxu3  ;;  %v1402_v14 = vpack.c.bf16 %v1382_v23, %v1380_v22  ;;  %v5269_v23 = vperm.slane %v1407_v20, 1 }
 0x1ab   : > { %v1300_v30 = vpop.f32.mrf.mxu0 }
 0x1ac   : > { %v1249_v31 = vadd.f32 %v1248_v29, %v1200_v28  ;;  %v1349_v32 = vpop.f32.mrf.mxu1  ;;  %1687 = vmatmul.bf16.gmra.mxu3 %v1402_v14  ;;  %1785 = vmatmul.bf16.gmra.mxu1 %v1402_v14  ;;  %v1301_v35 = vadd.f32 %v1300_v30, %v5182_v13 }
 0x1ae   : > { %v1381_v34 = vmax.f32 %v1249_v31, 0.0  ;;  %v1350_v42 = vadd.f32 %v1349_v32, %v1301_v35 }
 0x1b0   : > { %v1401_v36 = vpack.c.bf16 %v1381_v34, %v1379_v33  ;;  %v1384_v47 = vmax.f32 %v1350_v42, 0.0 }
 0x1b1   : > { %v1202_v37 = vpop.f32.mrf.mxu2 }
 0x1b2   : > { %v1251_v38 = vpop.f32.mrf.mxu3  ;;  %1638 = vmatmul.bf16.gmra.mxu2 %v1401_v36  ;;  %1736 = vmatmul.bf16.gmra.mxu0 %v1401_v36  ;;  %v1203_v45 = vadd.f32 %v1202_v37, %v5185_v18 }
 0x1b3   : > { %v1302_v41 = vpop.f32.mrf.mxu0 }
 0x1b4   : > { %v1303_v43 = vadd.f32 %v1302_v41, %v5182_v13  ;;  %v1351_v44 = vpop.f32.mrf.mxu1  ;;  %v1252_v50 = vadd.f32 %v1251_v38, %v1203_v45 }
 0x1b6   : > { %v1352_v46 = vadd.f32 %v1351_v44, %v1303_v43  ;;  %v1383_v59 = vmax.f32 %v1252_v50, 0.0 }
 0x1b8   : > { %v1386_v48 = vmax.f32 %v1352_v46, 0.0 }
 0x1b9   : > { %v1204_v49 = vpop.f32.mrf.mxu2 }
 0x1ba   : > { %v1205_v51 = vadd.f32 %v1204_v49, %v5185_v18  ;;  %v1253_v52 = vpop.f32.mrf.mxu3  ;;  %v1404_v53 = vpack.c.bf16 %v1386_v48, %v1384_v47 }
 0x1bb   : > { %v1305_v54 = vpop.f32.mrf.mxu0 }
 0x1bc   : > { %v1254_v57 = vadd.f32 %v1253_v52, %v1205_v51  ;;  %v1354_v58 = vpop.f32.mrf.mxu1  ;;  %1692 = vmatmul.bf16.gmra.mxu3 %v1404_v53  ;;  %1790 = vmatmul.bf16.gmra.mxu1 %v1404_v53  ;;  %v1306_v61 = vadd.f32 %v1305_v54, %v5182_v13 }
 0x1be   : > { %v1385_v60 = vmax.f32 %v1254_v57, 0.0  ;;  %v1355_v2 = vadd.f32 %v1354_v58, %v1306_v61 }
 0x1c0   : > { %v1403_v62 = vpack.c.bf16 %v1385_v60, %v1383_v59  ;;  %v1388_v7 = vmax.f32 %v1355_v2, 0.0 }
 0x1c1   : > { %v1207_v63 = vpop.f32.mrf.mxu2 }
 0x1c2   : > { %v1256_v0 = vpop.f32.mrf.mxu3  ;;  %1643 = vmatmul.bf16.gmra.mxu2 %v1403_v62  ;;  %1741 = vmatmul.bf16.gmra.mxu0 %v1403_v62  ;;  %v1208_v5 = vadd.f32 %v1207_v63, %v5185_v18 }
 0x1c3   : > { %v1307_v1 = vpop.f32.mrf.mxu0 }
 0x1c4   : > { %v1308_v3 = vadd.f32 %v1307_v1, %v5182_v13  ;;  %v1356_v4 = vpop.f32.mrf.mxu1  ;;  %v1257_v9 = vadd.f32 %v1256_v0, %v1208_v5  ;;  %v4178_v13 = vld [vmem:[%s5596_s8 + $0x40] sm:$0xff] }
 0x1c5   : > { %2037 = vmatpush.bf16.msrb.mxu3 %v4178_v13 }
 0x1c6   : > { %v1357_v6 = vadd.f32 %v1356_v4, %v1308_v3  ;;  %v1387_v16 = vmax.f32 %v1257_v9, 0.0 }
 0x1c8   : > { %v1390_v55 = vmax.f32 %v1357_v6, 0.0 }
 0x1c9   : > { %v1209_v8 = vpop.f32.mrf.mxu2 }
 0x1ca   : > { %v1210_v56 = vadd.f32 %v1209_v8, %v5185_v18  ;;  %v1406_v10 = vpack.c.bf16 %v1390_v55, %v1388_v7  ;;  %v1258_v12 = vpop.f32.mrf.mxu3 }
 0x1cc   : > { %v1259_v15 = vadd.f32 %v1258_v12, %v1210_v56  ;;  %1697 = vmatmul.bf16.gmra.mxu3 %v1406_v10  ;;  %1795 = vmatmul.bf16.gmra.mxu1 %v1406_v10 }
 0x1ce   : > { %v1389_v17 = vmax.f32 %v1259_v15, 0.0 }
 0x1d0   : > { %v1405_v19 = vpack.c.bf16 %v1389_v17, %v1387_v16 }
 0x1d2   : > { %1648 = vmatmul.bf16.gmra.mxu2 %v1405_v19  ;;  %1746 = vmatmul.bf16.gmra.mxu0 %v1405_v19 }
 0x1d9   : > { %v1761_v18 = vpop.f32.mrf.mxu1 }
 0x1df   : > { %v1663_v21 = vpop.f32.mrf.mxu3  ;;  %v1712_v22 = vpop.f32.mrf.mxu0 }
 0x1e0   : > { %v1713_v25 = vadd.f32 %v1712_v22, %v5269_v23 }
 0x1e1   : > { %v1763_v24 = vpop.f32.mrf.mxu1 }
 0x1e2   : > { %v1762_v14 = vadd.f32 %v1761_v18, %v1713_v25 }
 0x1e4   : > { %v1802_v34 = vmax.f32 %v1762_v14, 0.0 }
 0x1e5   : > { %v1614_v26 = vpop.f32.mrf.mxu2 }
 0x1e6   : > { %v1615_v32 = vadd.f32 %v1614_v26, %v5272_v27 }
 0x1e7   : > { %v1665_v28 = vpop.f32.mrf.mxu3  ;;  %v1714_v29 = vpop.f32.mrf.mxu0 }
 0x1e8   : > { %v1715_v30 = vadd.f32 %v1714_v29, %v5269_v23  ;;  %v1664_v37 = vadd.f32 %v1663_v21, %v1615_v32 }
 0x1e9   : > { %v1766_v31 = vpop.f32.mrf.mxu1 }
 0x1ea   : > { %v1764_v33 = vadd.f32 %v1763_v24, %v1715_v30  ;;  %v1801_v44 = vmax.f32 %v1664_v37, 0.0 }
 0x1ec   : > { %v1804_v35 = vmax.f32 %v1764_v33, 0.0 }
 0x1ed   : > { %v1616_v36 = vpop.f32.mrf.mxu2 }
 0x1ee   : > { %v1834_v38 = vpack.c.bf16 %v1804_v35, %v1802_v34  ;;  %v1617_v39 = vadd.f32 %v1616_v36, %v5272_v27 }
 0x1ef   : > { %v1668_v40 = vpop.f32.mrf.mxu3  ;;  %v1717_v41 = vpop.f32.mrf.mxu0 }
 0x1f0   : > { %v1666_v42 = vadd.f32 %v1665_v28, %v1617_v39  ;;  %2038 = vmatmul.bf16.vlgmr.msrb.gmra.mxu3 %v1834_v38  ;;  %v1718_v47 = vadd.f32 %v1717_v41, %v5269_v23 }
 0x1f1   : > { %v1768_v43 = vpop.f32.mrf.mxu1 }
 0x1f2   : > { %v1803_v45 = vmax.f32 %v1666_v42, 0.0  ;;  %v1767_v51 = vadd.f32 %v1766_v31, %v1718_v47 }
 0x1f4   : > { %v1833_v46 = vpack.c.bf16 %v1803_v45, %v1801_v44  ;;  %v1806_v58 = vmax.f32 %v1767_v51, 0.0 }
 0x1f5   : > { %v1619_v48 = vpop.f32.mrf.mxu2 }
 0x1f6   : > { %1989 = vmatmul.bf16.vlgmr.msrb.gmra.mxu2 %v1833_v46  ;;  %v1620_v54 = vadd.f32 %v1619_v48, %v5272_v27 }
 0x1f7   : > { %v1670_v49 = vpop.f32.mrf.mxu3  ;;  %v1719_v50 = vpop.f32.mrf.mxu0 }
 0x1f8   : > { %v1720_v52 = vadd.f32 %v1719_v50, %v5269_v23  ;;  %v1669_v61 = vadd.f32 %v1668_v40, %v1620_v54 }
 0x1f9   : > { %v1771_v53 = vpop.f32.mrf.mxu1 }
 0x1fa   : > { %v1769_v57 = vadd.f32 %v1768_v43, %v1720_v52  ;;  %v1805_v4 = vmax.f32 %v1669_v61, 0.0 }
 0x1fc   : > { %v1808_v59 = vmax.f32 %v1769_v57, 0.0 }
 0x1fd   : > { %v1621_v60 = vpop.f32.mrf.mxu2 }
 0x1fe   : > { %v1622_v62 = vadd.f32 %v1621_v60, %v5272_v27  ;;  %v1836_v63 = vpack.c.bf16 %v1808_v59, %v1806_v58 }
 0x1ff   : > { %v1673_v0 = vpop.f32.mrf.mxu3  ;;  %v1722_v1 = vpop.f32.mrf.mxu0 }
 0x200   : > { %v1671_v2 = vadd.f32 %v1670_v49, %v1622_v62  ;;  %2043 = vmatmul.bf16.gmra.mxu3 %v1836_v63  ;;  %v1723_v6 = vadd.f32 %v1722_v1, %v5269_v23 }
 0x201   : > { %v1773_v3 = vpop.f32.mrf.mxu1 }
 0x202   : > { %v1807_v5 = vmax.f32 %v1671_v2, 0.0  ;;  %v1772_v56 = vadd.f32 %v1771_v53, %v1723_v6 }
 0x204   : > { %v1835_v7 = vpack.c.bf16 %v1807_v5, %v1805_v4  ;;  %v1810_v13 = vmax.f32 %v1772_v56, 0.0 }
 0x205   : > { %v1624_v55 = vpop.f32.mrf.mxu2 }
 0x206   : > { %1994 = vmatmul.bf16.gmra.mxu2 %v1835_v7  ;;  %v1625_v12 = vadd.f32 %v1624_v55, %v5272_v27 }
 0x207   : > { %v1675_v8 = vpop.f32.mrf.mxu3  ;;  %v1724_v9 = vpop.f32.mrf.mxu0 }
 0x208   : > { %v1725_v10 = vadd.f32 %v1724_v9, %v5269_v23  ;;  %v1674_v19 = vadd.f32 %v1673_v0, %v1625_v12 }
 0x209   : > { %v1776_v11 = vpop.f32.mrf.mxu1 }
 0x20a   : > { %v1774_v15 = vadd.f32 %v1773_v3, %v1725_v10  ;;  %v1809_v26 = vmax.f32 %v1674_v19, 0.0 }
 0x20c   : > { %v1812_v16 = vmax.f32 %v1774_v15, 0.0 }
 0x20d   : > { %v1626_v17 = vpop.f32.mrf.mxu2 }
 0x20e   : > { %v1627_v18 = vadd.f32 %v1626_v17, %v5272_v27  ;;  %v1838_v20 = vpack.c.bf16 %v1812_v16, %v1810_v13 }
 0x20f   : > { %v1678_v21 = vpop.f32.mrf.mxu3  ;;  %v1727_v22 = vpop.f32.mrf.mxu0 }
 0x210   : > { %v1676_v24 = vadd.f32 %v1675_v8, %v1627_v18  ;;  %2048 = vmatmul.bf16.gmra.mxu3 %v1838_v20  ;;  %v1728_v29 = vadd.f32 %v1727_v22, %v5269_v23 }
 0x211   : > { %v1778_v25 = vpop.f32.mrf.mxu1 }
 0x212   : > { %v1811_v28 = vmax.f32 %v1676_v24, 0.0  ;;  %v1777_v33 = vadd.f32 %v1776_v11, %v1728_v29 }
 0x214   : > { %v1837_v14 = vpack.c.bf16 %v1811_v28, %v1809_v26  ;;  %v1814_v38 = vmax.f32 %v1777_v33, 0.0 }
 0x215   : > { %v1629_v30 = vpop.f32.mrf.mxu2 }
 0x216   : > { %1999 = vmatmul.bf16.gmra.mxu2 %v1837_v14  ;;  %v1630_v36 = vadd.f32 %v1629_v30, %v5272_v27 }
 0x217   : > { %v1680_v31 = vpop.f32.mrf.mxu3  ;;  %v1729_v32 = vpop.f32.mrf.mxu0 }
 0x218   : > { %v1730_v34 = vadd.f32 %v1729_v32, %v5269_v23  ;;  %v1679_v41 = vadd.f32 %v1678_v21, %v1630_v36  ;;  %v4201_v36 = vld [vmem:[#allocation7 + $0x74] sm:$0xf0] }
 0x219   : > { %v1781_v35 = vpop.f32.mrf.mxu1 }
 0x21a   : > { %v1779_v37 = vadd.f32 %v1778_v25, %v1730_v34  ;;  %v1813_v48 = vmax.f32 %v1679_v41, 0.0  ;;  %v3854_v41 = vld [vmem:[#allocation7 + $0x60] sm:$0xf] }
 0x21c   : > { %v1816_v39 = vmax.f32 %v1779_v37, 0.0  ;;  %v4200_v37 = vld [vmem:[#allocation7 + $0x74] sm:$0xf] }
 0x21d   : > { %v1631_v40 = vpop.f32.mrf.mxu2 }
 0x21e   : > { %v1632_v42 = vadd.f32 %v1631_v40, %v5272_v27  ;;  %v1840_v43 = vpack.c.bf16 %v1816_v39, %v1814_v38  ;;  %v3864_v40 = vld [vmem:[#allocation7 + $0x78] sm:$0xf0] }
 0x21f   : > { %v1683_v44 = vpop.f32.mrf.mxu3  ;;  %v1732_v45 = vpop.f32.mrf.mxu0 }
 0x220   : > { %v1681_v46 = vadd.f32 %v1680_v31, %v1632_v42  ;;  %2053 = vmatmul.bf16.gmra.mxu3 %v1840_v43  ;;  %v1733_v50 = vadd.f32 %v1732_v45, %v5269_v23  ;;  %v4199_v42 = vld [vmem:[#allocation7 + $0x64] sm:$0xf0]  ;;  %v3867_v45 = vor.u32 %v4200_v37, %v3864_v40  ;;  %v4204_v40 = vld [vmem:[#allocation9 + $0x14] sm:$0xf] }
 0x221   : > { %v1783_v47 = vpop.f32.mrf.mxu1 }
 0x222   : > { %v1815_v49 = vmax.f32 %v1681_v46, 0.0  ;;  %v1782_v57 = vadd.f32 %v1781_v35, %v1733_v50  ;;  %v3862_v35 = vld [vmem:[#allocation7 + $0x70] sm:$0xf]  ;;  %v4198_v46 = vld [vmem:[#allocation7 + $0x64] sm:$0xf]  ;;  %2254 = vmatpush.bf16.msrb.mxu1 %v3867_v45 }
 0x223   : > { %v3863_v39 = vor.u32 %v4201_v36, %v3862_v35 }
 0x224   : > { %v1839_v51 = vpack.c.bf16 %v1815_v49, %v1813_v48  ;;  %v1818_v62 = vmax.f32 %v1782_v57, 0.0  ;;  %v3855_v48 = vor.u32 %v4199_v42, %v3854_v41  ;;  %v3880_v41 = vld [vmem:[#allocation9 + $0x18] sm:$0xf0] }
 0x225   : > { %v1634_v52 = vpop.f32.mrf.mxu2  ;;  %2205 = vmatpush.bf16.msrb.mxu0 %v3863_v39  ;;  %4258 = vmatpush.bf16.msra.mxu2 %v3863_v39  ;;  %v3824_v39 = vld [vmem:[#allocation7 + $0x28] sm:$0xf0] }
 0x226   : > { %2004 = vmatmul.bf16.gmra.mxu2 %v1839_v51  ;;  %v1635_v60 = vadd.f32 %v1634_v52, %v5272_v27 }
 0x227   : > { %v1685_v53 = vpop.f32.mrf.mxu3  ;;  %v1734_v54 = vpop.f32.mrf.mxu0 }
 0x228   : > { %v1735_v58 = vadd.f32 %v1734_v54, %v5269_v23  ;;  %v1684_v1 = vadd.f32 %v1683_v44, %v1635_v60 }
 0x229   : > { %v1786_v59 = vpop.f32.mrf.mxu1  ;;  %2206 = vmatpush.bf16.msrb.mxu0 %v3855_v48  ;;  %4259 = vmatpush.bf16.msra.mxu2 %v3855_v48  ;;  %v4188_v48 = vld [vmem:[#allocation7 + $0x14] sm:$0xf] }
 0x22a   : > { %v1784_v61 = vadd.f32 %v1783_v47, %v1735_v58  ;;  %v1817_v55 = vmax.f32 %v1684_v1, 0.0  ;;  %v3856_v47 = vld [vmem:[#allocation7 + $0x68] sm:$0xf0]  ;;  %v4197_v1 = vld [vmem:[#allocation7 + $0x54] sm:$0xf0] }
 0x22b   : > { %v3859_v51 = vor.u32 %v4198_v46, %v3856_v47  ;;  %v3814_v46 = vld [vmem:[#allocation7 + $0x10] sm:$0xf]  ;;  %v4189_v47 = vld [vmem:[#allocation7 + $0x14] sm:$0xf0] }
 0x22c   : > { %v1820_v63 = vmax.f32 %v1784_v61, 0.0 }
 0x22d   : > { %v1636_v0 = vpop.f32.mrf.mxu2  ;;  %2255 = vmatpush.bf16.msrb.mxu1 %v3859_v51  ;;  %v3815_v51 = vor.u32 %v4189_v47, %v3814_v46 }
 0x22e   : > { %v1637_v2 = vadd.f32 %v1636_v0, %v5272_v27  ;;  %v1842_v3 = vpack.c.bf16 %v1820_v63, %v1818_v62  ;;  %v3846_v0 = vld [vmem:[#allocation7 + $0x50] sm:$0xf] }
 0x22f   : > { %v1688_v4 = vpop.f32.mrf.mxu3  ;;  %v1737_v5 = vpop.f32.mrf.mxu0 }
 0x230   : > { %v1686_v6 = vadd.f32 %v1685_v53, %v1637_v2  ;;  %2058 = vmatmul.bf16.gmra.mxu3 %v1842_v3  ;;  %v1738_v9 = vadd.f32 %v1737_v5, %v5269_v23  ;;  %v4196_v2 = vld [vmem:[#allocation7 + $0x54] sm:$0xf]  ;;  %v3847_v5 = vor.u32 %v4197_v1, %v3846_v0  ;;  %v5306_v1 = vld [vmem:[%s4912_s28] sm:$0xff] }
 0x231   : > { %v1788_v7 = vpop.f32.mrf.mxu1 }
 0x232   : > { %v1819_v8 = vmax.f32 %v1686_v6, 0.0  ;;  %v1787_v15 = vadd.f32 %v1786_v59, %v1738_v9  ;;  %v3848_v6 = vld [vmem:[#allocation7 + $0x58] sm:$0xf0]  ;;  %v4194_v9 = vld [vmem:[#allocation7 + $0x44] sm:$0xf]  ;;  %2207 = vmatpush.bf16.msrb.mxu0 %v3847_v5  ;;  %4260 = vmatpush.bf16.msra.mxu2 %v3847_v5 }
 0x234   : > { %v1841_v56 = vpack.c.bf16 %v1819_v8, %v1817_v55  ;;  %v1822_v18 = vmax.f32 %v1787_v15, 0.0  ;;  %v3838_v55 = vld [vmem:[#allocation7 + $0x40] sm:$0xf]  ;;  %v4195_v8 = vld [vmem:[#allocation7 + $0x44] sm:$0xf0] }
 0x235   : > { %v1639_v10 = vpop.f32.mrf.mxu2 }
 0x236   : > { %2009 = vmatmul.bf16.gmra.mxu2 %v1841_v56  ;;  %v1640_v16 = vadd.f32 %v1639_v10, %v5272_v27 }
 0x237   : > { %v1690_v11 = vpop.f32.mrf.mxu3  ;;  %v1739_v12 = vpop.f32.mrf.mxu0 }
 0x238   : > { %v1740_v13 = vadd.f32 %v1739_v12, %v5269_v23  ;;  %v1689_v22 = vadd.f32 %v1688_v4, %v1640_v16  ;;  %v3840_v12 = vld [vmem:[#allocation7 + $0x48] sm:$0xf0] }
 0x239   : > { %v1791_v19 = vpop.f32.mrf.mxu1  ;;  %v3843_v16 = vor.u32 %v4194_v9, %v3840_v12 }
 0x23a   : > { %v1789_v17 = vadd.f32 %v1788_v7, %v1740_v13  ;;  %v1821_v14 = vmax.f32 %v1689_v22, 0.0  ;;  %v3851_v7 = vor.u32 %v4196_v2, %v3848_v6  ;;  %v4193_v22 = vld [vmem:[#allocation7 + $0x34] sm:$0xf0] }
 0x23c   : > { %v1824_v20 = vmax.f32 %v1789_v17, 0.0  ;;  %2256 = vmatpush.bf16.msrb.mxu1 %v3851_v7  ;;  %v5314_v7 = vld [vmem:[%s4912_s28 + $0x8] sm:$0xff] }
 0x23d   : > { %v1641_v21 = vpop.f32.mrf.mxu2 }
 0x23e   : > { %v1642_v24 = vadd.f32 %v1641_v21, %v5272_v27  ;;  %v1844_v25 = vpack.c.bf16 %v1824_v20, %v1822_v18  ;;  %v3830_v21 = vld [vmem:[#allocation7 + $0x30] sm:$0xf] }
 0x23f   : > { %v1742_v26 = vpop.f32.mrf.mxu0  ;;  %v1693_v29 = vpop.f32.mrf.mxu3 }
 0x240   : > { %v1691_v28 = vadd.f32 %v1690_v11, %v1642_v24  ;;  %2063 = vmatmul.bf16.gmra.mxu3 %v1844_v25  ;;  %v1743_v31 = vadd.f32 %v1742_v26, %v5269_v23  ;;  %v3839_v11 = vor.u32 %v4195_v8, %v3838_v55  ;;  %2257 = vmatpush.bf16.msrb.mxu1 %v3843_v16  ;;  %v4192_v24 = vld [vmem:[#allocation7 + $0x34] sm:$0xf] }
 0x241   : > { %v1793_v33 = vpop.f32.mrf.mxu1 }
 0x242   : > { %v1823_v30 = vmax.f32 %v1691_v28, 0.0  ;;  %v1792_v43 = vadd.f32 %v1791_v19, %v1743_v31  ;;  %2208 = vmatpush.bf16.msrb.mxu0 %v3839_v11  ;;  %4261 = vmatpush.bf16.msra.mxu2 %v3839_v11  ;;  %v3831_v28 = vor.u32 %v4193_v22, %v3830_v21 }
 0x244   : > { %v1843_v32 = vpack.c.bf16 %v1823_v30, %v1821_v14  ;;  %v1826_v53 = vmax.f32 %v1792_v43, 0.0 }
 0x245   : > { %v1644_v34 = vpop.f32.mrf.mxu2 }
 0x246   : > { %2014 = vmatmul.bf16.gmra.mxu2 %v1843_v32  ;;  %v1645_v49 = vadd.f32 %v1644_v34, %v5272_v27  ;;  %2209 = vmatpush.bf16.msrb.mxu0 %v3831_v28  ;;  %v4190_v34 = vld [vmem:[#allocation7 + $0x24] sm:$0xf] }
 0x247   : > { %v1744_v38 = vpop.f32.mrf.mxu0  ;;  %v1695_v52 = vpop.f32.mrf.mxu3  ;;  %4262 = vmatpush.bf16.msra.mxu2 %v3831_v28  ;;  %v3827_v43 = vor.u32 %v4190_v34, %v3824_v39 }
 0x248   : > { %v1745_v44 = vadd.f32 %v1744_v38, %v5269_v23  ;;  %v1694_v58 = vadd.f32 %v1693_v29, %v1645_v49  ;;  %v3832_v29 = vld [vmem:[#allocation7 + $0x38] sm:$0xf0] }
 0x249   : > { %v1796_v61 = vpop.f32.mrf.mxu1  ;;  %v3835_v14 = vor.u32 %v4192_v24, %v3832_v29 }
 0x24a   : > { %v1794_v50 = vadd.f32 %v1793_v33, %v1745_v44  ;;  %v1825_v3 = vmax.f32 %v1694_v58, 0.0  ;;  %v4191_v33 = vld [vmem:[#allocation7 + $0x24] sm:$0xf0]  ;;  %v3883_v44 = vor.u32 %v4204_v40, %v3880_v41 }
 0x24b   : > { %2258 = vmatpush.bf16.msrb.mxu1 %v3835_v14 }
 0x24c   : > { %v1828_v54 = vmax.f32 %v1794_v50, 0.0  ;;  %2382 = vmatpush.bf16.msra.mxu3 %v3883_v44 }
 0x24d   : > { %v1646_v57 = vpop.f32.mrf.mxu2 }
 0x24e   : > { %v1647_v59 = vadd.f32 %v1646_v57, %v5272_v27  ;;  %v1846_v60 = vpack.c.bf16 %v1828_v54, %v1826_v53  ;;  %v3872_v54 = vld [vmem:[#allocation9 + $0x8] sm:$0xf0] }
 0x24f   : > { %v1747_v62 = vpop.f32.mrf.mxu0  ;;  %v1698_v15 = vpop.f32.mrf.mxu3  ;;  %2259 = vmatpush.bf16.msrb.mxu1 %v3827_v43 }
 0x250   : > { %v1696_v63 = vadd.f32 %v1695_v52, %v1647_v59  ;;  %2068 = vmatmul.bf16.gmra.mxu3 %v1846_v60  ;;  %v1748_v56 = vadd.f32 %v1747_v62, %v5269_v23  ;;  %v4202_v52 = vld [vmem:[#allocation9 + $0x4] sm:$0xf]  ;;  %v3806_v59 = vld [vmem:[#allocation7] sm:$0xf]  ;;  %v4187_v60 = vld [vmem:[#allocation7 + $0x4] sm:$0xf0] }
 0x251   : > { %v1798_v20 = vpop.f32.mrf.mxu1  ;;  %v3875_v58 = vor.u32 %v4202_v52, %v3872_v54  ;;  %v3807_v62 = vor.u32 %v4187_v60, %v3806_v59 }
 0x252   : > { %v1827_v4 = vmax.f32 %v1696_v63, 0.0  ;;  %v1797_v19 = vadd.f32 %v1796_v61, %v1748_v56  ;;  %v4186_v61 = vld [vmem:[#allocation7 + $0x4] sm:$0xf]  ;;  %v3808_v63 = vld [vmem:[#allocation7 + $0x8] sm:$0xf0] }
 0x253   : > { %2383 = vmatpush.bf16.msra.mxu3 %v3875_v58  ;;  %v3811_v0 = vor.u32 %v4186_v61, %v3808_v63 }
 0x254   : > { %v1845_v10 = vpack.c.bf16 %v1827_v4, %v1825_v3  ;;  %v1830_v30 = vmax.f32 %v1797_v19, 0.0  ;;  %v5310_v4 = vld [vmem:[#allocation6] ss:$0 sm:$0xff]  ;;  %v5321_v19 = vld [vmem:[%s4912_s28 + $0x10] sm:$0xff] }
 0x255   : > { %v1649_v13 = vpop.f32.mrf.mxu2 }
 0x256   : > { %2019 = vmatmul.bf16.gmra.mxu2 %v1845_v10  ;;  %v1650_v25 = vadd.f32 %v1649_v13, %v5272_v27 }
 0x257   : > { %v1749_v17 = vpop.f32.mrf.mxu0  ;;  %v1700_v42 = vpop.f32.mrf.mxu3 }
 0x258   : > { %v1750_v18 = vadd.f32 %v1749_v17, %v5269_v23  ;;  %v3822_v23 = vld [vmem:[#allocation7 + $0x20] sm:$0xf]  ;;  %v1699_v35 = vadd.f32 %v1698_v15, %v1650_v25 }
 0x259   : > { %v3823_v38 = vor.u32 %v4191_v33, %v3822_v23 }
 0x25a   : > { %v1799_v26 = vadd.f32 %v1798_v20, %v1750_v18  ;;  %v1829_v49 = vmax.f32 %v1699_v35, 0.0 }
 0x25b   : > { %2210 = vmatpush.bf16.msrb.mxu0 %v3823_v38  ;;  %4263 = vmatpush.bf16.msra.mxu2 %v3823_v38 }
 0x25c   : > { %v1832_v31 = vmax.f32 %v1799_v26, 0.0 }
 0x25d   : > { %v1651_v32 = vpop.f32.mrf.mxu2 }
 0x25e   : > { %v1652_v36 = vadd.f32 %v1651_v32, %v5272_v27  ;;  %v1848_v37 = vpack.c.bf16 %v1832_v31, %v1830_v30  ;;  %v3816_v27 = vld [vmem:[#allocation7 + $0x18] sm:$0xf0] }
 0x25f   : > { %v3819_v53 = vor.u32 %v4188_v48, %v3816_v27  ;;  %2211 = vmatpush.bf16.msrb.mxu0 %v3815_v51  ;;  %4264 = vmatpush.bf16.msra.mxu2 %v3815_v51  ;;  %v5328_v31 = vld [vmem:[%s4912_s28 + $0x18] sm:$0xff] }
 0x260   : > { %v1701_v45 = vadd.f32 %v1700_v42, %v1652_v36  ;;  %2073 = vmatmul.bf16.gmra.mxu3 %v1848_v37  ;;  %v5335_v42 = vld [vmem:[%s4912_s28 + $0x20] sm:$0xff] }
 0x261   : > { %2260 = vmatpush.bf16.msrb.mxu1 %v3819_v53  ;;  %v5342_v53 = vld [vmem:[%s4912_s28 + $0x28] sm:$0xff] }
 0x262   : > { %v1831_v50 = vmax.f32 %v1701_v45, 0.0 }
 0x263   : > { %2212 = vmatpush.bf16.msrb.mxu0 %v3807_v62  ;;  %4265 = vmatpush.bf16.msra.mxu2 %v3807_v62 }
 0x264   : > { %v1847_v57 = vpack.c.bf16 %v1831_v50, %v1829_v49 }
 0x265   : > { %2261 = vmatpush.bf16.msrb.mxu1 %v3811_v0 }
 0x266   : > { %2024 = vmatmul.bf16.gmra.mxu2 %v1847_v57 }
 0x270   : > { %3892 = vmatmul.msk.bf16.vlgmr.msra.gmra.mxu3 %vm794_vm0, %v5306_v1 }
 0x273   : > { %v2039_v2 = vpop.f32.mrf.mxu3 }
 0x279   : > { %v1990_v3 = vpop.f32.mrf.mxu2 }
 0x27a   : > { %v1991_v6 = vadd.f32 %v5310_v4, %v1990_v3 }
 0x27b   : > { %v2041_v5 = vpop.f32.mrf.mxu3 }
 0x27c   : > { %v2040_v8 = vadd.f32 %v2039_v2, %v1991_v6 }
 0x27e   : > { %v2079_v11 = vmax.f32 %v2040_v8, 0.0 }
 0x280   : > { %3893 = vmatmul.msk.bf16.gmra.mxu3 %vm794_vm0, %v5314_v7 }
 0x281   : > { %v1992_v55 = vpop.f32.mrf.mxu2 }
 0x282   : > { %v1993_v9 = vadd.f32 %v5310_v4, %v1992_v55 }
 0x283   : > { %v2044_v56 = vpop.f32.mrf.mxu3 }
 0x284   : > { %v2042_v10 = vadd.f32 %v2041_v5, %v1993_v9  ;;  %v5349_v5 = vld [vmem:[%s4912_s28 + $0x30] sm:$0xff] }
 0x286   : > { %v2080_v12 = vmax.f32 %v2042_v10, 0.0 }
 0x288   : > { %v2095_v15 = vpack.c.bf16 %v2080_v12, %v2079_v11  ;;  %v4022_v12 = vld [vmem:[#allocation10 + $0xf0] sm:$0xf] }
 0x289   : > { %v1995_v13 = vpop.f32.mrf.mxu2 }
 0x28a   : > { %2213 = vmatmul.bf16.vlgmr.msrb.gmra.mxu0 %v2095_v15  ;;  %2262 = vmatmul.bf16.vlgmr.msrb.gmra.mxu1 %v2095_v15  ;;  %v1996_v17 = vadd.f32 %v5310_v4, %v1995_v13  ;;  %v4237_v15 = vld [vmem:[#allocation10 + $0xf4] sm:$0xf0]  ;;  %v4236_v13 = vld [vmem:[#allocation10 + $0xf4] sm:$0xf] }
 0x28b   : > { %v2046_v16 = vpop.f32.mrf.mxu3 }
 0x28c   : > { %v2045_v20 = vadd.f32 %v2044_v56, %v1996_v17  ;;  %v4023_v17 = vor.u32 %v4237_v15, %v4022_v12 }
 0x28e   : > { %v2081_v25 = vmax.f32 %v2045_v20, 0.0  ;;  %2752 = vmatpush.bf16.msra.mxu1 %v4023_v17  ;;  %v4224_v17 = vld [vmem:[#allocation10 + $0x94] sm:$0xf] }
 0x290   : > { %3894 = vmatmul.msk.bf16.gmra.mxu3 %vm794_vm0, %v5321_v19 }
 0x291   : > { %v1997_v18 = vpop.f32.mrf.mxu2 }
 0x292   : > { %v1998_v21 = vadd.f32 %v5310_v4, %v1997_v18  ;;  %v4024_v18 = vld [vmem:[#allocation10 + $0xf8] sm:$0xf0] }
 0x293   : > { %v2049_v22 = vpop.f32.mrf.mxu3 }
 0x294   : > { %v2047_v24 = vadd.f32 %v2046_v16, %v1998_v21  ;;  %v4027_v21 = vor.u32 %v4236_v13, %v4024_v18  ;;  %v3974_v13 = vld [vmem:[#allocation10 + $0x90] sm:$0xf] }
 0x296   : > { %v2082_v26 = vmax.f32 %v2047_v24, 0.0  ;;  %v4205_v24 = vld [vmem:[#allocation9 + $0x14] sm:$0xf0]  ;;  %2850 = vmatpush.bf16.msrb.mxu3 %v4027_v21 }
 0x298   : > { %v2096_v28 = vpack.c.bf16 %v2082_v26, %v2081_v25  ;;  %v4014_v25 = vld [vmem:[#allocation10 + $0xe0] sm:$0xf] }
 0x299   : > { %v2000_v29 = vpop.f32.mrf.mxu2 }
 0x29a   : > { %2218 = vmatmul.bf16.gmra.mxu0 %v2096_v28  ;;  %2267 = vmatmul.bf16.gmra.mxu1 %v2096_v28  ;;  %v2001_v30 = vadd.f32 %v5310_v4, %v2000_v29  ;;  %v4235_v29 = vld [vmem:[#allocation10 + $0xe4] sm:$0xf0] }
 0x29b   : > { %v2051_v14 = vpop.f32.mrf.mxu3 }
 0x29c   : > { %v2050_v23 = vadd.f32 %v2049_v22, %v2001_v30  ;;  %v3878_v22 = vld [vmem:[#allocation9 + $0x10] sm:$0xf]  ;;  %v4016_v30 = vld [vmem:[#allocation10 + $0xe8] sm:$0xf0] }
 0x29d   : > { %v3879_v28 = vor.u32 %v4205_v24, %v3878_v22 }
 0x29e   : > { %v2083_v36 = vmax.f32 %v2050_v23, 0.0 }
 0x29f   : > { %2333 = vmatpush.bf16.msrb.mxu2 %v3879_v28  ;;  %v3966_v28 = vld [vmem:[#allocation10 + $0x80] sm:$0xf] }
 0x2a0   : > { %3895 = vmatmul.msk.bf16.gmra.mxu3 %vm794_vm0, %v5328_v31 }
 0x2a1   : > { %v2002_v32 = vpop.f32.mrf.mxu2 }
 0x2a2   : > { %v2003_v33 = vadd.f32 %v5310_v4, %v2002_v32  ;;  %v4015_v32 = vor.u32 %v4235_v29, %v4014_v25  ;;  %v4223_v29 = vld [vmem:[#allocation10 + $0x84] sm:$0xf0] }
 0x2a3   : > { %v2054_v34 = vpop.f32.mrf.mxu3 }
 0x2a4   : > { %v2052_v35 = vadd.f32 %v2051_v14, %v2003_v33  ;;  %v4234_v14 = vld [vmem:[#allocation10 + $0xe4] sm:$0xf]  ;;  %v4006_v33 = vld [vmem:[#allocation10 + $0xd0] sm:$0xf]  ;;  %2753 = vmatpush.bf16.msra.mxu1 %v4015_v32  ;;  %v3967_v32 = vor.u32 %v4223_v29, %v3966_v28 }
 0x2a5   : > { %v4019_v23 = vor.u32 %v4234_v14, %v4016_v30  ;;  %v4222_v14 = vld [vmem:[#allocation10 + $0x84] sm:$0xf] }
 0x2a6   : > { %v2084_v37 = vmax.f32 %v2052_v35, 0.0  ;;  %v4232_v35 = vld [vmem:[#allocation10 + $0xd4] sm:$0xf] }
 0x2a7   : > { %2851 = vmatpush.bf16.msrb.mxu3 %v4019_v23  ;;  %v3968_v23 = vld [vmem:[#allocation10 + $0x88] sm:$0xf0] }
 0x2a8   : > { %v2097_v38 = vpack.c.bf16 %v2084_v37, %v2083_v36  ;;  %v4008_v36 = vld [vmem:[#allocation10 + $0xd8] sm:$0xf0]  ;;  %v3870_v37 = vld [vmem:[#allocation9] sm:$0xf] }
 0x2a9   : > { %v2005_v39 = vpop.f32.mrf.mxu2 }
 0x2aa   : > { %2223 = vmatmul.bf16.gmra.mxu0 %v2097_v38  ;;  %2272 = vmatmul.bf16.gmra.mxu1 %v2097_v38  ;;  %v2006_v41 = vadd.f32 %v5310_v4, %v2005_v39  ;;  %v4203_v38 = vld [vmem:[#allocation9 + $0x4] sm:$0xf0] }
 0x2ab   : > { %v2056_v40 = vpop.f32.mrf.mxu3 }
 0x2ac   : > { %v2055_v44 = vadd.f32 %v2054_v34, %v2006_v41  ;;  %v4233_v34 = vld [vmem:[#allocation10 + $0xd4] sm:$0xf0] }
 0x2ad   : > { %v4007_v41 = vor.u32 %v4233_v34, %v4006_v33  ;;  %v3971_v33 = vor.u32 %v4222_v14, %v3968_v23 }
 0x2ae   : > { %v2085_v48 = vmax.f32 %v2055_v44, 0.0  ;;  %v3998_v44 = vld [vmem:[#allocation10 + $0xc0] sm:$0xf] }
 0x2af   : > { %2754 = vmatpush.bf16.msra.mxu1 %v4007_v41  ;;  %v5368_v41 = vld [vmem:[%s696_s9] sm:$0x3] }
 0x2b0   : > { %3896 = vmatmul.msk.bf16.gmra.mxu3 %vm794_vm0, %v5335_v42 }
 0x2b1   : > { %v2007_v43 = vpop.f32.mrf.mxu2 }
 0x2b2   : > { %v2008_v45 = vadd.f32 %v5310_v4, %v2007_v43  ;;  %v4011_v43 = vor.u32 %v4232_v35, %v4008_v36 }
 0x2b3   : > { %v2059_v46 = vpop.f32.mrf.mxu3 }
 0x2b4   : > { %v2057_v47 = vadd.f32 %v2056_v40, %v2008_v45  ;;  %v3871_v40 = vor.u32 %v4203_v38, %v3870_v37  ;;  %v5356_v45 = vld [vmem:[%s4912_s28 + $0x38] sm:$0xff]  ;;  %2852 = vmatpush.bf16.msrb.mxu3 %v4011_v43 }
 0x2b5   : > { %v3960_v38 = vld [vmem:[#allocation10 + $0x78] sm:$0xf0] }
 0x2b6   : > { %v2086_v49 = vmax.f32 %v2057_v47, 0.0  ;;  %v4230_v47 = vld [vmem:[#allocation10 + $0xc4] sm:$0xf]  ;;  %2334 = vmatpush.bf16.msrb.mxu2 %v3871_v40 }
 0x2b8   : > { %v2098_v50 = vpack.c.bf16 %v2086_v49, %v2085_v48  ;;  %v4000_v48 = vld [vmem:[#allocation10 + $0xc8] sm:$0xf0] }
 0x2b9   : > { %v2010_v51 = vpop.f32.mrf.mxu2 }
 0x2ba   : > { %2228 = vmatmul.bf16.gmra.mxu0 %v2098_v50  ;;  %2277 = vmatmul.bf16.gmra.mxu1 %v2098_v50  ;;  %v2011_v52 = vadd.f32 %v5310_v4, %v2010_v51 }
 0x2bb   : > { %v2061_v27 = vpop.f32.mrf.mxu3 }
 0x2bc   : > { %v2060_v57 = vadd.f32 %v2059_v46, %v2011_v52  ;;  %v4231_v46 = vld [vmem:[#allocation10 + $0xc4] sm:$0xf0] }
 0x2bd   : > { %v3999_v52 = vor.u32 %v4231_v46, %v3998_v44  ;;  %v5371_v44 = vperm.slane %v5368_v41, 1 }
 0x2be   : > { %v2087_v61 = vmax.f32 %v2060_v57, 0.0 }
 0x2bf   : > { %2755 = vmatpush.bf16.msra.mxu1 %v3999_v52 }
 0x2c0   : > { %3897 = vmatmul.msk.bf16.gmra.mxu3 %vm794_vm0, %v5342_v53 }
 0x2c1   : > { %v2012_v54 = vpop.f32.mrf.mxu2 }
 0x2c2   : > { %v2013_v58 = vadd.f32 %v5310_v4, %v2012_v54  ;;  %v4003_v54 = vor.u32 %v4230_v47, %v4000_v48  ;;  %v4218_v48 = vld [vmem:[#allocation10 + $0x64] sm:$0xf] }
 0x2c3   : > { %v2064_v59 = vpop.f32.mrf.mxu3 }
 0x2c4   : > { %v2062_v60 = vadd.f32 %v2061_v27, %v2013_v58  ;;  %2853 = vmatpush.bf16.msrb.mxu3 %v4003_v54  ;;  %v3958_v54 = vld [vmem:[#allocation10 + $0x70] sm:$0xf] }
 0x2c6   : > { %v2088_v62 = vmax.f32 %v2062_v60, 0.0  ;;  %v3990_v60 = vld [vmem:[#allocation10 + $0xb0] sm:$0xf] }
 0x2c8   : > { %v2099_v63 = vpack.c.bf16 %v2088_v62, %v2087_v61  ;;  %v4229_v61 = vld [vmem:[#allocation10 + $0xb4] sm:$0xf0]  ;;  %v4228_v62 = vld [vmem:[#allocation10 + $0xb4] sm:$0xf] }
 0x2c9   : > { %v2015_v0 = vpop.f32.mrf.mxu2 }
 0x2ca   : > { %2233 = vmatmul.bf16.gmra.mxu0 %v2099_v63  ;;  %2282 = vmatmul.bf16.gmra.mxu1 %v2099_v63  ;;  %v2016_v3 = vadd.f32 %v5310_v4, %v2015_v0  ;;  %v3991_v0 = vor.u32 %v4229_v61, %v3990_v60 }
 0x2cb   : > { %v2066_v2 = vpop.f32.mrf.mxu3 }
 0x2cc   : > { %v2065_v55 = vadd.f32 %v2064_v59, %v2016_v3  ;;  %2756 = vmatpush.bf16.msra.mxu1 %v3991_v0 }
 0x2ce   : > { %v2089_v10 = vmax.f32 %v2065_v55, 0.0 }
 0x2d0   : > { %3898 = vmatmul.msk.bf16.gmra.mxu3 %vm794_vm0, %v5349_v5 }
 0x2d1   : > { %v2017_v6 = vpop.f32.mrf.mxu2 }
 0x2d2   : > { %v2018_v8 = vadd.f32 %v5310_v4, %v2017_v6 }
 0x2d3   : > { %v2069_v9 = vpop.f32.mrf.mxu3 }
 0x2d4   : > { %v2067_v56 = vadd.f32 %v2066_v2, %v2018_v8  ;;  %v3992_v2 = vld [vmem:[#allocation10 + $0xb8] sm:$0xf0]  ;;  %v3982_v8 = vld [vmem:[#allocation10 + $0xa0] sm:$0xf] }
 0x2d5   : > { %v3995_v6 = vor.u32 %v4228_v62, %v3992_v2 }
 0x2d6   : > { %v2090_v11 = vmax.f32 %v2067_v56, 0.0  ;;  %v4226_v56 = vld [vmem:[#allocation10 + $0xa4] sm:$0xf] }
 0x2d7   : > { %2854 = vmatpush.bf16.msrb.mxu3 %v3995_v6  ;;  %v3944_v6 = vld [vmem:[#allocation10 + $0x58] sm:$0xf0] }
 0x2d8   : > { %v2100_v16 = vpack.c.bf16 %v2090_v11, %v2089_v10  ;;  %v3984_v11 = vld [vmem:[#allocation10 + $0xa8] sm:$0xf0] }
 0x2d9   : > { %v2020_v20 = vpop.f32.mrf.mxu2  ;;  %v3987_v12 = vor.u32 %v4226_v56, %v3984_v11 }
 0x2da   : > { %2238 = vmatmul.bf16.gmra.mxu0 %v2100_v16  ;;  %2287 = vmatmul.bf16.gmra.mxu1 %v2100_v16  ;;  %v2021_v39 = vadd.f32 %v5310_v4, %v2020_v20  ;;  %v4225_v16 = vld [vmem:[#allocation10 + $0x94] sm:$0xf0]  ;;  %v3976_v20 = vld [vmem:[#allocation10 + $0x98] sm:$0xf0] }
 0x2db   : > { %v2071_v26 = vpop.f32.mrf.mxu3  ;;  %2855 = vmatpush.bf16.msrb.mxu3 %v3987_v12  ;;  %v3975_v18 = vor.u32 %v4225_v16, %v3974_v13  ;;  %v3979_v22 = vor.u32 %v4224_v17, %v3976_v20 }
 0x2dc   : > { %v2070_v50 = vadd.f32 %v2069_v9, %v2021_v39  ;;  %v4227_v9 = vld [vmem:[#allocation10 + $0xa4] sm:$0xf0] }
 0x2dd   : > { %v3983_v10 = vor.u32 %v4227_v9, %v3982_v8  ;;  %v3950_v8 = vld [vmem:[#allocation10 + $0x60] sm:$0xf]  ;;  %v4219_v9 = vld [vmem:[#allocation10 + $0x64] sm:$0xf0] }
 0x2de   : > { %v2091_v58 = vmax.f32 %v2070_v50, 0.0  ;;  %v3951_v56 = vor.u32 %v4219_v9, %v3950_v8 }
 0x2df   : > { %2757 = vmatpush.bf16.msra.mxu1 %v3983_v10  ;;  %2856 = vmatpush.bf16.msrb.mxu3 %v3979_v22  ;;  %v4217_v22 = vld [vmem:[#allocation10 + $0x54] sm:$0xf0] }
 0x2e0   : > { %3899 = vmatmul.msk.bf16.gmra.mxu3 %vm794_vm0, %v5356_v45 }
 0x2e1   : > { %v2022_v49 = vpop.f32.mrf.mxu2 }
 0x2e2   : > { %v2023_v51 = vadd.f32 %v5310_v4, %v2022_v49  ;;  %v3952_v49 = vld [vmem:[#allocation10 + $0x68] sm:$0xf0] }
 0x2e3   : > { %v2074_v27 = vpop.f32.mrf.mxu3  ;;  %2758 = vmatpush.bf16.msra.mxu1 %v3975_v18  ;;  %2857 = vmatpush.bf16.msrb.mxu3 %v3971_v33  ;;  %v3955_v50 = vor.u32 %v4218_v48, %v3952_v49 }
 0x2e4   : > { %v2072_v57 = vadd.f32 %v2071_v26, %v2023_v51 }
 0x2e6   : > { %v2092_v59 = vmax.f32 %v2072_v57, 0.0  ;;  %v4221_v57 = vld [vmem:[#allocation10 + $0x74] sm:$0xf0] }
 0x2e7   : > { %2759 = vmatpush.bf16.msra.mxu1 %v3967_v32 }
 0x2e8   : > { %v2101_v63 = vpack.c.bf16 %v2092_v59, %v2091_v58  ;;  %v3959_v58 = vor.u32 %v4221_v57, %v3958_v54  ;;  %v3926_v57 = vld [vmem:[#allocation10 + $0x30] sm:$0xf] }
 0x2e9   : > { %v2025_v3 = vpop.f32.mrf.mxu2 }
 0x2ea   : > { %2243 = vmatmul.bf16.gmra.mxu0 %v2101_v63  ;;  %2292 = vmatmul.bf16.gmra.mxu1 %v2101_v63  ;;  %v2026_v15 = vadd.f32 %v5310_v4, %v2025_v3  ;;  %v4216_v3 = vld [vmem:[#allocation10 + $0x54] sm:$0xf] }
 0x2eb   : > { %v2076_v55 = vpop.f32.mrf.mxu3  ;;  %2703 = vmatpush.bf16.msra.mxu0 %v3959_v58  ;;  %v4213_v58 = vld [vmem:[#allocation10 + $0x34] sm:$0xf0] }
 0x2ec   : > { %v2075_v24 = vadd.f32 %v2074_v27, %v2026_v15 }
 0x2ee   : > { %v2093_v34 = vmax.f32 %v2075_v24, 0.0 }
 0x2ef   : > { %2704 = vmatpush.bf16.msra.mxu0 %v3951_v56  ;;  %v3918_v56 = vld [vmem:[#allocation10 + $0x20] sm:$0xf] }
 0x2f1   : > { %v2027_v21 = vpop.f32.mrf.mxu2 }
 0x2f2   : > { %v2028_v25 = vadd.f32 %v5310_v4, %v2027_v21  ;;  %v4220_v4 = vld [vmem:[#allocation10 + $0x74] sm:$0xf]  ;;  %v3942_v21 = vld [vmem:[#allocation10 + $0x50] sm:$0xf] }
 0x2f3   : > { %v2385_v26 = vpop.f32.mrf.mxu3  ;;  %v3963_v39 = vor.u32 %v4220_v4, %v3960_v38  ;;  %v3943_v24 = vor.u32 %v4217_v22, %v3942_v21  ;;  %v3934_v4 = vld [vmem:[#allocation10 + $0x40] sm:$0xf]  ;;  %v4215_v38 = vld [vmem:[#allocation10 + $0x44] sm:$0xf0] }
 0x2f4   : > { %v2077_v30 = vadd.f32 %v2076_v55, %v2028_v25  ;;  %v3947_v55 = vor.u32 %v4216_v3, %v3944_v6  ;;  %v4214_v25 = vld [vmem:[#allocation10 + $0x44] sm:$0xf] }
 0x2f5   : > { %2705 = vmatpush.bf16.msra.mxu0 %v3943_v24 }
 0x2f6   : > { %v2094_v35 = vmax.f32 %v2077_v30, 0.0 }
 0x2f8   : > { %v2102_v36 = vpack.c.bf16 %v2094_v35, %v2093_v34 }
 0x2fa   : > { %2248 = vmatmul.bf16.vlgmr.msra.gmra.mxu2 %v2102_v36  ;;  %2297 = vmatmul.bf16.gmra.mxu1 %v2102_v36 }
 0x2fb   : > { %v2387_v37 = vpop.f32.mrf.mxu3  ;;  %2801 = vmatpush.bf16.msra.mxu2 %v3963_v39  ;;  %v3935_v39 = vor.u32 %v4215_v38, %v3934_v4  ;;  %v3902_v4 = vld [vmem:[#allocation10] sm:$0xf]  ;;  %v4207_v38 = vld [vmem:[#allocation10 + $0x4] sm:$0xf0] }
 0x2fd   : > { %2706 = vmatpush.bf16.msra.mxu0 %v3935_v39  ;;  %v3903_v39 = vor.u32 %v4207_v38, %v3902_v4  ;;  %v4250_v4 = vld [vmem:[%s5627_s27 + $0x60] sm:$0xff] }
 0x2ff   : > { %2802 = vmatpush.bf16.msra.mxu2 %v3955_v50 }
 0x303   : > { %v2390_v40 = vpop.f32.mrf.mxu3  ;;  %2803 = vmatpush.bf16.msra.mxu2 %v3947_v55 }
 0x307   : > { %v2263_v43 = vpop.f32.mrf.mxu1 }
 0x308   : > { %v2264_v47 = vadd.f32 %v2263_v43, %v5371_v44  ;;  %v3928_v43 = vld [vmem:[#allocation10 + $0x38] sm:$0xf0] }
 0x30a   : > { %3884 = vmatmul.msk.bf16.vlgmr.msrb.gmra.mxu2 %vm794_vm0, %v5306_v1  ;;  %v2426_v27 = vadd.f32 %v2385_v26, %v2264_v47  ;;  %v3936_v26 = vld [vmem:[#allocation10 + $0x48] sm:$0xf0] }
 0x30b   : > { %v2392_v46 = vpop.f32.mrf.mxu3  ;;  %v3939_v28 = vor.u32 %v4214_v25, %v3936_v26 }
 0x30c   : > { %v2458_v61 = vmax.f32 %v2426_v27, 0.0 }
 0x30d   : > { %2804 = vmatpush.bf16.msra.mxu2 %v3939_v28  ;;  %v3910_v28 = vld [vmem:[#allocation10 + $0x10] sm:$0xf] }
 0x30f   : > { %v2265_v51 = vpop.f32.mrf.mxu1 }
 0x310   : > { %v2266_v52 = vadd.f32 %v2265_v51, %v5371_v44 }
 0x312   : > { %v2428_v59 = vadd.f32 %v2387_v37, %v2266_v52 }
 0x313   : > { %v2395_v60 = vpop.f32.mrf.mxu3 }
 0x314   : > { %v2460_v62 = vmax.f32 %v2428_v59, 0.0  ;;  %v3927_v59 = vor.u32 %v4213_v58, %v3926_v57 }
 0x316   : > { %v2490_v1 = vpack.c.bf16 %v2460_v62, %v2458_v61  ;;  %2707 = vmatpush.bf16.msra.mxu0 %v3927_v59  ;;  %v4210_v61 = vld [vmem:[#allocation10 + $0x24] sm:$0xf]  ;;  %v3920_v62 = vld [vmem:[#allocation10 + $0x28] sm:$0xf0] }
 0x317   : > { %v2268_v63 = vpop.f32.mrf.mxu1 }
 0x318   : > { %2760 = vmatmul.bf16.vlgmr.msra.gmra.mxu1 %v2490_v1  ;;  %2858 = vmatmul.bf16.vlgmr.msrb.gmra.mxu3 %v2490_v1  ;;  %v2269_v2 = vadd.f32 %v2268_v63, %v5371_v44  ;;  %v3923_v63 = vor.u32 %v4210_v61, %v3920_v62 }
 0x31a   : > { %3885 = vmatmul.msk.bf16.gmra.mxu2 %vm794_vm0, %v5314_v7  ;;  %v2430_v11 = vadd.f32 %v2390_v40, %v2269_v2  ;;  %v4212_v40 = vld [vmem:[#allocation10 + $0x34] sm:$0xf] }
 0x31b   : > { %v2397_v0 = vpop.f32.mrf.mxu3 }
 0x31c   : > { %v2462_v13 = vmax.f32 %v2430_v11, 0.0 }
 0x31f   : > { %v2270_v10 = vpop.f32.mrf.mxu1 }
 0x320   : > { %v2271_v12 = vadd.f32 %v2270_v10, %v5371_v44  ;;  %v4211_v10 = vld [vmem:[#allocation10 + $0x24] sm:$0xf0] }
 0x322   : > { %v2432_v15 = vadd.f32 %v2392_v46, %v2271_v12  ;;  %v3931_v46 = vor.u32 %v4212_v40, %v3928_v43  ;;  %v3919_v12 = vor.u32 %v4211_v10, %v3918_v56 }
 0x323   : > { %v2400_v17 = vpop.f32.mrf.mxu3 }
 0x324   : > { %v2464_v16 = vmax.f32 %v2432_v15, 0.0  ;;  %2805 = vmatpush.bf16.msra.mxu2 %v3931_v46  ;;  %2708 = vmatpush.bf16.msra.mxu0 %v3919_v12  ;;  %v4252_v12 = vld [vmem:[%s5627_s27 + $0x70] sm:$0xff] }
 0x326   : > { %v2492_v7 = vpack.c.bf16 %v2464_v16, %v2462_v13  ;;  %v4208_v13 = vld [vmem:[#allocation10 + $0x14] sm:$0xf]  ;;  %v3912_v16 = vld [vmem:[#allocation10 + $0x18] sm:$0xf0] }
 0x327   : > { %v2273_v18 = vpop.f32.mrf.mxu1 }
 0x328   : > { %2765 = vmatmul.bf16.gmra.mxu1 %v2492_v7  ;;  %2863 = vmatmul.bf16.gmra.mxu3 %v2492_v7  ;;  %v2274_v20 = vadd.f32 %v2273_v18, %v5371_v44 }
 0x329   : > { %2806 = vmatpush.bf16.msra.mxu2 %v3923_v63  ;;  %v5410_v63 = vperm.slane %v5368_v41, 0 }
 0x32a   : > { %3886 = vmatmul.msk.bf16.gmra.mxu2 %vm794_vm0, %v5321_v19  ;;  %v2434_v30 = vadd.f32 %v2395_v60, %v2274_v20 }
 0x32b   : > { %v2402_v14 = vpop.f32.mrf.mxu3 }
 0x32c   : > { %v2466_v33 = vmax.f32 %v2434_v30, 0.0 }
 0x32f   : > { %v2275_v29 = vpop.f32.mrf.mxu1 }
 0x330   : > { %v2276_v32 = vadd.f32 %v2275_v29, %v5371_v44  ;;  %v4209_v29 = vld [vmem:[#allocation10 + $0x14] sm:$0xf0] }
 0x331   : > { %v3911_v30 = vor.u32 %v4209_v29, %v3910_v28  ;;  %v4251_v28 = vld [vmem:[%s5627_s27 + $0x68] sm:$0xff] }
 0x332   : > { %v2436_v23 = vadd.f32 %v2397_v0, %v2276_v32  ;;  %v3904_v32 = vld [vmem:[#allocation10 + $0x8] sm:$0xf0] }
 0x333   : > { %v2405_v36 = vpop.f32.mrf.mxu3  ;;  %2709 = vmatpush.bf16.msra.mxu0 %v3911_v30 }
 0x334   : > { %v2468_v34 = vmax.f32 %v2436_v23, 0.0 }
 0x336   : > { %v2494_v35 = vpack.c.bf16 %v2468_v34, %v2466_v33 }
 0x337   : > { %v2278_v19 = vpop.f32.mrf.mxu1  ;;  %2710 = vmatpush.bf16.msra.mxu0 %v3903_v39 }
 0x338   : > { %2770 = vmatmul.bf16.gmra.mxu1 %v2494_v35  ;;  %2868 = vmatmul.bf16.gmra.mxu3 %v2494_v35  ;;  %v2279_v37 = vadd.f32 %v2278_v19, %v5371_v44  ;;  %v2214_v35 = vpop.f32.mrf.mxu0 }
 0x33a   : > { %3887 = vmatmul.msk.bf16.gmra.mxu2 %vm794_vm0, %v5328_v31  ;;  %v2438_v48 = vadd.f32 %v2400_v17, %v2279_v37  ;;  %v3915_v17 = vor.u32 %v4208_v13, %v3912_v16 }
 0x33b   : > { %v2407_v51 = vpop.f32.mrf.mxu3 }
 0x33c   : > { %v2470_v27 = vmax.f32 %v2438_v48, 0.0  ;;  %2807 = vmatpush.bf16.msra.mxu2 %v3915_v17 }
 0x33f   : > { %v2280_v47 = vpop.f32.mrf.mxu1 }
 0x340   : > { %v2281_v49 = vadd.f32 %v2280_v47, %v5371_v44 }
 0x342   : > { %v2440_v50 = vadd.f32 %v2402_v14, %v2281_v49 }
 0x343   : > { %v2410_v1 = vpop.f32.mrf.mxu3 }
 0x344   : > { %v2472_v52 = vmax.f32 %v2440_v50, 0.0 }
 0x346   : > { %v2496_v54 = vpack.c.bf16 %v2472_v52, %v2470_v27 }
 0x347   : > { %v2283_v31 = vpop.f32.mrf.mxu1 }
 0x348   : > { %2775 = vmatmul.bf16.gmra.mxu1 %v2496_v54  ;;  %2873 = vmatmul.bf16.gmra.mxu3 %v2496_v54  ;;  %v2284_v60 = vadd.f32 %v2283_v31, %v5371_v44 }
 0x34a   : > { %3888 = vmatmul.msk.bf16.gmra.mxu2 %vm794_vm0, %v5335_v42  ;;  %v2442_v2 = vadd.f32 %v2405_v36, %v2284_v60 }
 0x34b   : > { %v2412_v42 = vpop.f32.mrf.mxu3 }
 0x34c   : > { %v2474_v55 = vmax.f32 %v2442_v2, 0.0  ;;  %v2215_v2 = vadd.f32 %v2214_v35, %v5410_v63 }
 0x34f   : > { %v2285_v0 = vpop.f32.mrf.mxu1 }
 0x350   : > { %v2286_v3 = vadd.f32 %v2285_v0, %v5371_v44  ;;  %v4245_v0 = vld [vmem:[%s5626_s25 + $0x38] sm:$0xff]  ;;  %s3419_s25 = sshll.u32 %s4906_s14, 3 }
 0x351   : > { %3079 = vmatpush.bf16.msrb.mxu0 %v4245_v0  ;;  %s5524_s16 = scalar_lea.vmem %s5629_s12, %s3419_s25 }
 0x352   : > { %v2444_v6 = vadd.f32 %v2407_v51, %v2286_v3 }
 0x353   : > { %v2415_v21 = vpop.f32.mrf.mxu3 }
 0x354   : > { %v2476_v8 = vmax.f32 %v2444_v6, 0.0 }
 0x356   : > { %v2498_v9 = vpack.c.bf16 %v2476_v8, %v2474_v55 }
 0x357   : > { %v2288_v11 = vpop.f32.mrf.mxu1 }
 0x358   : > { %2780 = vmatmul.bf16.gmra.mxu1 %v2498_v9  ;;  %2878 = vmatmul.bf16.gmra.mxu3 %v2498_v9  ;;  %v2289_v15 = vadd.f32 %v2288_v11, %v5371_v44 }
 0x35a   : > { %3889 = vmatmul.msk.bf16.gmra.mxu2 %vm794_vm0, %v5342_v53  ;;  %v2446_v18 = vadd.f32 %v2410_v1, %v2289_v15  ;;  %v4206_v53 = vld [vmem:[#allocation10 + $0x4] sm:$0xf] }
 0x35b   : > { %v3907_v23 = vor.u32 %v4206_v53, %v3904_v32  ;;  %v2417_v33 = vpop.f32.mrf.mxu3 }
 0x35c   : > { %v2478_v24 = vmax.f32 %v2446_v18, 0.0 }
 0x35d   : > { %2808 = vmatpush.bf16.msra.mxu2 %v3907_v23 }
 0x35f   : > { %v2290_v7 = vpop.f32.mrf.mxu1 }
 0x360   : > { %v2291_v20 = vadd.f32 %v2290_v7, %v5371_v44 }
 0x362   : > { %v2448_v22 = vadd.f32 %v2412_v42, %v2291_v20  ;;  %v4244_v42 = vld [vmem:[%s5627_s27 + $0x30] sm:$0xff] }
 0x363   : > { %v2420_v47 = vpop.f32.mrf.mxu3  ;;  %3080 = vmatpush.bf16.msrb.mxu0 %v4244_v42 }
 0x364   : > { %v2480_v25 = vmax.f32 %v2448_v22, 0.0 }
 0x366   : > { %v2500_v26 = vpack.c.bf16 %v2480_v25, %v2478_v24 }
 0x367   : > { %v2293_v14 = vpop.f32.mrf.mxu1 }
 0x368   : > { %2785 = vmatmul.bf16.gmra.mxu1 %v2500_v26  ;;  %2883 = vmatmul.bf16.gmra.mxu3 %v2500_v26  ;;  %v2294_v34 = vadd.f32 %v2293_v14, %v5371_v44  ;;  %v4243_v26 = vld [vmem:[%s5627_s27 + $0x28] sm:$0xff] }
 0x369   : > { %3081 = vmatpush.bf16.msrb.mxu0 %v4243_v26 }
 0x36a   : > { %3890 = vmatmul.msk.bf16.gmra.mxu2 %vm794_vm0, %v5349_v5  ;;  %v2450_v36 = vadd.f32 %v2415_v21, %v2294_v34  ;;  %v2216_v5 = vpop.f32.mrf.mxu0 }
 0x36b   : > { %v2422_v52 = vpop.f32.mrf.mxu3  ;;  %v2217_v3 = vadd.f32 %v2216_v5, %v5410_v63 }
 0x36c   : > { %v2482_v43 = vmax.f32 %v2450_v36, 0.0 }
 0x36f   : > { %v2295_v19 = vpop.f32.mrf.mxu1 }
 0x370   : > { %v2296_v37 = vadd.f32 %v2295_v19, %v5371_v44 }
 0x372   : > { %v2452_v40 = vadd.f32 %v2417_v33, %v2296_v37  ;;  %v2219_v58 = vpop.f32.mrf.mxu0  ;;  %v4242_v37 = vld [vmem:[%s5627_s27 + $0x20] sm:$0xff] }
 0x373   : > { %v2220_v13 = vadd.f32 %v2219_v58, %v5410_v63  ;;  %3082 = vmatpush.bf16.msrb.mxu0 %v4242_v37 }
 0x374   : > { %v2484_v46 = vmax.f32 %v2452_v40, 0.0 }
 0x376   : > { %v2502_v48 = vpack.c.bf16 %v2484_v46, %v2482_v43 }
 0x377   : > { %v2298_v49 = vpop.f32.mrf.mxu1 }
 0x378   : > { %2790 = vmatmul.bf16.gmra.mxu1 %v2502_v48  ;;  %2888 = vmatmul.bf16.gmra.mxu3 %v2502_v48  ;;  %v2299_v50 = vadd.f32 %v2298_v49, %v5371_v44 }
 0x37a   : > { %3891 = vmatmul.msk.bf16.gmra.mxu2 %vm794_vm0, %v5356_v45  ;;  %v2454_v54 = vadd.f32 %v2420_v47, %v2299_v50  ;;  %v2221_v1 = vpop.f32.mrf.mxu0 }
 0x37b   : > { %v2222_v16 = vadd.f32 %v2221_v1, %v5410_v63 }
 0x37c   : > { %v2486_v59 = vmax.f32 %v2454_v54, 0.0 }
 0x37d   : > { %v5404_v51 = vpop.f32.mrf.mxu2 }
 0x37f   : > { %v2300_v27 = vpop.f32.mrf.mxu1 }
 0x380   : > { %v2301_v31 = vadd.f32 %v2300_v27, %v5371_v44  ;;  %v4253_v44 = vld [vmem:[%s5627_s27 + $0x78] sm:$0xff] }
 0x381   : > { %3128 = vmatpush.bf16.msrb.mxu1 %v4253_v44  ;;  %v4241_v27 = vld [vmem:[%s5627_s27 + $0x18] sm:$0xff] }
 0x382   : > { %v2456_v57 = vadd.f32 %v2422_v52, %v2301_v31  ;;  %v2224_v9 = vpop.f32.mrf.mxu0  ;;  %v4249_v52 = vld [vmem:[%s5627_s27 + $0x58] sm:$0xff]  ;;  %3083 = vmatpush.bf16.msrb.mxu0 %v4241_v27 }
 0x383   : > { %v2225_v29 = vadd.f32 %v2224_v9, %v5410_v63 }
 0x384   : > { %v2488_v60 = vmax.f32 %v2456_v57, 0.0 }
 0x385   : > { %v5407_v61 = vpop.f32.mrf.mxu2  ;;  %3129 = vmatpush.bf16.msrb.mxu1 %v4252_v12 }
 0x386   : > { %v2504_v62 = vpack.c.bf16 %v2488_v60, %v2486_v59 }
 0x388   : > { %2795 = vmatmul.bf16.gmra.mxu1 %v2504_v62  ;;  %2893 = vmatmul.bf16.gmra.mxu3 %v2504_v62 }
 0x389   : > { %3130 = vmatpush.bf16.msrb.mxu1 %v4251_v28 }
 0x38a   : > { %v2226_v15 = vpop.f32.mrf.mxu0 }
 0x38b   : > { %v2227_v14 = vadd.f32 %v2226_v15, %v5410_v63  ;;  %v4239_v15 = vld [vmem:[%s5627_s27 + $0x8] sm:$0xff] }
 0x38d   : > { %v2336_v45 = vpop.f32.mrf.mxu2  ;;  %3131 = vmatpush.bf16.msrb.mxu1 %v4250_v4 }
 0x38e   : > { %v2425_v6 = vadd.f32 %v2336_v45, %v2215_v2  ;;  %v4240_v2 = vld [vmem:[%s5627_s27 + $0x10] sm:$0xff] }
 0x38f   : > { %3084 = vmatpush.bf16.msrb.mxu0 %v4240_v2 }
 0x390   : > { %v2457_v41 = vmax.f32 %v2425_v6, 0.0 }
 0x391   : > { %3132 = vmatpush.bf16.msrb.mxu1 %v4249_v52 }
 0x392   : > { %v2229_v24 = vpop.f32.mrf.mxu0 }
 0x393   : > { %v2230_v38 = vadd.f32 %v2229_v24, %v5410_v63  ;;  %3085 = vmatpush.bf16.msrb.mxu0 %v4239_v15 }
 0x395   : > { %v2338_v55 = vpop.f32.mrf.mxu2  ;;  %v2761_v26 = vpop.f32.mrf.mxu1 }
 0x396   : > { %v2427_v8 = vadd.f32 %v2338_v55, %v2217_v3  ;;  %v4248_v3 = vld [vmem:[%s5627_s27 + $0x50] sm:$0xff] }
 0x397   : > { %3133 = vmatpush.bf16.msrb.mxu1 %v4248_v3 }
 0x398   : > { %v2459_v56 = vmax.f32 %v2427_v8, 0.0 }
 0x39a   : > { %v2489_v10 = vpack.c.bf16 %v2459_v56, %v2457_v41  ;;  %v2231_v53 = vpop.f32.mrf.mxu0 }
 0x39b   : > { %v2232_v39 = vadd.f32 %v2231_v53, %v5410_v63  ;;  %v2252_v53 = vadd.f32 %v5407_v61, %v5410_v63 }
 0x39c   : > { %2711 = vmatmul.bf16.vlgmr.msra.gmra.mxu0 %v2489_v10  ;;  %2809 = vmatmul.bf16.vlgmr.msra.gmra.mxu2 %v2489_v10 }
 0x39d   : > { %v2341_v11 = vpop.f32.mrf.mxu2 }
 0x39e   : > { %v2429_v17 = vadd.f32 %v2341_v11, %v2220_v13  ;;  %v4247_v13 = vld [vmem:[%s5627_s27 + $0x48] sm:$0xff] }
 0x39f   : > { %3134 = vmatpush.bf16.msrb.mxu1 %v4247_v13 }
 0x3a0   : > { %v2461_v20 = vmax.f32 %v2429_v17, 0.0 }
 0x3a2   : > { %v2234_v36 = vpop.f32.mrf.mxu0 }
 0x3a3   : > { %v2235_v54 = vadd.f32 %v2234_v36, %v5410_v63 }
 0x3a5   : > { %v2343_v7 = vpop.f32.mrf.mxu2 }
 0x3a6   : > { %v2431_v18 = vadd.f32 %v2343_v7, %v2222_v16 }
 0x3a8   : > { %v2463_v21 = vmax.f32 %v2431_v18, 0.0 }
 0x3aa   : > { %v2491_v22 = vpack.c.bf16 %v2463_v21, %v2461_v20  ;;  %v2236_v49 = vpop.f32.mrf.mxu0 }
 0x3ab   : > { %v2237_v57 = vadd.f32 %v2236_v49, %v5410_v63 }
 0x3ac   : > { %2716 = vmatmul.bf16.gmra.mxu0 %v2491_v22  ;;  %2814 = vmatmul.bf16.gmra.mxu2 %v2491_v22 }
 0x3ad   : > { %v2346_v25 = vpop.f32.mrf.mxu2 }
 0x3ae   : > { %v2433_v30 = vadd.f32 %v2346_v25, %v2225_v29  ;;  %v4238_v29 = vld [vmem:[%s5627_s27] sm:$0xff] }
 0x3af   : > { %3086 = vmatpush.bf16.msrb.mxu0 %v4238_v29 }
 0x3b0   : > { %v2465_v33 = vmax.f32 %v2433_v30, 0.0  ;;  %v2859_v30 = vpop.f32.mrf.mxu3 }
 0x3b2   : > { %v2239_v31 = vpop.f32.mrf.mxu0 }
 0x3b3   : > { %v2240_v6 = vadd.f32 %v2239_v31, %v5410_v63 }
 0x3b5   : > { %v2348_v32 = vpop.f32.mrf.mxu2 }
 0x3b6   : > { %v2435_v23 = vadd.f32 %v2348_v32, %v2227_v14  ;;  %v2250_v14 = vadd.f32 %v5404_v51, %v5410_v63 }
 0x3b8   : > { %v2467_v34 = vmax.f32 %v2435_v23, 0.0  ;;  %v4246_v23 = vld [vmem:[%s5627_s27 + $0x40] sm:$0xff]  ;;  %v2861_v4 = vpop.f32.mrf.mxu3 }
 0x3b9   : > { %3135 = vmatpush.bf16.msrb.mxu1 %v4246_v23 }
 0x3ba   : > { %v2493_v35 = vpack.c.bf16 %v2467_v34, %v2465_v33  ;;  %v2241_v0 = vpop.f32.mrf.mxu0 }
 0x3bb   : > { %v2242_v55 = vadd.f32 %v2241_v0, %v5410_v63 }
 0x3bc   : > { %2721 = vmatmul.bf16.gmra.mxu0 %v2493_v35  ;;  %2819 = vmatmul.bf16.gmra.mxu2 %v2493_v35  ;;  %v2763_v35 = vpop.f32.mrf.mxu1 }
 0x3bd   : > { %v2351_v19 = vpop.f32.mrf.mxu2 }
 0x3be   : > { %v2437_v40 = vadd.f32 %v2351_v19, %v2230_v38 }
 0x3c0   : > { %v2469_v47 = vmax.f32 %v2437_v40, 0.0  ;;  %v2864_v38 = vpop.f32.mrf.mxu3 }
 0x3c2   : > { %v2244_v56 = vpop.f32.mrf.mxu0 }
 0x3c3   : > { %v2245_v17 = vadd.f32 %v2244_v56, %v5410_v63 }
 0x3c4   : > { %v2766_v51 = vpop.f32.mrf.mxu1 }
 0x3c5   : > { %v2353_v43 = vpop.f32.mrf.mxu2 }
 0x3c6   : > { %v2439_v46 = vadd.f32 %v2353_v43, %v2232_v39  ;;  %v2505_v39 = vld [vmem:[#allocation12] sm:$0x3] }
 0x3c7   : > { %v5478_v61 = vperm.slane %v2505_v39, 0 }
 0x3c8   : > { %v2471_v48 = vmax.f32 %v2439_v46, 0.0 }
 0x3ca   : > { %v2495_v5 = vpack.c.bf16 %v2471_v48, %v2469_v47  ;;  %v2246_v16 = vpop.f32.mrf.mxu0  ;;  %v5481_v47 = vperm.slane %v2505_v39, 1  ;;  %v2866_v48 = vpop.f32.mrf.mxu3 }
 0x3cb   : > { %v2247_v7 = vadd.f32 %v2246_v16, %v5410_v63 }
 0x3cc   : > { %2726 = vmatmul.bf16.gmra.mxu0 %v2495_v5  ;;  %2824 = vmatmul.bf16.gmra.mxu2 %v2495_v5  ;;  %v2768_v63 = vpop.f32.mrf.mxu1 }
 0x3cd   : > { %v2356_v50 = vpop.f32.mrf.mxu2 }
 0x3ce   : > { %v2441_v58 = vadd.f32 %v2356_v50, %v2235_v54 }
 0x3d0   : > { %v2473_v62 = vmax.f32 %v2441_v58, 0.0 }
 0x3d2   : > { %v2869_v0 = vpop.f32.mrf.mxu3 }
 0x3d4   : > { %v2771_v54 = vpop.f32.mrf.mxu1 }
 0x3d5   : > { %v2358_v59 = vpop.f32.mrf.mxu2 }
 0x3d6   : > { %v2443_v60 = vadd.f32 %v2358_v59, %v2237_v57 }
 0x3d8   : > { %v2475_v1 = vmax.f32 %v2443_v60, 0.0 }
 0x3da   : > { %v2497_v45 = vpack.c.bf16 %v2475_v1, %v2473_v62 }
 0x3dc   : > { %2731 = vmatmul.bf16.gmra.mxu0 %v2497_v45  ;;  %2829 = vmatmul.bf16.gmra.mxu2 %v2497_v45 }
 0x3dd   : > { %v2361_v44 = vpop.f32.mrf.mxu2 }
 0x3de   : > { %v2445_v8 = vadd.f32 %v2361_v44, %v2240_v6 }
 0x3e0   : > { %v2477_v10 = vmax.f32 %v2445_v8, 0.0 }
 0x3e5   : > { %v2363_v9 = vpop.f32.mrf.mxu2 }
 0x3e6   : > { %v2447_v41 = vadd.f32 %v2363_v9, %v2242_v55  ;;  %v2773_v55 = vpop.f32.mrf.mxu1 }
 0x3e8   : > { %v2479_v11 = vmax.f32 %v2447_v41, 0.0 }
 0x3ea   : > { %v2499_v42 = vpack.c.bf16 %v2479_v11, %v2477_v10 }
 0x3ec   : > { %2736 = vmatmul.bf16.gmra.mxu0 %v2499_v42  ;;  %2834 = vmatmul.bf16.gmra.mxu2 %v2499_v42  ;;  %v2871_v42 = vpop.f32.mrf.mxu3 }
 0x3ed   : > { %v2366_v12 = vpop.f32.mrf.mxu2 }
 0x3ee   : > { %v2449_v18 = vadd.f32 %v2366_v12, %v2245_v17 }
 0x3f0   : > { %v2481_v22 = vmax.f32 %v2449_v18, 0.0  ;;  %v2776_v18 = vpop.f32.mrf.mxu1 }
 0x3f5   : > { %v2368_v20 = vpop.f32.mrf.mxu2 }
 0x3f6   : > { %v2451_v21 = vadd.f32 %v2368_v20, %v2247_v7 }
 0x3f8   : > { %v2483_v24 = vmax.f32 %v2451_v21, 0.0 }
 0x3fa   : > { %v2501_v25 = vpack.c.bf16 %v2483_v24, %v2481_v22 }
 0x3fc   : > { %2741 = vmatmul.bf16.gmra.mxu0 %v2501_v25  ;;  %2839 = vmatmul.bf16.gmra.mxu2 %v2501_v25 }
 0x3fd   : > { %v2371_v28 = vpop.f32.mrf.mxu2 }
 0x3fe   : > { %v2453_v32 = vadd.f32 %v2371_v28, %v2250_v14  ;;  %v2874_v28 = vpop.f32.mrf.mxu3 }
 0x400   : > { %v2485_v19 = vmax.f32 %v2453_v32, 0.0  ;;  %v2778_v32 = vpop.f32.mrf.mxu1 }
 0x405   : > { %v2373_v33 = vpop.f32.mrf.mxu2 }
 0x406   : > { %v2455_v34 = vadd.f32 %v2373_v33, %v2252_v53 }
 0x408   : > { %v2487_v36 = vmax.f32 %v2455_v34, 0.0 }
 0x40a   : > { %v2503_v37 = vpack.c.bf16 %v2487_v36, %v2485_v19 }
 0x40c   : > { %2746 = vmatmul.bf16.gmra.mxu0 %v2503_v37  ;;  %2844 = vmatmul.bf16.gmra.mxu2 %v2503_v37 }
 0x419   : > { %v2712_v40 = vpop.f32.mrf.mxu0 }
 0x41a   : > { %v2713_v43 = vadd.f32 %v2712_v40, %v5478_v61 }
 0x41c   : > { %v2762_v5 = vadd.f32 %v2761_v26, %v2713_v43  ;;  %v2781_v43 = vpop.f32.mrf.mxu1 }
 0x41e   : > { %v2899_v31 = vmax.f32 %v2762_v5, 0.0 }
 0x41f   : > { %v2810_v46 = vpop.f32.mrf.mxu2 }
 0x420   : > { %v2811_v27 = vadd.f32 %v2810_v46, %v5481_v47 }
 0x421   : > { %v2714_v49 = vpop.f32.mrf.mxu0 }
 0x422   : > { %v2715_v50 = vadd.f32 %v2714_v49, %v5478_v61  ;;  %v2860_v59 = vadd.f32 %v2859_v30, %v2811_v27 }
 0x424   : > { %v2764_v52 = vadd.f32 %v2763_v35, %v2715_v50  ;;  %v2900_v44 = vmax.f32 %v2860_v59, 0.0  ;;  %v2783_v59 = vpop.f32.mrf.mxu1 }
 0x426   : > { %v2901_v57 = vmax.f32 %v2764_v52, 0.0 }
 0x427   : > { %v2812_v58 = vpop.f32.mrf.mxu2 }
 0x428   : > { %v2931_v60 = vpack.c.bf16 %v2901_v57, %v2899_v31  ;;  %v2813_v62 = vadd.f32 %v2812_v58, %v5481_v47 }
 0x429   : > { %v2717_v1 = vpop.f32.mrf.mxu0 }
 0x42a   : > { %v2862_v45 = vadd.f32 %v2861_v4, %v2813_v62  ;;  %3087 = vmatmul.bf16.vlgmr.msrb.gmra.mxu0 %v2931_v60  ;;  %v2718_v6 = vadd.f32 %v2717_v1, %v5478_v61 }
 0x42c   : > { %v2902_v2 = vmax.f32 %v2862_v45, 0.0  ;;  %v2767_v41 = vadd.f32 %v2766_v51, %v2718_v6  ;;  %v2876_v51 = vpop.f32.mrf.mxu3 }
 0x42e   : > { %v2932_v3 = vpack.c.bf16 %v2902_v2, %v2900_v44  ;;  %v2903_v12 = vmax.f32 %v2767_v41, 0.0  ;;  %v2786_v41 = vpop.f32.mrf.mxu1 }
 0x42f   : > { %v2815_v8 = vpop.f32.mrf.mxu2 }
 0x430   : > { %3136 = vmatmul.bf16.vlgmr.msrb.gmra.mxu1 %v2932_v3  ;;  %v2816_v10 = vadd.f32 %v2815_v8, %v5481_v47 }
 0x431   : > { %v2719_v9 = vpop.f32.mrf.mxu0 }
 0x432   : > { %v2720_v56 = vadd.f32 %v2719_v9, %v5478_v61  ;;  %v2865_v16 = vadd.f32 %v2864_v38, %v2816_v10 }
 0x434   : > { %v2769_v11 = vadd.f32 %v2768_v63, %v2720_v56  ;;  %v2904_v22 = vmax.f32 %v2865_v16, 0.0  ;;  %v2879_v52 = vpop.f32.mrf.mxu3 }
 0x436   : > { %v2905_v15 = vmax.f32 %v2769_v11, 0.0 }
 0x437   : > { %v2817_v13 = vpop.f32.mrf.mxu2 }
 0x438   : > { %v2818_v17 = vadd.f32 %v2817_v13, %v5481_v47  ;;  %v2933_v7 = vpack.c.bf16 %v2905_v15, %v2903_v12 }
 0x439   : > { %v2722_v20 = vpop.f32.mrf.mxu0 }
 0x43a   : > { %v2867_v21 = vadd.f32 %v2866_v48, %v2818_v17  ;;  %3092 = vmatmul.bf16.gmra.mxu0 %v2933_v7  ;;  %v2723_v25 = vadd.f32 %v2722_v20, %v5478_v61 }
 0x43c   : > { %v2906_v24 = vmax.f32 %v2867_v21, 0.0  ;;  %v2772_v30 = vadd.f32 %v2771_v54, %v2723_v25  ;;  %v2881_v6 = vpop.f32.mrf.mxu3 }
 0x43e   : > { %v2934_v26 = vpack.c.bf16 %v2906_v24, %v2904_v22  ;;  %v2907_v34 = vmax.f32 %v2772_v30, 0.0  ;;  %v2788_v24 = vpop.f32.mrf.mxu1 }
 0x43f   : > { %v2820_v29 = vpop.f32.mrf.mxu2 }
 0x440   : > { %3141 = vmatmul.bf16.gmra.mxu1 %v2934_v26  ;;  %v2821_v23 = vadd.f32 %v2820_v29, %v5481_v47 }
 0x441   : > { %v2724_v14 = vpop.f32.mrf.mxu0 }
 0x442   : > { %v2725_v53 = vadd.f32 %v2724_v14, %v5478_v61  ;;  %v2870_v36 = vadd.f32 %v2869_v0, %v2821_v23 }
 0x444   : > { %v2774_v33 = vadd.f32 %v2773_v55, %v2725_v53  ;;  %v2908_v40 = vmax.f32 %v2870_v36, 0.0  ;;  %v2884_v16 = vpop.f32.mrf.mxu3 }
 0x446   : > { %v2909_v35 = vmax.f32 %v2774_v33, 0.0 }
 0x447   : > { %v2822_v19 = vpop.f32.mrf.mxu2 }
 0x448   : > { %v2823_v37 = vadd.f32 %v2822_v19, %v5481_v47  ;;  %v2935_v4 = vpack.c.bf16 %v2909_v35, %v2907_v34  ;;  %v2791_v35 = vpop.f32.mrf.mxu1 }
 0x449   : > { %v2727_v38 = vpop.f32.mrf.mxu0 }
 0x44a   : > { %v2872_v39 = vadd.f32 %v2871_v42, %v2823_v37  ;;  %3097 = vmatmul.bf16.gmra.mxu0 %v2935_v4  ;;  %v2728_v46 = vadd.f32 %v2727_v38, %v5478_v61 }
 0x44c   : > { %v2910_v63 = vmax.f32 %v2872_v39, 0.0  ;;  %v2777_v50 = vadd.f32 %v2776_v18, %v2728_v46  ;;  %v2886_v30 = vpop.f32.mrf.mxu3 }
 0x44e   : > { %v2936_v48 = vpack.c.bf16 %v2910_v63, %v2908_v40  ;;  %v2911_v57 = vmax.f32 %v2777_v50, 0.0 }
 0x44f   : > { %v2825_v49 = vpop.f32.mrf.mxu2 }
 0x450   : > { %3146 = vmatmul.bf16.gmra.mxu1 %v2936_v48  ;;  %v2826_v54 = vadd.f32 %v2825_v49, %v5481_v47 }
 0x451   : > { %v2729_v5 = vpop.f32.mrf.mxu0 }
 0x452   : > { %v2730_v27 = vadd.f32 %v2729_v5, %v5478_v61  ;;  %v2875_v62 = vadd.f32 %v2874_v28, %v2826_v54  ;;  %v2793_v5 = vpop.f32.mrf.mxu1 }
 0x454   : > { %v2779_v31 = vadd.f32 %v2778_v32, %v2730_v27  ;;  %v2912_v2 = vmax.f32 %v2875_v62, 0.0  ;;  %v2889_v63 = vpop.f32.mrf.mxu3 }
 0x456   : > { %v2913_v58 = vmax.f32 %v2779_v31, 0.0 }
 0x457   : > { %v2827_v60 = vpop.f32.mrf.mxu2 }
 0x458   : > { %v2828_v1 = vadd.f32 %v2827_v60, %v5481_v47  ;;  %v2937_v45 = vpack.c.bf16 %v2913_v58, %v2911_v57 }
 0x459   : > { %v2732_v0 = vpop.f32.mrf.mxu0 }
 0x45a   : > { %v2877_v44 = vadd.f32 %v2876_v51, %v2828_v1  ;;  %3102 = vmatmul.bf16.gmra.mxu0 %v2937_v45  ;;  %v2733_v55 = vadd.f32 %v2732_v0, %v5478_v61 }
 0x45c   : > { %v2914_v3 = vmax.f32 %v2877_v44, 0.0  ;;  %v2782_v10 = vadd.f32 %v2781_v43, %v2733_v55  ;;  %v2891_v58 = vpop.f32.mrf.mxu3  ;;  %v2796_v44 = vpop.f32.mrf.mxu1 }
 0x45e   : > { %v2938_v8 = vpack.c.bf16 %v2914_v3, %v2912_v2  ;;  %v2915_v15 = vmax.f32 %v2782_v10, 0.0 }
 0x45f   : > { %v2830_v9 = vpop.f32.mrf.mxu2 }
 0x460   : > { %3151 = vmatmul.bf16.gmra.mxu1 %v2938_v8  ;;  %v2831_v42 = vadd.f32 %v2830_v9, %v5481_v47 }
 0x461   : > { %v2734_v56 = vpop.f32.mrf.mxu0 }
 0x462   : > { %v2735_v11 = vadd.f32 %v2734_v56, %v5478_v61  ;;  %v2880_v7 = vadd.f32 %v2879_v52, %v2831_v42 }
 0x464   : > { %v2784_v12 = vadd.f32 %v2783_v59, %v2735_v11  ;;  %v2916_v25 = vmax.f32 %v2880_v7, 0.0 }
 0x466   : > { %v2917_v13 = vmax.f32 %v2784_v12, 0.0  ;;  %v2798_v12 = vpop.f32.mrf.mxu1 }
 0x467   : > { %v2832_v17 = vpop.f32.mrf.mxu2 }
 0x468   : > { %v2833_v18 = vadd.f32 %v2832_v17, %v5481_v47  ;;  %v2939_v20 = vpack.c.bf16 %v2917_v13, %v2915_v15 }
 0x469   : > { %v2737_v21 = vpop.f32.mrf.mxu0 }
 0x46a   : > { %v2882_v22 = vadd.f32 %v2881_v6, %v2833_v18  ;;  %3107 = vmatmul.bf16.gmra.mxu0 %v2939_v20  ;;  %v2738_v28 = vadd.f32 %v2737_v21, %v5478_v61 }
 0x46c   : > { %v2918_v26 = vmax.f32 %v2882_v22, 0.0  ;;  %v2787_v32 = vadd.f32 %v2786_v41, %v2738_v28  ;;  %v2894_v41 = vpop.f32.mrf.mxu3 }
 0x46e   : > { %v2940_v29 = vpack.c.bf16 %v2918_v26, %v2916_v25  ;;  %v2919_v19 = vmax.f32 %v2787_v32, 0.0 }
 0x46f   : > { %v2835_v14 = vpop.f32.mrf.mxu2 }
 0x470   : > { %3156 = vmatmul.bf16.gmra.mxu1 %v2940_v29  ;;  %v2836_v33 = vadd.f32 %v2835_v14, %v5481_v47  ;;  %v5517_v29 = vld [vmem:[%s5628_s20] ss:$0 sm:$0xff] }
 0x471   : > { %v2739_v53 = vpop.f32.mrf.mxu0 }
 0x472   : > { %v2740_v23 = vadd.f32 %v2739_v53, %v5478_v61  ;;  %v2885_v4 = vadd.f32 %v2884_v16, %v2836_v33 }
 0x474   : > { %v2789_v34 = vadd.f32 %v2788_v24, %v2740_v23  ;;  %v2920_v43 = vmax.f32 %v2885_v4, 0.0  ;;  %v2896_v22 = vpop.f32.mrf.mxu3 }
 0x476   : > { %v2921_v36 = vmax.f32 %v2789_v34, 0.0 }
 0x477   : > { %v2837_v37 = vpop.f32.mrf.mxu2 }
 0x478   : > { %v2838_v51 = vadd.f32 %v2837_v37, %v5481_v47  ;;  %v2941_v38 = vpack.c.bf16 %v2921_v36, %v2919_v19 }
 0x479   : > { %v2742_v39 = vpop.f32.mrf.mxu0 }
 0x47a   : > { %v2887_v40 = vadd.f32 %v2886_v30, %v2838_v51  ;;  %3112 = vmatmul.bf16.gmra.mxu0 %v2941_v38  ;;  %v2743_v48 = vadd.f32 %v2742_v39, %v5478_v61 }
 0x47c   : > { %v2922_v46 = vmax.f32 %v2887_v40, 0.0  ;;  %v2792_v52 = vadd.f32 %v2791_v35, %v2743_v48 }
 0x47e   : > { %v2942_v49 = vpack.c.bf16 %v2922_v46, %v2920_v43  ;;  %v2923_v59 = vmax.f32 %v2792_v52, 0.0 }
 0x47f   : > { %v2840_v50 = vpop.f32.mrf.mxu2 }
 0x480   : > { %3161 = vmatmul.bf16.gmra.mxu1 %v2942_v49  ;;  %v2841_v31 = vadd.f32 %v2840_v50, %v5481_v47 }
 0x481   : > { %v2744_v27 = vpop.f32.mrf.mxu0 }
 0x482   : > { %v2745_v54 = vadd.f32 %v2744_v27, %v5478_v61  ;;  %v2890_v1 = vadd.f32 %v2889_v63, %v2841_v31 }
 0x484   : > { %v2794_v57 = vadd.f32 %v2793_v5, %v2745_v54  ;;  %v2924_v6 = vmax.f32 %v2890_v1, 0.0 }
 0x486   : > { %v2925_v60 = vmax.f32 %v2794_v57, 0.0 }
 0x487   : > { %v2842_v62 = vpop.f32.mrf.mxu2 }
 0x488   : > { %v2843_v45 = vadd.f32 %v2842_v62, %v5481_v47  ;;  %v2943_v0 = vpack.c.bf16 %v2925_v60, %v2923_v59 }
 0x489   : > { %v2747_v2 = vpop.f32.mrf.mxu0 }
 0x48a   : > { %v2892_v3 = vadd.f32 %v2891_v58, %v2843_v45  ;;  %3117 = vmatmul.bf16.gmra.mxu0 %v2943_v0  ;;  %v2748_v8 = vadd.f32 %v2747_v2, %v5478_v61 }
 0x48c   : > { %v2926_v55 = vmax.f32 %v2892_v3, 0.0  ;;  %v2797_v11 = vadd.f32 %v2796_v44, %v2748_v8 }
 0x48e   : > { %v2944_v9 = vpack.c.bf16 %v2926_v55, %v2924_v6  ;;  %v2927_v16 = vmax.f32 %v2797_v11, 0.0 }
 0x48f   : > { %v2845_v56 = vpop.f32.mrf.mxu2 }
 0x490   : > { %3166 = vmatmul.bf16.gmra.mxu1 %v2944_v9  ;;  %v2846_v15 = vadd.f32 %v2845_v56, %v5481_v47 }
 0x491   : > { %v2749_v10 = vpop.f32.mrf.mxu0 }
 0x492   : > { %v2750_v42 = vadd.f32 %v2749_v10, %v5478_v61  ;;  %v2895_v18 = vadd.f32 %v2894_v41, %v2846_v15 }
 0x494   : > { %v2799_v13 = vadd.f32 %v2798_v12, %v2750_v42  ;;  %v2928_v25 = vmax.f32 %v2895_v18, 0.0 }
 0x496   : > { %v2929_v17 = vmax.f32 %v2799_v13, 0.0 }
 0x497   : > { %v2847_v7 = vpop.f32.mrf.mxu2 }
 0x498   : > { %v2848_v20 = vadd.f32 %v2847_v7, %v5481_v47  ;;  %v2945_v21 = vpack.c.bf16 %v2929_v17, %v2927_v16 }
 0x49a   : > { %v2897_v24 = vadd.f32 %v2896_v22, %v2848_v20  ;;  %3122 = vmatmul.bf16.gmra.mxu0 %v2945_v21 }
 0x49c   : > { %v2930_v26 = vmax.f32 %v2897_v24, 0.0 }
 0x49e   : > { %v2946_v28 = vpack.c.bf16 %v2930_v26, %v2928_v25 }
 0x4a0   : > { %3171 = vmatmul.bf16.gmra.mxu1 %v2946_v28 }
 0x4a7   : > { %v3088_v61 = vpop.f32.mrf.mxu0 }
 0x4a8   : > { %v3089_v14 = vadd.f32 %v5517_v29, %v3088_v61 }
 0x4ad   : > { %v3137_v30 = vpop.f32.mrf.mxu1 }
 0x4ae   : > { %v3138_v53 = vadd.f32 %v3137_v30, %v3089_v14 }
 0x4af   : > { %v3090_v47 = vpop.f32.mrf.mxu0 }
 0x4b0   : > { %4381 = vtanh.f32 %v3138_v53  ;;  %v3091_v32 = vadd.f32 %v5517_v29, %v3090_v47 }
 0x4b5   : > { %v3139_v23 = vpop.f32.mrf.mxu1 }
 0x4b6   : > { %v4382_v33 = vpop.eup %4381  ;;  %v3140_v34 = vadd.f32 %v3139_v23, %v3091_v32 }
 0x4b7   : > { %3194 = vst.msk [vmem:[%s5524_s16] sm:$0xff] %vm3193_vm1, %v4382_v33  ;;  %v3093_v35 = vpop.f32.mrf.mxu0 }
 0x4b8   : > { %4383 = vtanh.f32 %v3140_v34  ;;  %v3094_v19 = vadd.f32 %v5517_v29, %v3093_v35 }
 0x4bd   : > { %v3142_v36 = vpop.f32.mrf.mxu1 }
 0x4be   : > { %v4384_v37 = vpop.eup %4383  ;;  %v3143_v4 = vadd.f32 %v3142_v36, %v3094_v19 }
 0x4bf   : > { %3195 = vst.msk [vmem:[%s5524_s16 + $0x8] sm:$0xff] %vm3193_vm1, %v4384_v37  ;;  %v3095_v51 = vpop.f32.mrf.mxu0 }
 0x4c0   : > { %4385 = vtanh.f32 %v3143_v4  ;;  %v3096_v38 = vadd.f32 %v5517_v29, %v3095_v51 }
 0x4c5   : > { %v3144_v39 = vpop.f32.mrf.mxu1 }
 0x4c6   : > { %v4386_v40 = vpop.eup %4385  ;;  %v3145_v63 = vadd.f32 %v3144_v39, %v3096_v38 }
 0x4c7   : > { %3196 = vst.msk [vmem:[%s5524_s16 + $0x10] sm:$0xff] %vm3193_vm1, %v4386_v40  ;;  %v3098_v43 = vpop.f32.mrf.mxu0 }
 0x4c8   : > { %4387 = vtanh.f32 %v3145_v63  ;;  %v3099_v46 = vadd.f32 %v5517_v29, %v3098_v43 }
 0x4cd   : > { %v3147_v48 = vpop.f32.mrf.mxu1 }
 0x4ce   : > { %v4388_v49 = vpop.eup %4387  ;;  %v3148_v5 = vadd.f32 %v3147_v48, %v3099_v46 }
 0x4cf   : > { %3197 = vst.msk [vmem:[%s5524_s16 + $0x18] sm:$0xff] %vm3193_vm1, %v4388_v49  ;;  %v3100_v50 = vpop.f32.mrf.mxu0 }
 0x4d0   : > { %4389 = vtanh.f32 %v3148_v5  ;;  %v3101_v27 = vadd.f32 %v5517_v29, %v3100_v50 }
 0x4d5   : > { %v3149_v52 = vpop.f32.mrf.mxu1 }
 0x4d6   : > { %v4390_v54 = vpop.eup %4389  ;;  %v3150_v31 = vadd.f32 %v3149_v52, %v3101_v27 }
 0x4d7   : > { %3198 = vst.msk [vmem:[%s5524_s16 + $0x20] sm:$0xff] %vm3193_vm1, %v4390_v54  ;;  %v3103_v57 = vpop.f32.mrf.mxu0 }
 0x4d8   : > { %4391 = vtanh.f32 %v3150_v31  ;;  %v3104_v58 = vadd.f32 %v5517_v29, %v3103_v57 }
 0x4dd   : > { %v3152_v59 = vpop.f32.mrf.mxu1 }
 0x4de   : > { %v4392_v60 = vpop.eup %4391  ;;  %v3153_v62 = vadd.f32 %v3152_v59, %v3104_v58 }
 0x4df   : > { %3199 = vst.msk [vmem:[%s5524_s16 + $0x28] sm:$0xff] %vm3193_vm1, %v4392_v60  ;;  %v3105_v1 = vpop.f32.mrf.mxu0 }
 0x4e0   : > { %4393 = vtanh.f32 %v3153_v62  ;;  %v3106_v45 = vadd.f32 %v5517_v29, %v3105_v1 }
 0x4e5   : > { %v3154_v0 = vpop.f32.mrf.mxu1 }
 0x4e6   : > { %v4394_v44 = vpop.eup %4393  ;;  %v3155_v2 = vadd.f32 %v3154_v0, %v3106_v45 }
 0x4e7   : > { %3200 = vst.msk [vmem:[%s5524_s16 + $0x30] sm:$0xff] %vm3193_vm1, %v4394_v44  ;;  %v3108_v3 = vpop.f32.mrf.mxu0 }
 0x4e8   : > { %4395 = vtanh.f32 %v3155_v2  ;;  %v3109_v6 = vadd.f32 %v5517_v29, %v3108_v3 }
 0x4ed   : > { %v3157_v55 = vpop.f32.mrf.mxu1 }
 0x4ee   : > { %v4396_v8 = vpop.eup %4395  ;;  %v3158_v9 = vadd.f32 %v3157_v55, %v3109_v6 }
 0x4ef   : > { %3201 = vst.msk [vmem:[%s5524_s16 + $0x38] sm:$0xff] %vm3193_vm1, %v4396_v8  ;;  %v3110_v41 = vpop.f32.mrf.mxu0 }
 0x4f0   : > { %4397 = vtanh.f32 %v3158_v9  ;;  %v3111_v56 = vadd.f32 %v5517_v29, %v3110_v41 }
 0x4f5   : > { %v3159_v10 = vpop.f32.mrf.mxu1 }
 0x4f6   : > { %v4398_v11 = vpop.eup %4397  ;;  %v3160_v42 = vadd.f32 %v3159_v10, %v3111_v56 }
 0x4f7   : > { %3202 = vst.msk [vmem:[%s5524_s16 + $0x40] sm:$0xff] %vm3193_vm1, %v4398_v11  ;;  %v3113_v12 = vpop.f32.mrf.mxu0 }
 0x4f8   : > { %4399 = vtanh.f32 %v3160_v42  ;;  %v3114_v15 = vadd.f32 %v5517_v29, %v3113_v12 }
 0x4fd   : > { %v3162_v13 = vpop.f32.mrf.mxu1 }
 0x4fe   : > { %v4400_v16 = vpop.eup %4399  ;;  %v3163_v17 = vadd.f32 %v3162_v13, %v3114_v15 }
 0x4ff   : > { %3203 = vst.msk [vmem:[%s5524_s16 + $0x48] sm:$0xff] %vm3193_vm1, %v4400_v16  ;;  %v3115_v7 = vpop.f32.mrf.mxu0 }
 0x500   : > { %4401 = vtanh.f32 %v3163_v17  ;;  %v3116_v18 = vadd.f32 %v5517_v29, %v3115_v7 }
 0x505   : > { %v3164_v20 = vpop.f32.mrf.mxu1 }
 0x506   : > { %v4402_v21 = vpop.eup %4401  ;;  %v3165_v22 = vadd.f32 %v3164_v20, %v3116_v18 }
 0x507   : > { %3204 = vst.msk [vmem:[%s5524_s16 + $0x50] sm:$0xff] %vm3193_vm1, %v4402_v21  ;;  %v3118_v24 = vpop.f32.mrf.mxu0 }
 0x508   : > { %4403 = vtanh.f32 %v3165_v22  ;;  %v3119_v25 = vadd.f32 %v5517_v29, %v3118_v24 }
 0x50d   : > { %v3167_v26 = vpop.f32.mrf.mxu1 }
 0x50e   : > { %v4404_v28 = vpop.eup %4403  ;;  %v3168_v61 = vadd.f32 %v3167_v26, %v3119_v25 }
 0x50f   : > { %3205 = vst.msk [vmem:[%s5524_s16 + $0x58] sm:$0xff] %vm3193_vm1, %v4404_v28  ;;  %v3120_v14 = vpop.f32.mrf.mxu0 }
 0x510   : > { %4405 = vtanh.f32 %v3168_v61  ;;  %v3121_v30 = vadd.f32 %v5517_v29, %v3120_v14 }
 0x515   : > { %v3169_v53 = vpop.f32.mrf.mxu1 }
 0x516   : > { %v4406_v47 = vpop.eup %4405  ;;  %v3170_v32 = vadd.f32 %v3169_v53, %v3121_v30 }
 0x517   : > { %3206 = vst.msk [vmem:[%s5524_s16 + $0x60] sm:$0xff] %vm3193_vm1, %v4406_v47  ;;  %v3123_v23 = vpop.f32.mrf.mxu0 }
 0x518   : > { %4407 = vtanh.f32 %v3170_v32  ;;  %v3124_v33 = vadd.f32 %v5517_v29, %v3123_v23 }
 0x51d   : > { %v3172_v34 = vpop.f32.mrf.mxu1 }
 0x51e   : > { %v4408_v35 = vpop.eup %4407  ;;  %v3173_v19 = vadd.f32 %v3172_v34, %v3124_v33 }
 0x51f   : > { %3207 = vst.msk [vmem:[%s5524_s16 + $0x68] sm:$0xff] %vm3193_vm1, %v4408_v35  ;;  %v3125_v36 = vpop.f32.mrf.mxu0 }
 0x520   : > { %4409 = vtanh.f32 %v3173_v19  ;;  %v3126_v37 = vadd.f32 %v5517_v29, %v3125_v36 }
 0x525   : > { %v3174_v4 = vpop.f32.mrf.mxu1 }
 0x526   : > { %v4410_v51 = vpop.eup %4409  ;;  %v3175_v38 = vadd.f32 %v3174_v4, %v3126_v37 }
 0x527   : > { %3208 = vst.msk [vmem:[%s5524_s16 + $0x70] sm:$0xff] %vm3193_vm1, %v4410_v51 }
 0x528   : > { %4411 = vtanh.f32 %v3175_v38 }
 0x52e   : > { %v4412_v39 = vpop.eup %4411 }
 0x52f   : > { %3209 = vst.msk [vmem:[%s5524_s16 + $0x78] sm:$0xff] %vm3193_vm1, %v4412_v39 }
 0x530 PF: > { %s5630_s14 = sld [smem:[#allocation17_spill]]  ;;  %s5631_s21 = smov %s4677_s23 }
 0x531   : > { %s5632_s22 = smov %s4681_s24  ;;  %s5633_s23 = smov %s5636_s17 }
 0x532   : > { %s5634_s24 = smov %s5640_s18 }
 0x536   : > { %s30_s25 = sadd.s32 1, %s5630_s14  }
 0x537   : > { %p27_p10 = scmp.ge.s32.totalorder %s30_s25, 6  }
 0x539   :  { %29 = sbr.rel (!%p27_p10) target bundleno = 16 (0x10), region = 149 }
 0x53e   :  { %3240 = vsyncpa [#allocation3], 1 }
 0x53f   :  { %3242 = vsyncpa [#allocation3 + $0x1], 1 }
 0x540   :  { %3243 = vsyncpa [#allocation5], 1 }
 0x541   :  { %3244 = vsyncpa [#allocation8], 1 }
 0x542   :  { %3245 = vsyncpa [#allocation11], 1 }

</bundles_post_ra>
